<compile_context>
chip_gen: v7x
topology: tpu7x:2x2x1
jax: 0.10.0
libtpu: 0.0.40
codegen_flags: <defaults>
</compile_context>

<pallas_src>
import functools

import jax
import jax.numpy as jnp
import numpy as np
from jax.experimental import pallas as pl
from jax.experimental.pallas import tpu as pltpu


# ----------------------------- Pallas kernel ---------------------------------
def _assemble_kernel(patch_ref, feat_ref, mix_ref, out_ref, *, c_lanes):
    """Assemble TN full patch rows, lane-dense.

    patch_ref : (TN, C*P2)               raw patch pixels (channels*pixels flattened)
    feat_ref  : (TN, F_POS + 1)          per-patch positional features + a 1.0 column
    mix_ref   : (F_POS + 1, 2*F_POS*P2)  constant mixing matrix:
                  rows 0..F_POS-1 : 0/1 selection broadcasting feature f over its
                                    P2 pixel lanes (per-patch section),
                  last row        : grid-invariant per-pixel feature slab.
    out_ref   : (TN, (C + 2*F_POS)*P2)
    """
    # 1) raw patch pixels: lanes [0, C*P2)
    out_ref[:, :c_lanes] = patch_ref[...]
    # 2) whole positional section (per-patch broadcast + per-pixel slab) in one MXU
    #    matmul: (TN, F_POS+1) @ (F_POS+1, 2*F_POS*P2). Exactly one nonzero (== 1.0)
    #    weight per output column, so the result is numerically exact; MXU is idle
    #    otherwise in this HBM-write-bound kernel, so this is free.
    out_ref[:, c_lanes:] = jnp.dot(
        feat_ref[...], mix_ref[...],
        precision=jax.lax.Precision.HIGHEST,
        preferred_element_type=jnp.float32,
    )


# ----------------------------- helpers ---------------------------------------
def _fourier_features(coords, nf):
    """coords (..., D) -> (..., D*2*nf): per coord dim [sin(f0..), cos(f0..)]."""
    freqs = 2.0 ** jnp.arange(nf, dtype=coords.dtype)
    angles = 2.0 * jnp.pi * coords[..., None] * freqs
    f = jnp.concatenate([jnp.sin(angles), jnp.cos(angles)], axis=-1)
    return f.reshape(*f.shape[:-2], -1)


def _round_up(x, m):
    return ((x + m - 1) // m) * m


# ----------------------------- forward wrapper --------------------------------
def patch_extractor_forward(image, patch_size, num_frequencies=8):
    """Pallas implementation of PatchExtractor.forward.

    image: (B, C, H, W) float32
    returns (patches, patches_with_coords, h_patches, w_patches)
    """
    B, C, H, W = image.shape
    p = patch_size
    pad_h = (-H) % p
    pad_w = (-W) % p
    image = jnp.pad(image, ((0, 0), (0, 0), (0, pad_h), (0, pad_w)))
    H, W = H + pad_h, W + pad_w
    hp, wp = H // p, W // p
    N = hp * wp
    P2 = p * p
    NF = num_frequencies
    F_POS = 2 + 4 * NF              # positional channels per section
    C_TOT = C + 2 * F_POS
    C_LANES = C * P2
    F_LANES = F_POS * P2
    OUT_LANES = C_TOT * P2

    image = image.astype(jnp.float32)

    # rearrange 'b c (h p1) (w p2) -> b (h w) c p1 p2' (XLA glue; tiny vs output write)
    patches5d = (image.reshape(B, C, hp, p, wp, p)
                 .transpose(0, 2, 4, 1, 3, 5)
                 .reshape(B, N, C, p, p))
    patches_flat = patches5d.reshape(B * N, C_LANES)       # free, contiguous, lane-dense

    # per-patch positional features (tiny: (B*N, F_POS)), plus a ones column that
    # selects the per-pixel slab row of the mixing matrix inside the kernel.
    y_norm = (jnp.arange(hp, dtype=jnp.float32) / (hp - 1)) if hp > 1 else jnp.zeros((hp,), jnp.float32)
    x_norm = (jnp.arange(wp, dtype=jnp.float32) / (wp - 1)) if wp > 1 else jnp.zeros((wp,), jnp.float32)
    coords = jnp.stack([jnp.tile(x_norm, hp), jnp.repeat(y_norm, wp)], axis=-1)    # (N, 2)
    patch_feats = jnp.concatenate([coords, _fourier_features(coords, NF)], -1)     # (N, F_POS)
    feat_aug = jnp.concatenate(
        [jnp.tile(patch_feats, (B, 1)), jnp.ones((B * N, 1), jnp.float32)], axis=-1)  # (B*N, F_POS+1)

    # per-pixel feature slab, precomputed once (grid-invariant)
    lin = jnp.linspace(0.0, 1.0, p, dtype=jnp.float32)
    yy, xx = jnp.meshgrid(lin, lin, indexing="ij")          # (p, p)
    xx_flat = xx.reshape(P2)
    yy_flat = yy.reshape(P2)
    xx_four = _fourier_features(xx_flat[:, None], NF)       # (P2, 2NF)
    yy_four = _fourier_features(yy_flat[:, None], NF)
    pix = jnp.concatenate([xx_flat[None], yy_flat[None], xx_four.T, yy_four.T], axis=0)  # (F_POS, P2)
    pix_flat = pix.reshape(1, F_LANES)

    # constant mixing matrix (F_POS+1, 2*F_LANES): selection block + per-pixel slab row
    sel = jnp.repeat(jnp.eye(F_POS, dtype=jnp.float32), P2, axis=1)   # (F_POS, F_LANES)
    mix = jnp.zeros((F_POS + 1, 2 * F_LANES), jnp.float32)
    mix = mix.at[:F_POS, :F_LANES].set(sel)
    mix = mix.at[F_POS:, F_LANES:].set(pix_flat)

    # --- tiling: ~4 MiB lane-dense output blocks, >=2 blocks when possible,
    #     rows padded up to a multiple of TN (no TN=1 divisor cliff) ---
    total = B * N
    out_bytes_per_row = OUT_LANES * 4
    cap = max(8, ((4 * 1024 * 1024) // out_bytes_per_row) // 8 * 8)
    half_rows = max(8, _round_up((total + 1) // 2, 8))      # keep >=2 blocks for v7x megacore
    TN = min(cap, half_rows)
    total_pad = _round_up(total, TN)
    num_blocks = total_pad // TN
    if total_pad > total:
        pad_rows = total_pad - total
        patches_flat = jnp.pad(patches_flat, ((0, pad_rows), (0, 0)))
        feat_aug = jnp.pad(feat_aug, ((0, pad_rows), (0, 0)))

    kernel = functools.partial(_assemble_kernel, c_lanes=C_LANES)

    # TODO(synk): when C*P2 is not a multiple of 128 (e.g. C=3, p=8) the single section
    # seam causes one masked edge store per block; left unpadded to preserve the exact
    # reference channel layout.
    out_flat = pl.pallas_call(
        kernel,
        out_shape=jax.ShapeDtypeStruct((total_pad, OUT_LANES), jnp.float32),
        grid=(num_blocks,),
        in_specs=[
            pl.BlockSpec((TN, C_LANES), lambda i: (i, 0)),              # raw patches
            pl.BlockSpec((TN, F_POS + 1), lambda i: (i, 0)),            # per-patch feats + 1
            pl.BlockSpec((F_POS + 1, 2 * F_LANES), lambda i: (0, 0)),   # constant mix (not re-fetched)
        ],
        out_specs=pl.BlockSpec((TN, OUT_LANES), lambda i: (i, 0)),
        compiler_params=pltpu.CompilerParams(
            dimension_semantics=("parallel",),
            vmem_limit_bytes=32 * 1024 * 1024),
    )(patches_flat, feat_aug, mix)

    patches_with_coords = out_flat[:total].reshape(B, N, C_TOT, p, p)
    return patches5d, patches_with_coords, hp, wp


# ----------------------- pure-JAX reference (for checking) --------------------
def reference_forward(image, patch_size, nf=8):
    B, C, H, W = image.shape
    p = patch_size
    pad_h = (-H) % p
    pad_w = (-W) % p
    image = jnp.pad(image, ((0, 0), (0, 0), (0, pad_h), (0, pad_w)))
    H, W = H + pad_h, W + pad_w
    hp, wp = H // p, W // p
    N = hp * wp
    patches = (image.reshape(B, C, hp, p, wp, p)
               .transpose(0, 2, 4, 1, 3, 5)
               .reshape(B, N, C, p, p)).astype(jnp.float32)
    coords = []
    for i in range(hp):
        for j in range(wp):
            x = j / (wp - 1) if wp > 1 else 0.0
            y = i / (hp - 1) if hp > 1 else 0.0
            coords.append([x, y])
    coords = jnp.array(coords, dtype=jnp.float32)                         # (N, 2)
    cf = _fourier_features(coords, nf)                                    # (N, 4nf)
    ppf = jnp.concatenate([coords, cf], axis=-1)                          # (N, 2+4nf)
    ppf = jnp.broadcast_to(ppf[None, :, :, None, None], (B, N, ppf.shape[-1], p, p))
    lin = jnp.linspace(0.0, 1.0, p, dtype=jnp.float32)
    yy, xx = jnp.meshgrid(lin, lin, indexing="ij")
    xxb = jnp.broadcast_to(xx[None, None], (B, N, p, p))
    yyb = jnp.broadcast_to(yy[None, None], (B, N, p, p))
    xx_f = jnp.transpose(_fourier_features(xxb[..., None], nf), (0, 1, 4, 2, 3))
    yy_f = jnp.transpose(_fourier_features(yyb[..., None], nf), (0, 1, 4, 2, 3))
    pix = jnp.concatenate([xxb[:, :, None], yyb[:, :, None], xx_f, yy_f], axis=2)
    out = jnp.concatenate([patches, ppf, pix], axis=2)
    return patches, out, hp, wp


if __name__ == "__main__":
    # small deterministic example: B=2, C=4, H=W=16, patch_size=8 -> 4 patches of 8x8
    key = jax.random.PRNGKey(0)
    image = jax.random.normal(key, (2, 4, 16, 16), dtype=jnp.float32)
    patch_size = 8
    num_frequencies = 8

    patches, patches_with_coords, hp, wp = patch_extractor_forward(
        image, patch_size, num_frequencies)
    jax.block_until_ready(patches_with_coords)

    # correctness check against a pure-JAX reference of the intended semantics
    patches_ref, pwc_ref, hp_ref, wp_ref = reference_forward(
        image, patch_size, num_frequencies)
    assert patches.shape == (2, 4, 4, 8, 8)
    assert patches_with_coords.shape == (2, 4, 4 + 2 * (2 + 4 * num_frequencies), 8, 8)
    assert (hp, wp) == (hp_ref, wp_ref) == (2, 2)
    np.testing.assert_allclose(np.asarray(patches), np.asarray(patches_ref),
                               rtol=1e-5, atol=1e-5)
    np.testing.assert_allclose(np.asarray(patches_with_coords), np.asarray(pwc_ref),
                               rtol=1e-5, atol=1e-5)

    print("KERNEL_OK")
</pallas_src>

<mosaic_0001>
module attributes {stable_mosaic.version = 11 : i64} {
  func.func @_assemble_kernel(%arg0: i32, %arg1: memref<8x256xf32, #tpu.memory_space<vmem>>, %arg2: memref<8x35xf32, #tpu.memory_space<vmem>>, %arg3: memref<35x4352xf32, #tpu.memory_space<vmem>>, %arg4: memref<8x4608xf32, #tpu.memory_space<vmem>>) attributes {dimension_semantics = [#tpu.dimension_semantics<parallel>], iteration_bounds = array<i64: 1>, scalar_prefetch = 0 : i64, scratch_operands = 0 : i64, tpu.core_type = #tpu.core_type<tc>, window_params = [{transform_indices = @transform_0, window_bounds = array<i64: 8, 256>}, {transform_indices = @transform_1, window_bounds = array<i64: 8, 35>}, {pipeline_mode = #tpu.pipeline_mode<synchronous>, transform_indices = @transform_2, window_bounds = array<i64: 35, 4352>}, {transform_indices = @transform_3, window_bounds = array<i64: 8, 4608>}]} {
    %c0 = arith.constant 0 : index
    %c0_0 = arith.constant 0 : index
    %0 = vector.load %arg1[%c0, %c0_0] : memref<8x256xf32, #tpu.memory_space<vmem>>, vector<8x256xf32>
    %c0_1 = arith.constant 0 : index
    %c0_2 = arith.constant 0 : index
    %1 = vector.load %arg4[%c0_1, %c0_2] : memref<8x4608xf32, #tpu.memory_space<vmem>>, vector<8x256xf32>
    tpu.vector_store %arg4[%c0_1, %c0_2], %0 {strides = array<i32>} : memref<8x4608xf32, #tpu.memory_space<vmem>>, vector<8x256xf32>,
    %c0_3 = arith.constant 0 : index
    %c0_4 = arith.constant 0 : index
    %2 = vector.load %arg2[%c0_3, %c0_4] : memref<8x35xf32, #tpu.memory_space<vmem>>, vector<8x35xf32>
    %c0_5 = arith.constant 0 : index
    %c0_6 = arith.constant 0 : index
    %3 = vector.load %arg3[%c0_5, %c0_6] : memref<35x4352xf32, #tpu.memory_space<vmem>>, vector<35x4352xf32>
    %cst = arith.constant dense<0.000000e+00> : vector<8x4352xf32>
    %4 = tpu.matmul %2, %3, %cst {dimension_numbers = #tpu.dot_dimension_numbers<[1], [0], [0], [1], [0, 0, 1, 1], [], []>, precision = #tpu.contract_precision<fp32>} : vector<8x35xf32>, vector<35x4352xf32>, vector<8x4352xf32> -> vector<8x4352xf32>
    %c0_7 = arith.constant 0 : index
    %c256 = arith.constant 256 : index
    %5 = vector.load %arg4[%c0_7, %c256] : memref<8x4608xf32, #tpu.memory_space<vmem>>, vector<8x4352xf32>
    tpu.vector_store %arg4[%c0_7, %c256], %4 {strides = array<i32>} : memref<8x4608xf32, #tpu.memory_space<vmem>>, vector<8x4352xf32>,
    return
  }
  func.func @transform_0(%arg0: i32) -> (i32, i32) {
    %c0_i32 = arith.constant 0 : i32
    %c0_i32_0 = arith.constant 0 : i32
    return %arg0, %c0_i32 : i32, i32
  }
  func.func @transform_1(%arg0: i32) -> (i32, i32) {
    %c0_i32 = arith.constant 0 : i32
    %c0_i32_0 = arith.constant 0 : i32
    return %arg0, %c0_i32 : i32, i32
  }
  func.func @transform_2(%arg0: i32) -> (i32, i32) {
    %c0_i32 = arith.constant 0 : i32
    %c0_i32_0 = arith.constant 0 : i32
    %c0_i32_1 = arith.constant 0 : i32
    return %c0_i32, %c0_i32_0 : i32, i32
  }
  func.func @transform_3(%arg0: i32) -> (i32, i32) {
    %c0_i32 = arith.constant 0 : i32
    %c0_i32_0 = arith.constant 0 : i32
    return %arg0, %c0_i32 : i32, i32
  }
}

</mosaic_0001>

<bundles_post_ra>
// kernel: tpu_custom_call.1
= control target key start
LH: loop header
LB: loop body
LE: loop exit
PB: predicated region body
PF: predicated region fallthrough
CT: control target
= control target key end

     0   :  { %8 = vsyncpa [#allocation3], 0  ;;  %s13579_s0 = inlined_call_operand.hbm [shape: f32[8,256], index: 0, kind: input, shape index: {}]   ;;  %s13580_s1 = inlined_call_operand.hbm [shape: f32[8,35], index: 1, kind: input, shape index: {}]   ;;  %s13581_s2 = inlined_call_operand.hbm [shape: f32[35,4352], index: 2, kind: input, shape index: {}]   ;;  %s13582_s3 = inlined_call_operand.hbm [shape: f32[8,4608], index: 3, kind: output, shape index: {}]  }
   0x1   :  { %9 = vsyncpa [#allocation6], 0 }
   0x2   :  { %10 = vsyncpa [#allocation4], 0  ;;  %s11144_s12 = smov [#allocation5]   ;;  %s11145_s14 = smov [#allocation2]  }
   0x3   :  { %s27_s13 = sshll.u32 %s11144_s12, 4  ;;  %s17_s15 = sshll.u32 %s11145_s14, 4  ;;  %s28_s13 = int_to_ptr.vmem [resolvable:$true] %s27_s13  ;;  %s18_s15 = int_to_ptr.vmem [resolvable:$true] %s17_s15 }
   0x4   :  { %s11050_s18 = scalar_lea.hbm %s13580_s1, 128 }
   0x5   :  { %p11051_p0 = scmp.ne.s32.totalorder %s13580_s1, %s11050_s18  ;;  %p11054_p1 = scmp.lt.u32.totalorder %s11050_s18, %s13580_s1 }
   0x7   :  { %p11056_p2 = pnand %p11054_p1, %p11051_p0 }
   0x9   :  { %11059 = shalt.err (!%p11056_p2)
}
   0xa   :  { %s11060_s23 = scalar_lea.vmem %s28_s13, 128  ;;  %p11065_p4 = scmp.lt.s32.totalorder %s28_s13, %s28_s13 }
   0xb   :  { %p11061_p3 = scmp.ne.s32.totalorder %s28_s13, %s11060_s23  ;;  %p11066_p5 = scmp.lt.s32.totalorder %s11060_s23, %s11060_s23 }
   0xd   :  { %p11067_p6 = por %p11066_p5, %p11065_p4 }
   0xf   :  { %p11068_p7 = pnand %p11067_p6, %p11061_p3 }
  0x11   :  { %11071 = shalt.err (!%p11068_p7)
}
  0x12   :  { %30 = dma.hbm_to_vmem [thread:$0]  %s13580_s1, 128, %s28_s13, [#allocation6]  }
  0x13   :  { %s11072_s28 = scalar_lea.hbm %s13579_s0, 256 }
  0x14   :  { %p11073_p8 = scmp.ne.s32.totalorder %s13579_s0, %s11072_s28  ;;  %p11076_p9 = scmp.lt.u32.totalorder %s11072_s28, %s13579_s0 }
  0x16   :  { %p11078_p10 = pnand %p11076_p9, %p11073_p8 }
  0x18   :  { %11081 = shalt.err (!%p11078_p10)
}
  0x19   :  { %s11082_s6 = scalar_lea.vmem %s18_s15, 256  ;;  %p11087_p12 = scmp.lt.s32.totalorder %s18_s15, %s18_s15 }
  0x1a   :  { %p11083_p11 = scmp.ne.s32.totalorder %s18_s15, %s11082_s6  ;;  %p11088_p13 = scmp.lt.s32.totalorder %s11082_s6, %s11082_s6 }
  0x1c   :  { %p11089_p0 = por %p11088_p13, %p11087_p12 }
  0x1e   :  { %p11090_p1 = pnand %p11089_p0, %p11083_p11 }
  0x20   :  { %11093 = shalt.err (!%p11090_p1)
}
  0x21   :  { %20 = dma.hbm_to_vmem [thread:$0]  %s13579_s0, 256, %s18_s15, [#allocation3]  }
  0x22   :  { %s11146_s8 = smov [#allocation7]   ;;  %s11094_s12 = scalar_lea.hbm %s13581_s2, 21760 }
  0x23   :  { %s36_s9 = sshll.u32 %s11146_s8, 4  ;;  %p11095_p2 = scmp.ne.s32.totalorder %s13581_s2, %s11094_s12  ;;  %s37_s9 = int_to_ptr.vmem [resolvable:$true] %s36_s9 }
  0x24   :  { %p11098_p3 = scmp.lt.u32.totalorder %s11094_s12, %s13581_s2 }
  0x26   :  { %p11100_p4 = pnand %p11098_p3, %p11095_p2 }
  0x28   :  { %11103 = shalt.err (!%p11100_p4)
}
  0x29   :  { %s11104_s18 = scalar_lea.vmem %s37_s9, 21760  ;;  %p11109_p6 = scmp.lt.s32.totalorder %s37_s9, %s37_s9 }
  0x2a   :  { %p11105_p5 = scmp.ne.s32.totalorder %s37_s9, %s11104_s18  ;;  %p11110_p7 = scmp.lt.s32.totalorder %s11104_s18, %s11104_s18 }
  0x2c   :  { %p11111_p8 = por %p11110_p7, %p11109_p6 }
  0x2e   :  { %p11112_p9 = pnand %p11111_p8, %p11105_p5 }
  0x30   :  { %11115 = shalt.err (!%p11112_p9)
}
  0x31   :  { %s11147_s0 = smov 4352   ;;  %s11148_s15 = smov 272  }
  0x32   :  { %42 = dma.hbm_to_vmem [thread:$0]  %s13581_s2, 21760, %s37_s9, [#allocation6], %s11147_s0, %s11147_s0, %s11148_s15  }
  0x33   :  { %11138 = dma.done.wait [#allocation3], 256  }
  0x34   :  { %11139 = vsyncadd [#allocation3], 4294967040 }
  0x35   :  { %11140 = dma.done.wait [#allocation6], 21888  }
  0x36   :  { %11141 = vsyncadd [#allocation6], 4294945408  ;;  %v13605_v0 = vmov 0.0   ;;  %v58_v1 = vld [vmem:[#allocation7 + $0x8] sm:$0xff]  ;;  %v92_v2 = vld [vmem:[#allocation7 + $0x118] sm:$0xff]  ;;  %vm231_vm0 = vcmask 1042432  }
  0x37   :  { %408 = vmatprep.mubr.f32.mxu1 %v13605_v0  ;;  %709 = vmatprep.mubr.f32.mxu0 %v13605_v0  ;;  %v57_v3 = vld [vmem:[#allocation7] sm:$0xff]  ;;  %v334_v4 = vand.u32 4294901760, %v58_v1  ;;  %v338_v5 = vand.u32 4294901760, %v92_v2  ;;  %v91_v6 = vld [vmem:[#allocation7 + $0x110] sm:$0xff]  ;;  %v126_v8 = vld [vmem:[#allocation7 + $0x228] sm:$0xff]  ;;  %vm227_vm1 = vcmask 285696  }
  0x38   :  { %v336_v7 = vand.u32 4294901760, %v57_v3  ;;  %v160_v9 = vld [vmem:[#allocation7 + $0x338] sm:$0xff]  ;;  %v340_v10 = vand.u32 4294901760, %v91_v6  ;;  %v342_v11 = vand.u32 4294901760, %v126_v8  ;;  %v125_v13 = vld [vmem:[#allocation7 + $0x220] sm:$0xff]  ;;  %v159_v14 = vld [vmem:[#allocation7 + $0x330] sm:$0xff] }
  0x39   :  { %v346_v12 = vand.u32 4294901760, %v160_v9  ;;  %v11209_v15 = vpack.c.bf16 %v338_v5, %v334_v4  ;;  %v11211_v16 = vsub.f32 %v58_v1, %v334_v4  ;;  %v11213_v17 = vsub.f32 %v92_v2, %v338_v5  ;;  %v194_v19 = vld [vmem:[#allocation7 + $0x448] sm:$0x7]  ;;  %v193_v20 = vld [vmem:[#allocation7 + $0x440] sm:$0x7]  ;;  %v56_v29 = vld [vmem:[#allocation5] sm:$0xff] }
  0x3a   :  { %v11215_v18 = vsub.f32 %v57_v3, %v336_v7  ;;  %v11217_v21 = vpack.c.bf16 %v340_v10, %v336_v7  ;;  %v11219_v22 = vsub.f32 %v91_v6, %v340_v10  ;;  %v11223_v24 = vsub.f32 %v126_v8, %v342_v11  ;;  %v60_v10 = vld [vmem:[#allocation7 + $0x18] sm:$0xff]  ;;  %s11150_s2 = smov [#allocation8]  }
  0x3b   :  { %v11221_v23 = vpack.c.bf16 %v346_v12, %v342_v11  ;;  %10058 = vmatprep.subr.bf16.mxu1 %v11209_v15  ;;  %10082 = vmatprep.subr.bf16.mxu0 %v11209_v15  ;;  %v11227_v25 = vsub.f32 %v160_v9, %v346_v12  ;;  %v344_v26 = vand.u32 4294901760, %v125_v13  ;;  %v348_v27 = vand.u32 4294901760, %v159_v14  ;;  %v94_v11 = vld [vmem:[#allocation7 + $0x128] sm:$0xff]  ;;  %s10047_s21 = sshll.u32 %s11150_s2, 4  ;;  %s10048_s21 = int_to_ptr.vmem [resolvable:$true] %s10047_s21 }
  0x3c   :  { %v236_v28 = vsel %vm231_vm0, %v194_v19, 0  ;;  %10060 = vmatpush1.bf16.msra.mxu1 %v11217_v21  ;;  %10084 = vmatpush1.bf16.msra.mxu0 %v11217_v21  ;;  %v233_v31 = vsel %vm231_vm0, %v193_v20, 0  ;;  %v422_v32 = vand.u32 4294901760, %v11211_v16  ;;  %v434_v33 = vand.u32 4294901760, %v11213_v17  ;;  %v62_v20 = vld [vmem:[#allocation7 + $0x28] sm:$0xff]  ;;  %s11116_s22 = scalar_lea.vmem %s10048_s21, 4608  ;;  %p11121_p11 = scmp.lt.s32.totalorder %s10048_s21, %s10048_s21 }
  0x3d   :  { %v11232_v30 = vand.u32 4294901760, %v236_v28  ;;  %10062 = vmatprep.subr.bf16.mxu1 %v11221_v23  ;;  %10086 = vmatprep.subr.bf16.mxu0 %v11221_v23  ;;  %v11239_v34 = vpack.c.bf16 %v348_v27, %v344_v26  ;;  %v11241_v35 = vsub.f32 %v125_v13, %v344_v26  ;;  %v11243_v36 = vsub.f32 %v159_v14, %v348_v27  ;;  %v96_v26 = vld [vmem:[#allocation7 + $0x138] sm:$0xff]  ;;  %v59_v27 = vld [vmem:[#allocation7 + $0x10] sm:$0xff]  ;;  %p11117_p10 = scmp.ne.s32.totalorder %s10048_s21, %s11116_s22  ;;  %p11122_p12 = scmp.lt.s32.totalorder %s11116_s22, %s11116_s22 }
  0x3e   :  { %v11245_v37 = vand.u32 4294901760, %v233_v31  ;;  %v423_v38 = vsub.f32 %v11211_v16, %v422_v32  ;;  %v435_v39 = vsub.f32 %v11213_v17, %v434_v33  ;;  %v10089_v40 = vpack.c.bf16 %v434_v33, %v422_v32 }
  0x3f   :  { %v229_v41 = vsel %vm227_vm1, %v56_v29, 0  ;;  %v428_v44 = vand.u32 4294901760, %v11215_v18  ;;  %v440_v45 = vand.u32 4294901760, %v11219_v22  ;;  %v446_v48 = vand.u32 4294901760, %v11223_v24  ;;  %p11123_p13 = por %p11122_p12, %p11121_p11 }
  0x40   :  { %v11251_v42 = vsub.f32 %v233_v31, %v11245_v37  ;;  %v11253_v43 = vand.u32 4294901760, %v229_v41  ;;  %10064 = vmatpush1.bf16.msra.mxu1 %v11239_v34  ;;  %10088 = vmatpush1.bf16.msra.mxu0 %v11239_v34  ;;  %v424_v46 = vand.u32 4294901760, %v423_v38  ;;  %v436_v47 = vand.u32 4294901760, %v435_v39 }
  0x41   :  { %v458_v49 = vand.u32 4294901760, %v11227_v25  ;;  %351 = vmatprep.subr.mxu1 %v11232_v30  ;;  %652 = vmatprep.subr.mxu0 %v11232_v30  ;;  %v429_v51 = vsub.f32 %v11215_v18, %v428_v44  ;;  %v441_v52 = vsub.f32 %v11219_v22, %v440_v45  ;;  %v452_v53 = vand.u32 4294901760, %v11241_v35  ;;  %p11124_p0 = pnand %p11123_p13, %p11117_p10 }
  0x42   :  { %v11264_v50 = vsub.f32 %v229_v41, %v11253_v43  ;;  %v10065_v54 = vpack.c.bf16 %v436_v47, %v424_v46  ;;  %v10091_v55 = vpack.c.bf16 %v440_v45, %v428_v44  ;;  %v447_v56 = vsub.f32 %v11223_v24, %v446_v48  ;;  %v93_v41 = vld [vmem:[#allocation7 + $0x120] sm:$0xff] }
  0x43   :  { %v459_v57 = vsub.f32 %v11227_v25, %v458_v49  ;;  %v430_v59 = vand.u32 4294901760, %v429_v51  ;;  %v442_v60 = vand.u32 4294901760, %v441_v52  ;;  %v10093_v61 = vpack.c.bf16 %v458_v49, %v446_v48  ;;  %v61_v48 = vld [vmem:[#allocation7 + $0x20] sm:$0xff]  ;;  %v95_v49 = vld [vmem:[#allocation7 + $0x130] sm:$0xff]  ;;  %v128_v51 = vld [vmem:[#allocation7 + $0x238] sm:$0xff] }
  0x44   :  { %v11272_v58 = vand.u32 4294901760, %v11264_v50  ;;  %353 = vmatpush1.msra.mxu1 %v11245_v37  ;;  %654 = vmatpush1.msra.mxu0 %v11245_v37  ;;  %v448_v62 = vand.u32 4294901760, %v447_v56  ;;  %v453_v1 = vsub.f32 %v11241_v35, %v452_v53  ;;  %v464_v2 = vand.u32 4294901760, %v11243_v36  ;;  %v162_v56 = vld [vmem:[#allocation7 + $0x348] sm:$0xff] }
  0x45   :  { %v460_v63 = vand.u32 4294901760, %v459_v57  ;;  %10066 = vmatprep.subr.bf16.mxu1 %v10065_v54  ;;  %10090 = vmatprep.subr.bf16.mxu0 %v10089_v40  ;;  %v11281_v4 = vsub.f32 %v236_v28, %v11232_v30  ;;  %v476_v5 = vand.u32 4294901760, %v11251_v42  ;;  %v10067_v6 = vpack.c.bf16 %v442_v60, %v430_v59  ;;  %v130_v57 = vld [vmem:[#allocation7 + $0x248] sm:$0xff] }
  0x46   :  { %v412_v3 = vsub.f32 %v11264_v50, %v11272_v58  ;;  %713 = vmatmul.mubr.f32.vlgmr.msra.gmra.mrb[0].mxu0 %v11272_v58  ;;  %v454_v8 = vand.u32 4294901760, %v453_v1  ;;  %v465_v9 = vsub.f32 %v11243_v36, %v464_v2  ;;  %v10095_v13 = vpack.c.bf16 %v464_v2, %v452_v53 }
  0x47   :  { %v10069_v7 = vpack.c.bf16 %v460_v63, %v448_v62  ;;  %10092 = vmatpush1.bf16.msra.mxu0 %v10091_v55  ;;  %v470_v14 = vand.u32 4294901760, %v11281_v4  ;;  %v11290_v19 = vsub.f32 %v11251_v42, %v476_v5  ;;  %813 = vmatprep.mubr.f32.mxu0 %v13605_v0  ;;  %v10073_v29 = vpack.c.bf16 %v11213_v17, %v11211_v16  ;;  %v164_v63 = vld [vmem:[#allocation7 + $0x358] sm:$0xff] }
  0x48   :  { %v11286_v12 = vand.u32 4294901760, %v412_v3  ;;  %10094 = vmatprep.subr.bf16.mxu0 %v10093_v61  ;;  %v466_v28 = vand.u32 4294901760, %v465_v9  ;;  %v10075_v31 = vpack.c.bf16 %v11219_v22, %v11215_v18  ;;  %v10077_v32 = vpack.c.bf16 %v11227_v25, %v11223_v24 }
  0x49   :  { %v471_v33 = vsub.f32 %v11281_v4, %v470_v14  ;;  %v10079_v38 = vpack.c.bf16 %v11243_v36, %v11241_v35  ;;  %v903_v39 = vand.u32 4294901760, %v60_v10  ;;  %v907_v40 = vand.u32 4294901760, %v94_v11 }
  0x4a   :  { %414 = vmatmul.mubr.f32.vlgmr.msra.gmra.mrb[0].mxu1 %v11286_v12  ;;  %v10071_v44 = vpack.c.bf16 %v466_v28, %v454_v8  ;;  %v1472_v45 = vand.u32 4294901760, %v62_v20  ;;  %v1476_v46 = vand.u32 4294901760, %v96_v26  ;;  %v905_v47 = vand.u32 4294901760, %v59_v27  ;;  %v129_v28 = vld [vmem:[#allocation7 + $0x240] sm:$0xff] }
  0x4b   :  { %10068 = vmatpush1.bf16.msra.mxu1 %v10067_v6  ;;  %534 = vmatprep.mubr.f32.mxu1 %v13605_v0  ;;  %v472_v52 = vand.u32 4294901760, %v471_v33  ;;  %v478_v53 = vand.u32 4294901760, %v11290_v19  ;;  %v11305_v54 = vpack.c.bf16 %v907_v40, %v903_v39  ;;  %v11307_v55 = vsub.f32 %v60_v10, %v903_v39  ;;  %v163_v33 = vld [vmem:[#allocation7 + $0x350] sm:$0xff]  ;;  %v196_v39 = vld [vmem:[#allocation7 + $0x458] sm:$0x7] }
  0x4c   :  { %10070 = vmatprep.subr.bf16.mxu1 %v10069_v7  ;;  %10096 = vmatpush1.bf16.msra.mxu0 %v10095_v13  ;;  %v11309_v59 = vsub.f32 %v94_v11, %v907_v40  ;;  %v11311_v60 = vpack.c.bf16 %v1476_v46, %v1472_v45  ;;  %v11313_v61 = vsub.f32 %v62_v20, %v1472_v45  ;;  %v909_v62 = vand.u32 4294901760, %v93_v41  ;;  %v127_v7 = vld [vmem:[#allocation7 + $0x230] sm:$0xff]  ;;  %v161_v13 = vld [vmem:[#allocation7 + $0x340] sm:$0xff] }
  0x4d   :  { %754 = vmatprep.subr.mxu0 %v470_v14  ;;  %v11315_v1 = vsub.f32 %v96_v26, %v1476_v46  ;;  %v1474_v2 = vand.u32 4294901760, %v61_v48  ;;  %v1478_v3 = vand.u32 4294901760, %v95_v49  ;;  %v911_v6 = vand.u32 4294901760, %v128_v51 }
  0x4e   :  { %v11317_v8 = vpack.c.bf16 %v909_v62, %v905_v47  ;;  %v11319_v9 = vsub.f32 %v59_v27, %v905_v47  ;;  %v915_v10 = vand.u32 4294901760, %v162_v56  ;;  %v1480_v11 = vand.u32 4294901760, %v130_v57 }
  0x4f   :  { %10072 = vmatpush1.bf16.msra.mxu1 %v10071_v44  ;;  %v11321_v14 = vsub.f32 %v93_v41, %v909_v62  ;;  %v11323_v19 = vpack.c.bf16 %v1478_v3, %v1474_v2  ;;  %v11325_v20 = vsub.f32 %v61_v48, %v1474_v2  ;;  %v1484_v26 = vand.u32 4294901760, %v164_v63  ;;  %v198_v41 = vld [vmem:[#allocation7 + $0x468] sm:$0x7]  ;;  %v195_v48 = vld [vmem:[#allocation7 + $0x450] sm:$0x7] }
  0x50   :  { %473 = vmatprep.subr.mxu1 %v472_v52  ;;  %758 = vmatpush1.msra.mxu0 %v476_v5  ;;  %v11329_v27 = vsub.f32 %v95_v49, %v1478_v3  ;;  %v11331_v40 = vpack.c.bf16 %v915_v10, %v911_v6  ;;  %v11333_v44 = vsub.f32 %v128_v51, %v911_v6  ;;  %v913_v5 = vand.u32 4294901760, %v127_v7 }
  0x51   :  { %10098 = vmatprep.subr.bf16.mxu0 %v11209_v15  ;;  %815 = vmatmul.mubr.f32.vlgmr.msra.gmra.mrb[0].mxu0 %v11253_v43  ;;  %v11337_v45 = vsub.f32 %v162_v56, %v915_v10  ;;  %v11339_v46 = vpack.c.bf16 %v1484_v26, %v1480_v11  ;;  %v11341_v47 = vsub.f32 %v130_v57, %v1480_v11  ;;  %v917_v15 = vand.u32 4294901760, %v161_v13 }
  0x52   :  { %10100 = vmatpush1.bf16.msra.mxu0 %v11217_v21  ;;  %895 = vmatprep.mubr.f32.mxu0 %v13605_v0  ;;  %v11344_v49 = vsub.f32 %v164_v63, %v1484_v26  ;;  %v1482_v51 = vand.u32 4294901760, %v129_v28  ;;  %v1486_v52 = vand.u32 4294901760, %v163_v33  ;;  %v11347_v62 = vsel %vm231_vm0, %v196_v39, 0  ;;  %v197_v21 = vld [vmem:[#allocation7 + $0x460] sm:$0x7] }
  0x53   :  { %479 = vmatpush1.msra.mxu1 %v478_v53  ;;  %10102 = vmatprep.subr.bf16.mxu0 %v11221_v23  ;;  %v11353_v56 = vpack.c.bf16 %v917_v15, %v913_v5  ;;  %v11355_v57 = vsub.f32 %v127_v7, %v913_v5  ;;  %v11357_v53 = vsub.f32 %v161_v13, %v917_v15  ;;  %v11360_v23 = vsel %vm231_vm0, %v198_v41, 0 }
  0x54   :  { %10074 = vmatprep.subr.bf16.mxu1 %v10073_v29  ;;  %536 = vmatmul.mubr.f32.vlgmr.msra.gmra.mrb[0].mxu1 %v11253_v43  ;;  %v11366_v63 = vpack.c.bf16 %v1486_v52, %v1482_v51  ;;  %v11368_v16 = vsub.f32 %v129_v28, %v1482_v51  ;;  %v11370_v17 = vsub.f32 %v163_v33, %v1486_v52  ;;  %v11373_v29 = vand.u32 4294901760, %v11347_v62 }
  0x55   :  { %10076 = vmatpush1.bf16.msra.mxu1 %v10075_v31  ;;  %626 = vmatprep.mubr.f32.mxu1 %v13605_v0  ;;  %v239_v18 = vsel %vm231_vm0, %v195_v48, 0  ;;  %v245_v22 = vsel %vm231_vm0, %v197_v21, 0  ;;  %v13588_v31 = vand.u32 4294901760, %v11307_v55  ;;  %v13587_v2 = vand.u32 4294901760, %v11309_v59 }
  0x56   :  { %10078 = vmatprep.subr.bf16.mxu1 %v10077_v32  ;;  %10104 = vmatpush1.bf16.msra.mxu0 %v11239_v34  ;;  %v11385_v3 = vand.u32 4294901760, %v11360_v23  ;;  %v11387_v6 = vand.u32 4294901760, %v239_v18  ;;  %v1560_v24 = vand.u32 4294901760, %v11313_v61  ;;  %v1572_v25 = vand.u32 4294901760, %v11315_v1 }
  0x57   :  { %838 = vmatprep.subr.mxu0 %v11232_v30  ;;  %v992_v34 = vsub.f32 %v11307_v55, %v13588_v31  ;;  %v1004_v32 = vsub.f32 %v11309_v59, %v13587_v2  ;;  %v13586_v7 = vand.u32 4294901760, %v11319_v9  ;;  %v13585_v30 = vand.u32 4294901760, %v11321_v14 }
  0x58   :  { %v11403_v10 = vsub.f32 %v239_v18, %v11387_v6  ;;  %v11405_v11 = vand.u32 4294901760, %v245_v22  ;;  %v1561_v13 = vsub.f32 %v11313_v61, %v1560_v24  ;;  %v1573_v26 = vsub.f32 %v11315_v1, %v1572_v25 }
  0x59   :  { %10080 = vmatpush1.bf16.msra.mxu1 %v10079_v38  ;;  %v993_v28 = vand.u32 4294901760, %v992_v34  ;;  %v1005_v35 = vand.u32 4294901760, %v1004_v32  ;;  %v998_v36 = vsub.f32 %v11319_v9, %v13586_v7  ;;  %v1010_v38 = vsub.f32 %v11321_v14, %v13585_v30 }
  0x5a   :  { %568 = vmatprep.subr.mxu1 %v11281_v4  ;;  %840 = vmatpush1.msra.mxu0 %v11245_v37  ;;  %v1562_v33 = vand.u32 4294901760, %v1561_v13  ;;  %v1574_v39 = vand.u32 4294901760, %v1573_v26  ;;  %v1566_v4 = vand.u32 4294901760, %v11325_v20  ;;  %v1578_v37 = vand.u32 4294901760, %v11329_v27 }
  0x5b   :  { %897 = vmatmul.mubr.f32.vlgmr.msra.gmra.mrb[0].mxu0 %v11253_v43  ;;  %10154 = vmatprep.subr.bf16.mxu0 %v11311_v60  ;;  %v11427_v5 = vsub.f32 %v245_v22, %v11405_v11  ;;  %v11429_v41 = vpack.c.bf16 %v1005_v35, %v993_v28  ;;  %v999_v15 = vand.u32 4294901760, %v998_v36  ;;  %v13584_v48 = vand.u32 4294901760, %v11333_v44 }
  0x5c   :  { %10156 = vmatpush1.bf16.msra.mxu0 %v11323_v19  ;;  %1546 = vmatprep.mubr.f32.mxu0 %v13605_v0  ;;  %v1011_v51 = vand.u32 4294901760, %v1010_v38  ;;  %v1567_v52 = vsub.f32 %v11325_v20, %v1566_v4  ;;  %v1579_v21 = vsub.f32 %v11329_v27, %v1578_v37  ;;  %v13583_v18 = vand.u32 4294901760, %v11337_v45 }
  0x5d   :  { %571 = vmatpush1.msra.mxu1 %v11251_v42  ;;  %10158 = vmatprep.subr.bf16.mxu0 %v11339_v46  ;;  %v10161_v22 = vpack.c.bf16 %v1574_v39, %v1562_v33  ;;  %v1016_v42 = vsub.f32 %v11333_v44, %v13584_v48  ;;  %v1584_v34 = vand.u32 4294901760, %v11341_v47  ;;  %v13589_v32 = vand.u32 4294901760, %v11344_v49 }
  0x5e   :  { %629 = vmatmul.mubr.f32.vlgmr.msra.gmra.mrb[0].mxu1 %v11264_v50  ;;  %10106 = vmatprep.subr.bf16.mxu1 %v11305_v54  ;;  %v1568_v13 = vand.u32 4294901760, %v1567_v52  ;;  %v1580_v26 = vand.u32 4294901760, %v1579_v21  ;;  %v1028_v28 = vsub.f32 %v11337_v45, %v13583_v18  ;;  %v1021_v35 = vand.u32 4294901760, %v11355_v57 }
  0x5f   :  { %10108 = vmatpush1.bf16.msra.mxu1 %v11317_v8  ;;  %977 = vmatprep.mubr.f32.mxu1 %v13605_v0  ;;  %v1017_v36 = vand.u32 4294901760, %v1016_v42  ;;  %v1585_v38 = vsub.f32 %v11341_v47, %v1584_v34  ;;  %v1597_v33 = vsub.f32 %v11344_v49, %v13589_v32  ;;  %v13590_v39 = vand.u32 4294901760, %v11357_v53 }
  0x60   :  { %10110 = vmatprep.subr.bf16.mxu1 %v11331_v40  ;;  %10160 = vmatpush1.bf16.msra.mxu0 %v11366_v63  ;;  %v10163_v52 = vpack.c.bf16 %v1580_v26, %v1568_v13  ;;  %v1029_v21 = vand.u32 4294901760, %v1028_v28  ;;  %v1022_v18 = vsub.f32 %v11355_v57, %v1021_v35  ;;  %v1590_v42 = vand.u32 4294901760, %v11368_v16 }
  0x61   :  { %1489 = vmatprep.subr.mxu0 %v11385_v3  ;;  %v1586_v48 = vand.u32 4294901760, %v1585_v38  ;;  %v1598_v30 = vand.u32 4294901760, %v1597_v33  ;;  %v1034_v7 = vsub.f32 %v11357_v53, %v13590_v39  ;;  %v1602_v2 = vand.u32 4294901760, %v11370_v17 }
  0x62   :  { %v10115_v31 = vpack.c.bf16 %v1011_v51, %v999_v15  ;;  %v1023_v32 = vand.u32 4294901760, %v1022_v18  ;;  %v1591_v13 = vsub.f32 %v11368_v16, %v1590_v42  ;;  %v11479_v26 = vsub.f32 %v11347_v62, %v11373_v29 }
  0x63   :  { %10112 = vmatpush1.bf16.msra.mxu1 %v11353_v56  ;;  %v10165_v28 = vpack.c.bf16 %v1598_v30, %v1586_v48  ;;  %v1035_v38 = vand.u32 4294901760, %v1034_v7  ;;  %v1603_v33 = vsub.f32 %v11370_v17, %v1602_v2  ;;  %v11488_v15 = vsub.f32 %v11360_v23, %v11385_v3 }
  0x64   :  { %920 = vmatprep.subr.mxu1 %v11373_v29  ;;  %1491 = vmatpush1.msra.mxu0 %v11405_v11  ;;  %v1592_v51 = vand.u32 4294901760, %v1591_v13  ;;  %v1039_v62 = vand.u32 4294901760, %v11479_v26  ;;  %v1045_v18 = vand.u32 4294901760, %v11403_v10  ;;  %v1614_v39 = vand.u32 4294901760, %v11427_v5 }
  0x65   :  { %10162 = vmatprep.subr.bf16.mxu0 %v10161_v22  ;;  %1552 = vmatmul.mubr.f32.vlgmr.msra.gmra.mrb[2].mxu0 %v11286_v12  ;;  %v10117_v7 = vpack.c.bf16 %v1029_v21, %v1017_v36  ;;  %v1604_v30 = vand.u32 4294901760, %v1603_v33  ;;  %v1608_v48 = vand.u32 4294901760, %v11488_v15  ;;  %v10119_v21 = vpack.c.bf16 %v1035_v38, %v1023_v32 }
  0x66   :  { %10164 = vmatpush1.bf16.msra.mxu0 %v10163_v52  ;;  %1672 = vmatprep.mubr.f32.mxu0 %v13605_v0  ;;  %v1040_v23 = vsub.f32 %v11479_v26, %v1039_v62  ;;  %v1615_v22 = vsub.f32 %v11427_v5, %v1614_v39  ;;  %v1046_v13 = vsub.f32 %v11403_v10, %v1045_v18 }
  0x67   :  { %922 = vmatpush1.msra.mxu1 %v11387_v6  ;;  %10166 = vmatprep.subr.bf16.mxu0 %v10165_v28  ;;  %v10167_v36 = vpack.c.bf16 %v1604_v30, %v1592_v51  ;;  %v1609_v52 = vsub.f32 %v11488_v15, %v1608_v48  ;;  %v10169_v51 = vpack.c.bf16 %v11315_v1, %v11313_v61  ;;  %v13692_v61 = vand.u32 4294901760, %v11307_v55 }
  0x68   :  { %10114 = vmatprep.subr.bf16.mxu1 %v11429_v41  ;;  %983 = vmatmul.mubr.f32.vlgmr.msra.gmra.mrb[2].mxu1 %v11286_v12  ;;  %v1041_v28 = vand.u32 4294901760, %v1040_v23  ;;  %v1616_v41 = vand.u32 4294901760, %v1615_v22  ;;  %v10171_v30 = vpack.c.bf16 %v11329_v27, %v11325_v20  ;;  %v10173_v32 = vpack.c.bf16 %v11344_v49, %v11341_v47 }
  0x69   :  { %10116 = vmatpush1.bf16.msra.mxu1 %v10115_v31  ;;  %1103 = vmatprep.mubr.f32.mxu1 %v13605_v0  ;;  %v1610_v33 = vand.u32 4294901760, %v1609_v52  ;;  %v1047_v31 = vand.u32 4294901760, %v1046_v13  ;;  %v10121_v38 = vpack.c.bf16 %v11309_v59, %v11307_v55  ;;  %v10125_v23 = vpack.c.bf16 %v11337_v45, %v11333_v44  ;;  %v98_v13 = vld [vmem:[#allocation7 + $0x148] sm:$0xff] }
  0x6a   :  { %10118 = vmatprep.subr.bf16.mxu1 %v10117_v7  ;;  %10168 = vmatpush1.bf16.msra.mxu0 %v10167_v36  ;;  %v10123_v7 = vpack.c.bf16 %v11321_v14, %v11319_v9  ;;  %v10175_v22 = vpack.c.bf16 %v11370_v17, %v11368_v16  ;;  %v10127_v36 = vpack.c.bf16 %v11357_v53, %v11355_v57  ;;  %v13693_v1 = vand.u32 4294901760, %v11309_v59 }
  0x6b   :  { %1611 = vmatprep.subr.mxu0 %v1610_v33  ;;  %v10185_v52 = vpack.c.bf16 %v1572_v25, %v1560_v24  ;;  %v13691_v33 = vand.u32 4294901760, %v11344_v49  ;;  %v2045_v24 = vand.u32 4294901760, %v98_v13  ;;  %v63_v25 = vld [vmem:[#allocation7 + $0x30] sm:$0xff]  ;;  %v13694_v47 = vand.u32 4294901760, %v11319_v9 }
  0x6c   :  { %v10137_v20 = vpack.c.bf16 %v13693_v1, %v13692_v61  ;;  %v13695_v49 = vand.u32 4294901760, %v11321_v14  ;;  %v13697_v55 = vand.u32 4294901760, %v11337_v45  ;;  %v99_v14 = vld [vmem:[#allocation7 + $0x150] sm:$0xff]  ;;  %v13698_v45 = vand.u32 4294901760, %v11357_v53  ;;  %v165_v1 = vld [vmem:[#allocation7 + $0x360] sm:$0xff] }
  0x6d   :  { %10120 = vmatpush1.bf16.msra.mxu1 %v10119_v21  ;;  %v64_v21 = vld [vmem:[#allocation7 + $0x38] sm:$0xff]  ;;  %v131_v61 = vld [vmem:[#allocation7 + $0x250] sm:$0xff]  ;;  %v11592_v57 = vsub.f32 %v98_v13, %v2045_v24 }
  0x6e   :  { %1042 = vmatprep.subr.mxu1 %v1041_v28  ;;  %1617 = vmatpush1.msra.mxu0 %v1616_v41  ;;  %v10187_v28 = vpack.c.bf16 %v1578_v37, %v1566_v4  ;;  %v10189_v41 = vpack.c.bf16 %v13691_v33, %v1584_v34  ;;  %v2041_v27 = vand.u32 4294901760, %v64_v21  ;;  %v97_v4 = vld [vmem:[#allocation7 + $0x140] sm:$0xff]  ;;  %v10139_v37 = vpack.c.bf16 %v13695_v49, %v13694_v47 }
  0x6f   :  { %10170 = vmatprep.subr.bf16.mxu0 %v10169_v51  ;;  %1674 = vmatmul.mubr.f32.vlgmr.msra.gmra.mrb[2].mxu0 %v11253_v43  ;;  %v66_v51 = vld [vmem:[#allocation7 + $0x48] sm:$0xff]  ;;  %v65_v34 = vld [vmem:[#allocation7 + $0x40] sm:$0xff]  ;;  %v10143_v16 = vpack.c.bf16 %v13698_v45, %v1021_v35  ;;  %v2051_v13 = vand.u32 4294901760, %v131_v61 }
  0x70   :  { %10172 = vmatpush1.bf16.msra.mxu0 %v10171_v30  ;;  %1764 = vmatprep.mubr.f32.mxu0 %v13605_v0  ;;  %v100_v30 = vld [vmem:[#allocation7 + $0x158] sm:$0xff]  ;;  %v2610_v9 = vand.u32 4294901760, %v66_v51  ;;  %v11587_v17 = vpack.c.bf16 %v2045_v24, %v2041_v27  ;;  %v133_v49 = vld [vmem:[#allocation7 + $0x260] sm:$0xff]  ;;  %v2055_v24 = vand.u32 4294901760, %v165_v1 }
  0x71   :  { %1048 = vmatpush1.msra.mxu1 %v1047_v31  ;;  %10174 = vmatprep.subr.bf16.mxu0 %v10173_v32  ;;  %v13696_v31 = vand.u32 4294901760, %v11333_v44  ;;  %v10191_v32 = vpack.c.bf16 %v1602_v2, %v1590_v42  ;;  %v2047_v44 = vand.u32 4294901760, %v97_v4  ;;  %v11589_v2 = vsub.f32 %v64_v21, %v2041_v27  ;;  %v134_v42 = vld [vmem:[#allocation7 + $0x268] sm:$0xff] }
  0x72   :  { %10122 = vmatprep.subr.bf16.mxu1 %v10121_v38  ;;  %1105 = vmatmul.mubr.f32.vlgmr.msra.gmra.mrb[2].mxu1 %v11253_v43  ;;  %v2614_v38 = vand.u32 4294901760, %v100_v30  ;;  %v11596_v35 = vsub.f32 %v66_v51, %v2610_v9  ;;  %v2618_v27 = vand.u32 4294901760, %v134_v42 }
  0x73   :  { %10124 = vmatpush1.bf16.msra.mxu1 %v10123_v7  ;;  %1195 = vmatprep.mubr.f32.mxu1 %v13605_v0  ;;  %v10141_v59 = vpack.c.bf16 %v13697_v55, %v13696_v31  ;;  %v132_v7 = vld [vmem:[#allocation7 + $0x258] sm:$0xff]  ;;  %v11606_v55 = vsub.f32 %v97_v4, %v2047_v44 }
  0x74   :  { %10126 = vmatprep.subr.bf16.mxu1 %v10125_v23  ;;  %10176 = vmatpush1.bf16.msra.mxu0 %v10175_v22  ;;  %v166_v23 = vld [vmem:[#allocation7 + $0x368] sm:$0xff]  ;;  %v2043_v22 = vand.u32 4294901760, %v63_v25  ;;  %v2049_v33 = vand.u32 4294901760, %v132_v7  ;;  %v11594_v53 = vpack.c.bf16 %v2614_v38, %v2610_v9  ;;  %v11600_v21 = vsub.f32 %v100_v30, %v2614_v38 }
  0x75   :  { %1706 = vmatprep.subr.mxu0 %v11488_v15  ;;  %v2620_v9 = vand.u32 4294901760, %v133_v49 }
  0x76   :  { %v11604_v31 = vsub.f32 %v63_v25, %v2043_v22  ;;  %v11620_v25 = vsub.f32 %v132_v7, %v2049_v33 }
  0x77   :  { %10128 = vmatpush1.bf16.msra.mxu1 %v10127_v36  ;;  %v168_v36 = vld [vmem:[#allocation7 + $0x378] sm:$0xff] }
  0x78   :  { %1137 = vmatprep.subr.mxu1 %v11479_v26  ;;  %1709 = vmatpush1.msra.mxu0 %v11427_v5  ;;  %v2622_v47 = vand.u32 4294901760, %v168_v36 }
  0x79   :  { %10178 = vmatprep.subr.bf16.mxu0 %v11311_v60  ;;  %1767 = vmatmul.mubr.f32.vlgmr.msra.gmra.mrb[2].mxu0 %v11264_v50 }
  0x7a   :  { %10180 = vmatpush1.bf16.msra.mxu0 %v11323_v19  ;;  %1847 = vmatprep.mubr.f32.mxu0 %v13605_v0  ;;  %v11630_v26 = vsub.f32 %v168_v36, %v2622_v47 }
  0x7b   :  { %1140 = vmatpush1.msra.mxu1 %v11403_v10  ;;  %10182 = vmatprep.subr.bf16.mxu0 %v11339_v46  ;;  %v13603_v10 = vand.u32 4294901760, %v11600_v21 }
  0x7c   :  { %10130 = vmatprep.subr.bf16.mxu1 %v11305_v54  ;;  %1198 = vmatmul.mubr.f32.vlgmr.msra.gmra.mrb[2].mxu1 %v11264_v50 }
  0x7d   :  { %10132 = vmatpush1.bf16.msra.mxu1 %v11317_v8  ;;  %1278 = vmatprep.mubr.f32.mxu1 %v13605_v0 }
  0x7e   :  { %10134 = vmatprep.subr.bf16.mxu1 %v11331_v40  ;;  %10184 = vmatpush1.bf16.msra.mxu0 %v11366_v63 }
  0x7f   :  { %1790 = vmatprep.subr.mxu0 %v11385_v3 }
  0x81   :  { %10136 = vmatpush1.bf16.msra.mxu1 %v11353_v56 }
  0x82   :  { %1221 = vmatprep.subr.mxu1 %v11373_v29  ;;  %1792 = vmatpush1.msra.mxu0 %v11405_v11 }
  0x83   :  { %10186 = vmatprep.subr.bf16.mxu0 %v10185_v52  ;;  %1851 = vmatmul.mubr.f32.vlgmr.msra.gmra.mrb[2].mxu0 %v11272_v58  ;;  %v2612_v52 = vand.u32 4294901760, %v65_v34 }
  0x84   :  { %10188 = vmatpush1.bf16.msra.mxu0 %v10187_v28  ;;  %1951 = vmatprep.mubr.f32.mxu0 %v13605_v0  ;;  %v2616_v28 = vand.u32 4294901760, %v99_v14 }
  0x85   :  { %1223 = vmatpush1.msra.mxu1 %v11387_v6  ;;  %10190 = vmatprep.subr.bf16.mxu0 %v10189_v41  ;;  %v2053_v41 = vand.u32 4294901760, %v166_v23  ;;  %v11610_v15 = vsub.f32 %v65_v34, %v2612_v52  ;;  %v201_v34 = vld [vmem:[#allocation7 + $0x480] sm:$0x7] }
  0x86   :  { %10138 = vmatprep.subr.bf16.mxu1 %v10137_v20  ;;  %1282 = vmatmul.mubr.f32.vlgmr.msra.gmra.mrb[2].mxu1 %v11272_v58  ;;  %v11602_v20 = vpack.c.bf16 %v2047_v44, %v2043_v22  ;;  %v11608_v51 = vpack.c.bf16 %v2616_v28, %v2612_v52  ;;  %v199_v22 = vld [vmem:[#allocation7 + $0x470] sm:$0x7]  ;;  %v11628_v44 = vsub.f32 %v134_v42, %v2618_v27  ;;  %v257_v45 = vsel %vm231_vm0, %v201_v34, 0 }
  0x87   :  { %10140 = vmatpush1.bf16.msra.mxu1 %v10139_v37  ;;  %1382 = vmatprep.mubr.f32.mxu1 %v13605_v0  ;;  %v167_v37 = vld [vmem:[#allocation7 + $0x370] sm:$0xff]  ;;  %v11614_v30 = vpack.c.bf16 %v2053_v41, %v2049_v33  ;;  %v11622_v4 = vsub.f32 %v166_v23, %v2053_v41  ;;  %v251_v23 = vsel %vm231_vm0, %v199_v22, 0 }
  0x88   :  { %10142 = vmatprep.subr.bf16.mxu1 %v10141_v59  ;;  %10192 = vmatpush1.bf16.msra.mxu0 %v10191_v32  ;;  %v200_v59 = vld [vmem:[#allocation7 + $0x478] sm:$0x7]  ;;  %v202_v32 = vld [vmem:[#allocation7 + $0x488] sm:$0x7]  ;;  %v2624_v38 = vand.u32 4294901760, %v167_v37  ;;  %v11672_v41 = vand.u32 4294901760, %v251_v23 }
  0x89   :  { %1892 = vmatprep.subr.mxu0 %v1608_v48  ;;  %v11612_v48 = vsub.f32 %v99_v14, %v2616_v28  ;;  %v11626_v14 = vpack.c.bf16 %v2622_v47, %v2618_v27  ;;  %v11633_v5 = vsel %vm231_vm0, %v200_v59, 0  ;;  %v260_v7 = vsel %vm231_vm0, %v202_v32, 0 }
  0x8a   :  { %v11653_v42 = vpack.c.bf16 %v2624_v38, %v2620_v9  ;;  %v11656_v36 = vand.u32 4294901760, %v11633_v5  ;;  %v11664_v52 = vsub.f32 %v167_v37, %v2624_v38  ;;  %v11670_v33 = vand.u32 4294901760, %v260_v7 }
  0x8b   :  { %10144 = vmatpush1.bf16.msra.mxu1 %v10143_v16  ;;  %v13604_v16 = vand.u32 4294901760, %v11596_v35  ;;  %v13600_v28 = vand.u32 4294901760, %v11612_v48  ;;  %v13594_v27 = vand.u32 4294901760, %v11630_v26  ;;  %v2711_v47 = vsub.f32 %v11600_v21, %v13603_v10 }
  0x8c   :  { %1323 = vmatprep.subr.mxu1 %v1039_v62  ;;  %1896 = vmatpush1.msra.mxu0 %v1614_v39  ;;  %v11637_v39 = vpack.c.bf16 %v2055_v24, %v2051_v13  ;;  %v11639_v62 = vsub.f32 %v131_v61, %v2051_v13  ;;  %v11674_v61 = vand.u32 4294901760, %v257_v45  ;;  %v13596_v37 = vand.u32 4294901760, %v11620_v25 }
  0x8d   :  { %10194 = vmatprep.subr.bf16.mxu0 %v11311_v60  ;;  %1953 = vmatmul.mubr.f32.vlgmr.msra.gmra.mrb[2].mxu0 %v11253_v43  ;;  %v11641_v60 = vsub.f32 %v165_v1, %v2055_v24  ;;  %v11698_v13 = vsub.f32 %v251_v23, %v11672_v41  ;;  %v2717_v59 = vsub.f32 %v11612_v48, %v13600_v28  ;;  %v13595_v32 = vand.u32 4294901760, %v11622_v4 }
  0x8e   :  { %10196 = vmatpush1.bf16.msra.mxu0 %v11323_v19  ;;  %2033 = vmatprep.mubr.f32.mxu0 %v13605_v0  ;;  %v13593_v19 = vand.u32 4294901760, %v11589_v2  ;;  %v13601_v22 = vand.u32 4294901760, %v11664_v52  ;;  %v11726_v23 = vsub.f32 %v260_v7, %v11670_v33 }
  0x8f   :  { %1327 = vmatpush1.msra.mxu1 %v1045_v18  ;;  %10198 = vmatprep.subr.bf16.mxu0 %v11339_v46  ;;  %v13602_v46 = vand.u32 4294901760, %v11610_v15  ;;  %v11662_v18 = vsub.f32 %v133_v49, %v2620_v9  ;;  %v13597_v49 = vand.u32 4294901760, %v11606_v55  ;;  %v11710_v9 = vsub.f32 %v257_v45, %v11674_v61 }
  0x90   :  { %10146 = vmatprep.subr.bf16.mxu1 %v11305_v54  ;;  %1384 = vmatmul.mubr.f32.vlgmr.msra.gmra.mrb[2].mxu1 %v11253_v43  ;;  %v13592_v54 = vand.u32 4294901760, %v11592_v57  ;;  %v11681_v1 = vsub.f32 %v11589_v2, %v13593_v19  ;;  %v2712_v45 = vand.u32 4294901760, %v2711_v47  ;;  %v2718_v7 = vand.u32 4294901760, %v2717_v59 }
  0x91   :  { %10148 = vmatpush1.bf16.msra.mxu1 %v11317_v8  ;;  %1464 = vmatprep.mubr.f32.mxu1 %v13605_v0  ;;  %v13591_v8 = vand.u32 4294901760, %v11604_v31  ;;  %v13599_v38 = vand.u32 4294901760, %v11662_v18  ;;  %v2166_v19 = vsub.f32 %v11622_v4, %v13595_v32  ;;  %v2159_v47 = vand.u32 4294901760, %v11639_v62 }
  0x92   :  { %10150 = vmatprep.subr.bf16.mxu1 %v11331_v40  ;;  %10200 = vmatpush1.bf16.msra.mxu0 %v11366_v63  ;;  %v2699_v40 = vsub.f32 %v11596_v35, %v13604_v16  ;;  %v13598_v63 = vand.u32 4294901760, %v11628_v44  ;;  %v2142_v24 = vsub.f32 %v11592_v57, %v13592_v54  ;;  %v2154_v54 = vsub.f32 %v11620_v25, %v13596_v37 }
  0x93   :  { %1976 = vmatprep.subr.mxu0 %v11385_v3  ;;  %v2705_v3 = vsub.f32 %v11610_v15, %v13602_v46  ;;  %v2741_v59 = vsub.f32 %v11664_v52, %v13601_v22  ;;  %v11754_v32 = vsub.f32 %v11633_v5, %v11656_v36  ;;  %v2167_v10 = vand.u32 4294901760, %v2166_v19 }
  0x94   :  { %v2700_v34 = vand.u32 4294901760, %v2699_v40  ;;  %v2148_v40 = vsub.f32 %v11606_v55, %v13597_v49  ;;  %v2143_v37 = vand.u32 4294901760, %v2142_v24  ;;  %v2155_v46 = vand.u32 4294901760, %v2154_v54 }
  0x95   :  { %10152 = vmatpush1.bf16.msra.mxu1 %v11353_v56  ;;  %v2136_v56 = vsub.f32 %v11604_v31, %v13591_v8  ;;  %v2706_v8 = vand.u32 4294901760, %v2705_v3  ;;  %v2131_v3 = vand.u32 4294901760, %v11681_v1  ;;  %v2746_v1 = vand.u32 4294901760, %v11726_v23 }
  0x96   :  { %1407 = vmatprep.subr.mxu1 %v11373_v29  ;;  %1978 = vmatpush1.msra.mxu0 %v11405_v11  ;;  %v2723_v29 = vsub.f32 %v11628_v44, %v13598_v63  ;;  %v2735_v11 = vsub.f32 %v11630_v26, %v13594_v27  ;;  %v2171_v27 = vand.u32 4294901760, %v11641_v60  ;;  %v2149_v22 = vand.u32 4294901760, %v2148_v40 }
  0x97   :  { %2035 = vmatmul.mubr.f32.vlgmr.msra.gmra.mrb[2].mxu0 %v11253_v43  ;;  %10250 = vmatprep.subr.bf16.mxu0 %v11594_v53  ;;  %v2137_v28 = vand.u32 4294901760, %v2136_v56  ;;  %v10259_v5 = vpack.c.bf16 %v2718_v7, %v2706_v8  ;;  %v2160_v24 = vsub.f32 %v11639_v62, %v2159_v47  ;;  %v2742_v16 = vand.u32 4294901760, %v2741_v59 }
  0x98   :  { %10252 = vmatpush1.bf16.msra.mxu0 %v11608_v51  ;;  %2684 = vmatprep.mubr.f32.mxu0 %v13605_v0  ;;  %v2724_v49 = vand.u32 4294901760, %v2723_v29  ;;  %v2736_v63 = vand.u32 4294901760, %v2735_v11  ;;  %v2172_v29 = vsub.f32 %v11641_v60, %v2171_v27  ;;  %v2752_v56 = vand.u32 4294901760, %v11710_v9 }
  0x99   :  { %1409 = vmatpush1.msra.mxu1 %v11387_v6  ;;  %10254 = vmatprep.subr.bf16.mxu0 %v11626_v14  ;;  %v2729_v6 = vsub.f32 %v11662_v18, %v13599_v38  ;;  %v10257_v38 = vpack.c.bf16 %v2712_v45, %v2700_v34  ;;  %v2747_v19 = vsub.f32 %v11726_v23, %v2746_v1  ;;  %v2161_v40 = vand.u32 4294901760, %v2160_v24 }
  0x9a   :  { %1466 = vmatmul.mubr.f32.vlgmr.msra.gmra.mrb[2].mxu1 %v11253_v43  ;;  %10202 = vmatprep.subr.bf16.mxu1 %v11587_v17  ;;  %v10261_v54 = vpack.c.bf16 %v2736_v63, %v2724_v49  ;;  %v10209_v8 = vpack.c.bf16 %v2143_v37, %v2131_v3  ;;  %v10211_v34 = vpack.c.bf16 %v2149_v22, %v2137_v28  ;;  %v2173_v7 = vand.u32 4294901760, %v2172_v29 }
  0x9b   :  { %10204 = vmatpush1.bf16.msra.mxu1 %v11602_v20  ;;  %2115 = vmatprep.mubr.f32.mxu1 %v13605_v0  ;;  %v2730_v11 = vand.u32 4294901760, %v2729_v6  ;;  %v2177_v0 = vand.u32 4294901760, %v11754_v32  ;;  %v10213_v45 = vpack.c.bf16 %v2167_v10, %v2155_v46  ;;  %v2183_v6 = vand.u32 4294901760, %v11698_v13 }
  0x9c   :  { %10206 = vmatprep.subr.bf16.mxu1 %v11614_v30  ;;  %10256 = vmatpush1.bf16.msra.mxu0 %v11653_v42  ;;  %v2753_v59 = vsub.f32 %v11710_v9, %v2752_v56  ;;  %v13699_v37 = vmov 0.0   ;;  %v2748_v10 = vand.u32 4294901760, %v2747_v19  ;;  %v10215_v46 = vpack.c.bf16 %v2173_v7, %v2161_v40 }
  0x9d   :  { %2627 = vmatprep.subr.mxu0 %v11670_v33  ;;  %v10263_v63 = vpack.c.bf16 %v2742_v16, %v2730_v11  ;;  %v2178_v49 = vsub.f32 %v11754_v32, %v2177_v0  ;;  %v2184_v16 = vsub.f32 %v11698_v13, %v2183_v6  ;;  %v10265_v22 = vpack.c.bf16 %v11600_v21, %v11596_v35 }
  0x9e   :  { %v10267_v3 = vpack.c.bf16 %v11612_v48, %v11610_v15  ;;  %v10269_v24 = vpack.c.bf16 %v11630_v26, %v11628_v44  ;;  %v10217_v29 = vpack.c.bf16 %v11592_v57, %v11589_v2  ;;  %v10219_v11 = vpack.c.bf16 %v11606_v55, %v11604_v31 }
  0x9f   :  { %10208 = vmatpush1.bf16.msra.mxu1 %v11637_v39  ;;  %v2179_v28 = vand.u32 4294901760, %v2178_v49  ;;  %v10271_v19 = vpack.c.bf16 %v11664_v52, %v11662_v18  ;;  %v13700_v40 = vand.u32 4294901760, %v11596_v35  ;;  %v13701_v7 = vand.u32 4294901760, %v11600_v21 }
  0xa0   :  { %2058 = vmatprep.subr.mxu1 %v11656_v36  ;;  %2629 = vmatpush1.msra.mxu0 %v11674_v61  ;;  %v13702_v49 = vand.u32 4294901760, %v11610_v15  ;;  %v13706_v35 = vand.u32 4294901760, %v11589_v2  ;;  %v13707_v21 = vand.u32 4294901760, %v11592_v57  ;;  %v13710_v2 = vand.u32 4294901760, %v11620_v25 }
  0xa1   :  { %10258 = vmatprep.subr.bf16.mxu0 %v10257_v38  ;;  %2690 = vmatmul.mubr.f32.vlgmr.msra.gmra.mrb[4].mxu0 %v11286_v12  ;;  %v2754_v38 = vand.u32 4294901760, %v2753_v59  ;;  %v13703_v59 = vand.u32 4294901760, %v11612_v48  ;;  %v67_v48 = vld [vmem:[#allocation7 + $0x50] sm:$0xff]  ;;  %v13711_v57 = vand.u32 4294901760, %v11622_v4 }
  0xa2   :  { %10260 = vmatpush1.bf16.msra.mxu0 %v10259_v5  ;;  %2810 = vmatprep.mubr.f32.mxu0 %v13699_v37  ;;  %v2185_v5 = vand.u32 4294901760, %v2184_v16  ;;  %v104_v16 = vld [vmem:[#allocation7 + $0x178] sm:$0xff]  ;;  %v10233_v15 = vpack.c.bf16 %v13707_v21, %v13706_v35  ;;  %v169_v21 = vld [vmem:[#allocation7 + $0x380] sm:$0xff] }
  0xa3   :  { %2060 = vmatpush1.msra.mxu1 %v11672_v41  ;;  %10262 = vmatprep.subr.bf16.mxu0 %v10261_v54  ;;  %v10221_v54 = vpack.c.bf16 %v11622_v4, %v11620_v25 }
  0xa4   :  { %10210 = vmatprep.subr.bf16.mxu1 %v10209_v8  ;;  %2121 = vmatmul.mubr.f32.vlgmr.msra.gmra.mrb[4].mxu1 %v11286_v12  ;;  %v10223_v8 = vpack.c.bf16 %v11641_v60, %v11639_v62 }
  0xa5   :  { %10212 = vmatpush1.bf16.msra.mxu1 %v10211_v34  ;;  %2241 = vmatprep.mubr.f32.mxu1 %v13699_v37  ;;  %v68_v34 = vld [vmem:[#allocation7 + $0x58] sm:$0xff] }
  0xa6   :  { %10214 = vmatprep.subr.bf16.mxu1 %v10213_v45  ;;  %10264 = vmatpush1.bf16.msra.mxu0 %v10263_v63  ;;  %v102_v45 = vld [vmem:[#allocation7 + $0x168] sm:$0xff]  ;;  %v10281_v63 = vpack.c.bf16 %v13701_v7, %v13700_v40  ;;  %v10237_v40 = vpack.c.bf16 %v13711_v57, %v13710_v2  ;;  %v13712_v7 = vand.u32 4294901760, %v11662_v18  ;;  %v3193_v2 = vand.u32 4294901760, %v169_v21 }
  0xa7   :  { %2749 = vmatprep.subr.mxu0 %v2748_v10  ;;  %v10283_v10 = vpack.c.bf16 %v13703_v59, %v13702_v49  ;;  %v10239_v49 = vpack.c.bf16 %v2171_v27, %v2159_v47  ;;  %v170_v59 = vld [vmem:[#allocation7 + $0x388] sm:$0xff] }
  0xa8   :  { %v138_v18 = vld [vmem:[#allocation7 + $0x288] sm:$0xff] }
  0xa9   :  { %10216 = vmatpush1.bf16.msra.mxu1 %v10215_v46  ;;  %v70_v46 = vld [vmem:[#allocation7 + $0x68] sm:$0xff] }
  0xaa   :  { %2180 = vmatprep.subr.mxu1 %v2179_v28  ;;  %2755 = vmatpush1.msra.mxu0 %v2754_v38  ;;  %v13704_v28 = vand.u32 4294901760, %v11628_v44  ;;  %v13705_v38 = vand.u32 4294901760, %v11630_v26  ;;  %v13709_v44 = vand.u32 4294901760, %v11606_v55  ;;  %v3748_v26 = vand.u32 4294901760, %v70_v46  ;;  %v136_v55 = vld [vmem:[#allocation7 + $0x278] sm:$0xff] }
  0xab   :  { %10266 = vmatprep.subr.bf16.mxu0 %v10265_v22  ;;  %2812 = vmatmul.mubr.f32.vlgmr.msra.gmra.mrb[4].mxu0 %v11253_v43 }
  0xac   :  { %10268 = vmatpush1.bf16.msra.mxu0 %v10267_v3  ;;  %2902 = vmatprep.mubr.f32.mxu0 %v13699_v37  ;;  %v10285_v22 = vpack.c.bf16 %v13705_v38, %v13704_v28  ;;  %v3179_v3 = vand.u32 4294901760, %v68_v34  ;;  %v11875_v27 = vsub.f32 %v70_v46, %v3748_v26 }
  0xad   :  { %2186 = vmatpush1.msra.mxu1 %v2185_v5  ;;  %10270 = vmatprep.subr.bf16.mxu0 %v10269_v24  ;;  %v3183_v5 = vand.u32 4294901760, %v102_v45  ;;  %v13708_v24 = vand.u32 4294901760, %v11604_v31  ;;  %v13713_v31 = vand.u32 4294901760, %v11664_v52  ;;  %v3181_v52 = vand.u32 4294901760, %v67_v48 }
  0xae   :  { %10218 = vmatprep.subr.bf16.mxu1 %v10217_v29  ;;  %2243 = vmatmul.mubr.f32.vlgmr.msra.gmra.mrb[4].mxu1 %v11253_v43  ;;  %v11867_v4 = vsub.f32 %v68_v34, %v3179_v3 }
  0xaf   :  { %10220 = vmatpush1.bf16.msra.mxu1 %v10219_v11  ;;  %2333 = vmatprep.mubr.f32.mxu1 %v13699_v37  ;;  %v10235_v29 = vpack.c.bf16 %v13709_v44, %v13708_v24  ;;  %v3752_v11 = vand.u32 4294901760, %v104_v16  ;;  %v11865_v25 = vpack.c.bf16 %v3183_v5, %v3179_v3  ;;  %v11871_v62 = vsub.f32 %v102_v45, %v3183_v5  ;;  %v137_v24 = vld [vmem:[#allocation7 + $0x280] sm:$0xff]  ;;  %v171_v44 = vld [vmem:[#allocation7 + $0x390] sm:$0xff] }
  0xb0   :  { %10222 = vmatprep.subr.bf16.mxu1 %v10221_v54  ;;  %10272 = vmatpush1.bf16.msra.mxu0 %v10271_v19  ;;  %v101_v54 = vld [vmem:[#allocation7 + $0x160] sm:$0xff]  ;;  %v11879_v34 = vsub.f32 %v67_v48, %v3181_v52  ;;  %v3187_v3 = vand.u32 4294901760, %v136_v55 }
  0xb1   :  { %2844 = vmatprep.subr.mxu0 %v11726_v23  ;;  %v69_v19 = vld [vmem:[#allocation7 + $0x60] sm:$0xff]  ;;  %v3185_v28 = vand.u32 4294901760, %v101_v54  ;;  %v11873_v60 = vpack.c.bf16 %v3752_v11, %v3748_v26  ;;  %v11877_v47 = vsub.f32 %v104_v16, %v3752_v11  ;;  %v3762_v23 = vand.u32 4294901760, %v171_v44 }
  0xb2   :  { %v3750_v38 = vand.u32 4294901760, %v69_v19  ;;  %v11893_v11 = vsub.f32 %v136_v55, %v3187_v3 }
  0xb3   :  { %10224 = vmatpush1.bf16.msra.mxu1 %v10223_v8  ;;  %v103_v8 = vld [vmem:[#allocation7 + $0x170] sm:$0xff]  ;;  %v11883_v57 = vpack.c.bf16 %v3185_v28, %v3181_v52  ;;  %v11885_v46 = vsub.f32 %v101_v54, %v3185_v28  ;;  %v13620_v28 = vand.u32 4294901760, %v11875_v27 }
  0xb4   :  { %2275 = vmatprep.subr.mxu1 %v11754_v32  ;;  %2847 = vmatpush1.msra.mxu0 %v11710_v9  ;;  %v3754_v35 = vand.u32 4294901760, %v103_v8  ;;  %v11889_v16 = vsub.f32 %v69_v19, %v3750_v38  ;;  %v11917_v9 = vsub.f32 %v169_v21, %v3193_v2 }
  0xb5   :  { %10274 = vmatprep.subr.bf16.mxu0 %v11594_v53  ;;  %2905 = vmatmul.mubr.f32.vlgmr.msra.gmra.mrb[4].mxu0 %v11264_v50 }
  0xb6   :  { %10276 = vmatpush1.bf16.msra.mxu0 %v11608_v51  ;;  %2985 = vmatprep.mubr.f32.mxu0 %v13699_v37  ;;  %v11887_v26 = vpack.c.bf16 %v3754_v35, %v3750_v38  ;;  %v11891_v48 = vsub.f32 %v103_v8, %v3754_v35  ;;  %v206_v8 = vld [vmem:[#allocation7 + $0x4a8] sm:$0x7] }
  0xb7   :  { %2278 = vmatpush1.msra.mxu1 %v11698_v13  ;;  %10278 = vmatprep.subr.bf16.mxu0 %v11626_v14  ;;  %v13619_v13 = vand.u32 4294901760, %v11877_v47 }
  0xb8   :  { %10226 = vmatprep.subr.bf16.mxu1 %v11587_v17  ;;  %2336 = vmatmul.mubr.f32.vlgmr.msra.gmra.mrb[4].mxu1 %v11264_v50  ;;  %v13616_v35 = vand.u32 4294901760, %v11891_v48 }
  0xb9   :  { %10228 = vmatpush1.bf16.msra.mxu1 %v11602_v20  ;;  %2416 = vmatprep.mubr.f32.mxu1 %v13699_v37 }
  0xba   :  { %10230 = vmatprep.subr.bf16.mxu1 %v11614_v30  ;;  %10280 = vmatpush1.bf16.msra.mxu0 %v11653_v42 }
  0xbb   :  { %2928 = vmatprep.subr.mxu0 %v11670_v33 }
  0xbd   :  { %10232 = vmatpush1.bf16.msra.mxu1 %v11637_v39 }
  0xbe   :  { %2359 = vmatprep.subr.mxu1 %v11656_v36  ;;  %2930 = vmatpush1.msra.mxu0 %v11674_v61 }
  0xbf   :  { %10282 = vmatprep.subr.bf16.mxu0 %v10281_v63  ;;  %2989 = vmatmul.mubr.f32.vlgmr.msra.gmra.mrb[4].mxu0 %v11272_v58  ;;  %v10287_v63 = vpack.c.bf16 %v13713_v31, %v13712_v7  ;;  %v203_v7 = vld [vmem:[#allocation7 + $0x490] sm:$0x7] }
  0xc0   :  { %10284 = vmatpush1.bf16.msra.mxu0 %v10283_v10  ;;  %3089 = vmatprep.mubr.f32.mxu0 %v13699_v37  ;;  %v172_v10 = vld [vmem:[#allocation7 + $0x398] sm:$0xff] }
  0xc1   :  { %2361 = vmatpush1.msra.mxu1 %v11672_v41  ;;  %10286 = vmatprep.subr.bf16.mxu0 %v10285_v22  ;;  %v135_v22 = vld [vmem:[#allocation7 + $0x270] sm:$0xff]  ;;  %v3760_v45 = vand.u32 4294901760, %v172_v10 }
  0xc2   :  { %10234 = vmatprep.subr.bf16.mxu1 %v10233_v15  ;;  %2420 = vmatmul.mubr.f32.vlgmr.msra.gmra.mrb[4].mxu1 %v11272_v58  ;;  %v3191_v15 = vand.u32 4294901760, %v170_v59  ;;  %v3189_v5 = vand.u32 4294901760, %v135_v22 }
  0xc3   :  { %10236 = vmatpush1.bf16.msra.mxu1 %v10235_v29  ;;  %2520 = vmatprep.mubr.f32.mxu1 %v13699_v37  ;;  %v3756_v29 = vand.u32 4294901760, %v138_v18 }
  0xc4   :  { %10238 = vmatprep.subr.bf16.mxu1 %v10237_v40  ;;  %10288 = vmatpush1.bf16.msra.mxu0 %v10287_v63  ;;  %v3758_v40 = vand.u32 4294901760, %v137_v24  ;;  %v11899_v54 = vpack.c.bf16 %v3191_v15, %v3187_v3  ;;  %v11901_v31 = vsub.f32 %v170_v59, %v3191_v15  ;;  %v205_v63 = vld [vmem:[#allocation7 + $0x4a0] sm:$0x7]  ;;  %v11915_v32 = vsub.f32 %v135_v22, %v3189_v5 }
  0xc5   :  { %3030 = vmatprep.subr.mxu0 %v2746_v1  ;;  %v204_v1 = vld [vmem:[#allocation7 + $0x498] sm:$0x7]  ;;  %v11903_v19 = vsub.f32 %v138_v18, %v3756_v29  ;;  %v11907_v55 = vpack.c.bf16 %v3760_v45, %v3756_v29  ;;  %v269_v18 = vsel %vm231_vm0, %v205_v63, 0  ;;  %v13607_v3 = vand.u32 4294901760, %v11885_v46 }
  0xc6   :  { %v11926_v59 = vpack.c.bf16 %v3762_v23, %v3758_v40  ;;  %v11933_v52 = vsub.f32 %v137_v24, %v3758_v40  ;;  %v11950_v21 = vand.u32 4294901760, %v269_v18  ;;  %v3855_v40 = vsub.f32 %v11891_v48, %v13616_v35 }
  0xc7   :  { %10240 = vmatpush1.bf16.msra.mxu1 %v10239_v49  ;;  %v11909_v49 = vsub.f32 %v172_v10, %v3760_v45  ;;  %v13610_v10 = vand.u32 4294901760, %v11867_v4  ;;  %v13614_v45 = vand.u32 4294901760, %v11893_v11 }
  0xc8   :  { %2461 = vmatprep.subr.mxu1 %v2177_v0  ;;  %3034 = vmatpush1.msra.mxu0 %v2752_v56  ;;  %v11911_v0 = vpack.c.bf16 %v3193_v2, %v3189_v5  ;;  %v11920_v56 = vsel %vm231_vm0, %v204_v1, 0  ;;  %v11977_v5 = vsub.f32 %v269_v18, %v11950_v21  ;;  %v3286_v1 = vsub.f32 %v11885_v46, %v13607_v3 }
  0xc9   :  { %10290 = vmatprep.subr.bf16.mxu0 %v11594_v53  ;;  %3091 = vmatmul.mubr.f32.vlgmr.msra.gmra.mrb[4].mxu0 %v11253_v43  ;;  %v263_v53 = vsel %vm231_vm0, %v203_v7, 0  ;;  %v11961_v24 = vsub.f32 %v11867_v4, %v13610_v10  ;;  %v13615_v7 = vand.u32 4294901760, %v11933_v52  ;;  %v3856_v10 = vand.u32 4294901760, %v3855_v40 }
  0xca   :  { %10292 = vmatpush1.bf16.msra.mxu0 %v11608_v51  ;;  %3171 = vmatprep.mubr.f32.mxu0 %v13699_v37  ;;  %v272_v51 = vsel %vm231_vm0, %v206_v8, 0  ;;  %v11942_v38 = vand.u32 4294901760, %v263_v53 }
  0xcb   :  { %2465 = vmatpush1.msra.mxu1 %v2183_v6  ;;  %10294 = vmatprep.subr.bf16.mxu0 %v11626_v14  ;;  %v13618_v14 = vand.u32 4294901760, %v11889_v16  ;;  %v11940_v6 = vsub.f32 %v171_v44, %v3762_v23  ;;  %v11948_v22 = vand.u32 4294901760, %v272_v51  ;;  %v3837_v44 = vsub.f32 %v11875_v27, %v13620_v28 }
  0xcc   :  { %10242 = vmatprep.subr.bf16.mxu1 %v11587_v17  ;;  %2522 = vmatmul.mubr.f32.vlgmr.msra.gmra.mrb[4].mxu1 %v11253_v43  ;;  %v13609_v17 = vand.u32 4294901760, %v11871_v62  ;;  %v11956_v15 = vsub.f32 %v263_v53, %v11942_v38  ;;  %v13613_v23 = vand.u32 4294901760, %v11901_v31 }
  0xcd   :  { %10244 = vmatpush1.bf16.msra.mxu1 %v11602_v20  ;;  %2602 = vmatprep.mubr.f32.mxu1 %v13699_v37  ;;  %v13608_v20 = vand.u32 4294901760, %v11879_v34  ;;  %v3843_v29 = vsub.f32 %v11889_v16, %v13618_v14  ;;  %v13617_v8 = vand.u32 4294901760, %v11940_v6  ;;  %v12008_v53 = vsub.f32 %v272_v51, %v11948_v22 }
  0xce   :  { %10246 = vmatprep.subr.bf16.mxu1 %v11614_v30  ;;  %10296 = vmatpush1.bf16.msra.mxu0 %v11653_v42  ;;  %v13612_v30 = vand.u32 4294901760, %v11903_v19  ;;  %v13611_v42 = vand.u32 4294901760, %v11909_v49  ;;  %v3280_v2 = vsub.f32 %v11871_v62, %v13609_v17  ;;  %v3838_v18 = vand.u32 4294901760, %v3837_v44 }
  0xcf   :  { %3114 = vmatprep.subr.mxu0 %v11670_v33  ;;  %v3849_v33 = vsub.f32 %v11877_v47, %v13619_v13  ;;  %v3292_v17 = vsub.f32 %v11893_v11, %v13614_v45  ;;  %v3304_v51 = vsub.f32 %v11901_v31, %v13613_v23  ;;  %v3269_v44 = vand.u32 4294901760, %v11961_v24 }
  0xd0   :  { %v3873_v63 = vsub.f32 %v11909_v49, %v13611_v42  ;;  %v3297_v42 = vand.u32 4294901760, %v11915_v32  ;;  %v3281_v40 = vand.u32 4294901760, %v3280_v2 }
  0xd1   :  { %10248 = vmatpush1.bf16.msra.mxu1 %v11637_v39  ;;  %v3274_v39 = vsub.f32 %v11879_v34, %v13608_v20  ;;  %v3850_v3 = vand.u32 4294901760, %v3849_v33  ;;  %v3844_v20 = vand.u32 4294901760, %v3843_v29  ;;  %v3879_v33 = vsub.f32 %v11940_v6, %v13617_v8 }
  0xd2   :  { %2545 = vmatprep.subr.mxu1 %v11656_v36  ;;  %3116 = vmatpush1.msra.mxu0 %v11674_v61  ;;  %v11999_v36 = vand.u32 4294901760, %v11920_v56  ;;  %v3861_v61 = vsub.f32 %v11903_v19, %v13612_v30  ;;  %v3309_v30 = vand.u32 4294901760, %v11917_v9  ;;  %v3874_v45 = vand.u32 4294901760, %v3873_v63 }
  0xd3   :  { %3173 = vmatmul.mubr.f32.vlgmr.msra.gmra.mrb[4].mxu0 %v11253_v43  ;;  %10346 = vmatprep.subr.bf16.mxu0 %v11873_v60  ;;  %v3275_v35 = vand.u32 4294901760, %v3274_v39  ;;  %v3287_v8 = vand.u32 4294901760, %v3286_v1  ;;  %v3293_v14 = vand.u32 4294901760, %v3292_v17  ;;  %v3305_v13 = vand.u32 4294901760, %v3304_v51 }
  0xd4   :  { %10348 = vmatpush1.bf16.msra.mxu0 %v11887_v26  ;;  %3822 = vmatprep.mubr.f32.mxu0 %v13699_v37  ;;  %v12033_v29 = vsub.f32 %v11920_v56, %v11999_v36  ;;  %v3862_v23 = vand.u32 4294901760, %v3861_v61  ;;  %v10355_v56 = vpack.c.bf16 %v3856_v10, %v3844_v20  ;;  %v3298_v2 = vsub.f32 %v11915_v32, %v3297_v42 }
  0xd5   :  { %2547 = vmatpush1.msra.mxu1 %v11672_v41  ;;  %10350 = vmatprep.subr.bf16.mxu0 %v11907_v55  ;;  %v3867_v41 = vsub.f32 %v11933_v52, %v13615_v7  ;;  %v10353_v7 = vpack.c.bf16 %v3850_v3, %v3838_v18  ;;  %v3310_v61 = vsub.f32 %v11917_v9, %v3309_v30  ;;  %v3880_v28 = vand.u32 4294901760, %v3879_v33 }
  0xd6   :  { %2604 = vmatmul.mubr.f32.vlgmr.msra.gmra.mrb[4].mxu1 %v11253_v43  ;;  %10298 = vmatprep.subr.bf16.mxu1 %v11865_v25  ;;  %v3315_v24 = vand.u32 4294901760, %v12033_v29  ;;  %v3890_v3 = vand.u32 4294901760, %v11977_v5  ;;  %v10357_v17 = vpack.c.bf16 %v3874_v45, %v3862_v23  ;;  %v13714_v10 = vand.u32 4294901760, %v12008_v53 }
  0xd7   :  { %10300 = vmatpush1.bf16.msra.mxu1 %v11883_v57  ;;  %3253 = vmatprep.mubr.f32.mxu1 %v13699_v37  ;;  %v3868_v63 = vand.u32 4294901760, %v3867_v41  ;;  %v10305_v39 = vpack.c.bf16 %v3281_v40, %v3269_v44  ;;  %v10307_v1 = vpack.c.bf16 %v3287_v8, %v3275_v35  ;;  %v10309_v18 = vpack.c.bf16 %v3305_v13, %v3293_v14 }
  0xd8   :  { %10302 = vmatprep.subr.bf16.mxu1 %v11899_v54  ;;  %10352 = vmatpush1.bf16.msra.mxu0 %v11926_v59  ;;  %v3885_v20 = vsub.f32 %v12008_v53, %v13714_v10  ;;  %v3299_v51 = vand.u32 4294901760, %v3298_v2  ;;  %v3311_v41 = vand.u32 4294901760, %v3310_v61  ;;  %v3321_v33 = vand.u32 4294901760, %v11956_v15 }
  0xd9   :  { %3765 = vmatprep.subr.mxu0 %v11948_v22  ;;  %v10359_v45 = vpack.c.bf16 %v3880_v28, %v3868_v63  ;;  %v3316_v23 = vsub.f32 %v12033_v29, %v3315_v24  ;;  %v3891_v10 = vsub.f32 %v11977_v5, %v3890_v3  ;;  %v10361_v8 = vpack.c.bf16 %v11877_v47, %v11875_v27 }
  0xda   :  { %v3886_v13 = vand.u32 4294901760, %v3885_v20  ;;  %v10311_v14 = vpack.c.bf16 %v3311_v41, %v3299_v51  ;;  %v3322_v28 = vsub.f32 %v11956_v15, %v3321_v33  ;;  %v10363_v44 = vpack.c.bf16 %v11891_v48, %v11889_v16  ;;  %v72_v51 = vld [vmem:[#allocation7 + $0x78] sm:$0xff]  ;;  %v106_v41 = vld [vmem:[#allocation7 + $0x188] sm:$0xff] }
  0xdb   :  { %10304 = vmatpush1.bf16.msra.mxu1 %v11911_v0  ;;  %v3317_v35 = vand.u32 4294901760, %v3316_v23  ;;  %v10313_v2 = vpack.c.bf16 %v11871_v62, %v11867_v4  ;;  %v10315_v61 = vpack.c.bf16 %v11885_v46, %v11879_v34  ;;  %v10317_v63 = vpack.c.bf16 %v11901_v31, %v11893_v11 }
  0xdc   :  { %3196 = vmatprep.subr.mxu1 %v11999_v36  ;;  %3767 = vmatpush1.msra.mxu0 %v11950_v21  ;;  %v3323_v40 = vand.u32 4294901760, %v3322_v28  ;;  %v10319_v20 = vpack.c.bf16 %v11917_v9, %v11915_v32  ;;  %v13718_v23 = vand.u32 4294901760, %v11891_v48  ;;  %v4317_v48 = vand.u32 4294901760, %v72_v51 }
  0xdd   :  { %10354 = vmatprep.subr.bf16.mxu0 %v10353_v7  ;;  %3828 = vmatmul.mubr.f32.vlgmr.msra.gmra.mrb[6].mxu0 %v11286_v12  ;;  %v3892_v7 = vand.u32 4294901760, %v3891_v10 }
  0xde   :  { %10356 = vmatpush1.bf16.msra.mxu0 %v10355_v56  ;;  %3948 = vmatprep.mubr.f32.mxu0 %v13699_v37  ;;  %v10365_v56 = vpack.c.bf16 %v11909_v49, %v11903_v19 }
  0xdf   :  { %3198 = vmatpush1.msra.mxu1 %v11942_v38  ;;  %10358 = vmatprep.subr.bf16.mxu0 %v10357_v17  ;;  %v10367_v17 = vpack.c.bf16 %v11940_v6, %v11933_v52 }
  0xe0   :  { %10306 = vmatprep.subr.bf16.mxu1 %v10305_v39  ;;  %3259 = vmatmul.mubr.f32.vlgmr.msra.gmra.mrb[6].mxu1 %v11286_v12  ;;  %v13715_v39 = vand.u32 4294901760, %v11875_v27  ;;  %v13721_v27 = vand.u32 4294901760, %v11867_v4  ;;  %v13726_v4 = vand.u32 4294901760, %v11901_v31  ;;  %v10335_v31 = vpack.c.bf16 %v3309_v30, %v3297_v42 }
  0xe1   :  { %10308 = vmatpush1.bf16.msra.mxu1 %v10307_v1  ;;  %3379 = vmatprep.mubr.f32.mxu1 %v13699_v37  ;;  %v13716_v1 = vand.u32 4294901760, %v11877_v47  ;;  %v13722_v47 = vand.u32 4294901760, %v11871_v62  ;;  %v13729_v42 = vand.u32 4294901760, %v12008_v53 }
  0xe2   :  { %10310 = vmatprep.subr.bf16.mxu1 %v10309_v18  ;;  %10360 = vmatpush1.bf16.msra.mxu0 %v10359_v45  ;;  %v13717_v45 = vand.u32 4294901760, %v11889_v16 }
  0xe3   :  { %3887 = vmatprep.subr.mxu0 %v3886_v13  ;;  %v10377_v18 = vpack.c.bf16 %v13716_v1, %v13715_v39  ;;  %v13719_v13 = vand.u32 4294901760, %v11903_v19  ;;  %v10329_v16 = vpack.c.bf16 %v13722_v47, %v13721_v27  ;;  %v13723_v19 = vand.u32 4294901760, %v11879_v34  ;;  %v140_v1 = vld [vmem:[#allocation7 + $0x298] sm:$0xff]  ;;  %v139_v47 = vld [vmem:[#allocation7 + $0x290] sm:$0xff] }
  0xe4   :  { %v10379_v10 = vpack.c.bf16 %v13718_v23, %v13717_v45  ;;  %v142_v23 = vld [vmem:[#allocation7 + $0x2a8] sm:$0xff] }
  0xe5   :  { %10312 = vmatpush1.bf16.msra.mxu1 %v10311_v14  ;;  %v13720_v14 = vand.u32 4294901760, %v11909_v49  ;;  %v13724_v49 = vand.u32 4294901760, %v11885_v46  ;;  %v107_v46 = vld [vmem:[#allocation7 + $0x190] sm:$0xff] }
  0xe6   :  { %3318 = vmatprep.subr.mxu1 %v3317_v35  ;;  %3893 = vmatpush1.msra.mxu0 %v3892_v7  ;;  %v74_v35 = vld [vmem:[#allocation7 + $0x88] sm:$0xff]  ;;  %v108_v7 = vld [vmem:[#allocation7 + $0x198] sm:$0xff] }
  0xe7   :  { %10362 = vmatprep.subr.bf16.mxu0 %v10361_v8  ;;  %3950 = vmatmul.mubr.f32.vlgmr.msra.gmra.mrb[6].mxu0 %v11253_v43  ;;  %v10381_v28 = vpack.c.bf16 %v13720_v14, %v13719_v13  ;;  %v4321_v8 = vand.u32 4294901760, %v106_v41  ;;  %v4886_v34 = vand.u32 4294901760, %v74_v35  ;;  %v4890_v39 = vand.u32 4294901760, %v108_v7 }
  0xe8   :  { %10364 = vmatpush1.bf16.msra.mxu0 %v10363_v44  ;;  %4040 = vmatprep.mubr.f32.mxu0 %v13699_v37  ;;  %v71_v44 = vld [vmem:[#allocation7 + $0x70] sm:$0xff]  ;;  %v4892_v14 = vand.u32 4294901760, %v107_v46 }
  0xe9   :  { %3324 = vmatpush1.msra.mxu1 %v3323_v40  ;;  %10366 = vmatprep.subr.bf16.mxu0 %v10365_v56  ;;  %v105_v40 = vld [vmem:[#allocation7 + $0x180] sm:$0xff]  ;;  %v10331_v56 = vpack.c.bf16 %v13724_v49, %v13723_v19  ;;  %v4319_v45 = vand.u32 4294901760, %v71_v44  ;;  %v12150_v32 = vsub.f32 %v106_v41, %v4321_v8  ;;  %v12152_v9 = vpack.c.bf16 %v4890_v39, %v4886_v34 }
  0xea   :  { %10314 = vmatprep.subr.bf16.mxu1 %v10313_v2  ;;  %3381 = vmatmul.mubr.f32.vlgmr.msra.gmra.mrb[6].mxu1 %v11253_v43  ;;  %v73_v2 = vld [vmem:[#allocation7 + $0x80] sm:$0xff]  ;;  %v12154_v30 = vsub.f32 %v74_v35, %v4886_v34  ;;  %v4894_v19 = vand.u32 4294901760, %v142_v23  ;;  %v4327_v41 = vand.u32 4294901760, %v139_v47 }
  0xeb   :  { %10316 = vmatpush1.bf16.msra.mxu1 %v10315_v61  ;;  %3471 = vmatprep.mubr.f32.mxu1 %v13699_v37  ;;  %v13725_v61 = vand.u32 4294901760, %v11893_v11  ;;  %v4323_v11 = vand.u32 4294901760, %v105_v40  ;;  %v4888_v13 = vand.u32 4294901760, %v73_v2 }
  0xec   :  { %10318 = vmatprep.subr.bf16.mxu1 %v10317_v63  ;;  %10368 = vmatpush1.bf16.msra.mxu0 %v10367_v17  ;;  %v13727_v63 = vand.u32 4294901760, %v11933_v52  ;;  %v13728_v17 = vand.u32 4294901760, %v11940_v6  ;;  %v12145_v52 = vpack.c.bf16 %v4321_v8, %v4317_v48  ;;  %v12147_v6 = vsub.f32 %v72_v51, %v4317_v48 }
  0xed   :  { %3982 = vmatprep.subr.mxu0 %v12008_v53  ;;  %v10333_v62 = vpack.c.bf16 %v13726_v4, %v13725_v61  ;;  %v12158_v51 = vsub.f32 %v108_v7, %v4890_v39  ;;  %v12160_v48 = vpack.c.bf16 %v4323_v11, %v4319_v45  ;;  %v175_v61 = vld [vmem:[#allocation7 + $0x3b0] sm:$0xff]  ;;  %v12162_v4 = vsub.f32 %v71_v44, %v4319_v45 }
  0xee   :  { %v12166_v35 = vpack.c.bf16 %v4892_v14, %v4888_v13  ;;  %v12168_v53 = vsub.f32 %v73_v2, %v4888_v13  ;;  %v12170_v7 = vsub.f32 %v107_v46, %v4892_v14  ;;  %v4900_v39 = vand.u32 4294901760, %v175_v61  ;;  %v207_v45 = vld [vmem:[#allocation7 + $0x4b0] sm:$0x7]  ;;  %v209_v2 = vld [vmem:[#allocation7 + $0x4c0] sm:$0x7] }
  0xef   :  { %10320 = vmatpush1.bf16.msra.mxu1 %v10319_v20  ;;  %v10383_v20 = vpack.c.bf16 %v13728_v17, %v13727_v63  ;;  %v208_v63 = vld [vmem:[#allocation7 + $0x4b8] sm:$0x7] }
  0xf0   :  { %3413 = vmatprep.subr.mxu1 %v12033_v29  ;;  %3985 = vmatpush1.msra.mxu0 %v11977_v5  ;;  %v12191_v5 = vsel %vm231_vm0, %v208_v63, 0  ;;  %v12222_v14 = vsub.f32 %v175_v61, %v4900_v39 }
  0xf1   :  { %10370 = vmatprep.subr.bf16.mxu0 %v11873_v60  ;;  %4043 = vmatmul.mubr.f32.vlgmr.msra.gmra.mrb[6].mxu0 %v11264_v50  ;;  %v12214_v13 = vand.u32 4294901760, %v12191_v5 }
  0xf2   :  { %10372 = vmatpush1.bf16.msra.mxu0 %v11887_v26  ;;  %4123 = vmatprep.mubr.f32.mxu0 %v13699_v37 }
  0xf3   :  { %3416 = vmatpush1.msra.mxu1 %v11956_v15  ;;  %10374 = vmatprep.subr.bf16.mxu0 %v11907_v55  ;;  %v13633_v15 = vand.u32 4294901760, %v12158_v51 }
  0xf4   :  { %10322 = vmatprep.subr.bf16.mxu1 %v11865_v25  ;;  %3474 = vmatmul.mubr.f32.vlgmr.msra.gmra.mrb[6].mxu1 %v11264_v50 }
  0xf5   :  { %10324 = vmatpush1.bf16.msra.mxu1 %v11883_v57  ;;  %3554 = vmatprep.mubr.f32.mxu1 %v13699_v37 }
  0xf6   :  { %10326 = vmatprep.subr.bf16.mxu1 %v11899_v54  ;;  %10376 = vmatpush1.bf16.msra.mxu0 %v11926_v59 }
  0xf7   :  { %4066 = vmatprep.subr.mxu0 %v11948_v22 }
  0xf9   :  { %10328 = vmatpush1.bf16.msra.mxu1 %v11911_v0 }
  0xfa   :  { %3497 = vmatprep.subr.mxu1 %v11999_v36  ;;  %4068 = vmatpush1.msra.mxu0 %v11950_v21 }
  0xfb   :  { %10378 = vmatprep.subr.bf16.mxu0 %v10377_v18  ;;  %4127 = vmatmul.mubr.f32.vlgmr.msra.gmra.mrb[6].mxu0 %v11272_v58  ;;  %v174_v18 = vld [vmem:[#allocation7 + $0x3a8] sm:$0xff] }
  0xfc   :  { %10380 = vmatpush1.bf16.msra.mxu0 %v10379_v10  ;;  %4227 = vmatprep.mubr.f32.mxu0 %v13699_v37  ;;  %v176_v10 = vld [vmem:[#allocation7 + $0x3b8] sm:$0xff]  ;;  %v4329_v27 = vand.u32 4294901760, %v174_v18 }
  0xfd   :  { %3499 = vmatpush1.msra.mxu1 %v11942_v38  ;;  %10382 = vmatprep.subr.bf16.mxu0 %v10381_v28  ;;  %v4325_v28 = vand.u32 4294901760, %v140_v1  ;;  %v4898_v49 = vand.u32 4294901760, %v176_v10 }
  0xfe   :  { %10330 = vmatprep.subr.bf16.mxu1 %v10329_v16  ;;  %3558 = vmatmul.mubr.f32.vlgmr.msra.gmra.mrb[6].mxu1 %v11272_v58  ;;  %v173_v16 = vld [vmem:[#allocation7 + $0x3a0] sm:$0xff] }
  0xff   :  { %10332 = vmatpush1.bf16.msra.mxu1 %v10331_v56  ;;  %3658 = vmatprep.mubr.f32.mxu1 %v13699_v37  ;;  %v141_v56 = vld [vmem:[#allocation7 + $0x2a0] sm:$0xff]  ;;  %v4331_v8 = vand.u32 4294901760, %v173_v16  ;;  %v12172_v17 = vpack.c.bf16 %v4329_v27, %v4325_v28  ;;  %v12178_v44 = vsub.f32 %v140_v1, %v4325_v28  ;;  %v12184_v46 = vpack.c.bf16 %v4898_v49, %v4894_v19 }
 0x100   :  { %10334 = vmatprep.subr.bf16.mxu1 %v10333_v62  ;;  %10384 = vmatpush1.bf16.msra.mxu0 %v10383_v20  ;;  %v12164_v62 = vsub.f32 %v105_v40, %v4323_v11  ;;  %v210_v20 = vld [vmem:[#allocation7 + $0x4c8] sm:$0x7]  ;;  %v12180_v40 = vsub.f32 %v174_v18, %v4329_v27  ;;  %v4896_v34 = vand.u32 4294901760, %v141_v56  ;;  %v12186_v11 = vsub.f32 %v142_v23, %v4894_v19 }
 0x101   :  { %4168 = vmatprep.subr.mxu0 %v13729_v42  ;;  %v12188_v29 = vsub.f32 %v176_v10, %v4898_v49  ;;  %v284_v1 = vsel %vm231_vm0, %v210_v20, 0  ;;  %v275_v18 = vsel %vm231_vm0, %v207_v45, 0  ;;  %v13634_v23 = vand.u32 4294901760, %v12154_v30 }
 0x102   :  { %v12211_v10 = vpack.c.bf16 %v4900_v39, %v4896_v34  ;;  %v13630_v28 = vand.u32 4294901760, %v12170_v7  ;;  %v12228_v27 = vand.u32 4294901760, %v284_v1  ;;  %v4987_v49 = vsub.f32 %v12158_v51, %v13633_v15 }
 0x103   :  { %10336 = vmatpush1.bf16.msra.mxu1 %v10335_v31  ;;  %v281_v31 = vsel %vm231_vm0, %v209_v2, 0  ;;  %v13624_v19 = vand.u32 4294901760, %v12188_v29  ;;  %v13626_v61 = vand.u32 4294901760, %v12178_v44  ;;  %v13625_v20 = vand.u32 4294901760, %v12180_v40 }
 0x104   :  { %3599 = vmatprep.subr.mxu1 %v3315_v24  ;;  %4172 = vmatpush1.msra.mxu0 %v3890_v3  ;;  %v12195_v24 = vpack.c.bf16 %v4331_v8, %v4327_v41  ;;  %v12197_v3 = vsub.f32 %v139_v47, %v4327_v41  ;;  %v12230_v47 = vand.u32 4294901760, %v275_v18  ;;  %v4993_v63 = vsub.f32 %v12170_v7, %v13630_v28 }
 0x105   :  { %10386 = vmatprep.subr.bf16.mxu0 %v11873_v60  ;;  %4229 = vmatmul.mubr.f32.vlgmr.msra.gmra.mrb[6].mxu0 %v11253_v43  ;;  %v12199_v60 = vsub.f32 %v173_v16, %v4331_v8  ;;  %v12232_v16 = vand.u32 4294901760, %v281_v31  ;;  %v13631_v45 = vand.u32 4294901760, %v12222_v14 }
 0x106   :  { %10388 = vmatpush1.bf16.msra.mxu0 %v11887_v26  ;;  %4309 = vmatprep.mubr.f32.mxu0 %v13699_v37  ;;  %v13623_v26 = vand.u32 4294901760, %v12147_v6  ;;  %v12256_v41 = vsub.f32 %v275_v18, %v12230_v47  ;;  %v12284_v18 = vsub.f32 %v284_v1, %v12228_v27  ;;  %v4994_v1 = vand.u32 4294901760, %v4993_v63 }
 0x107   :  { %3603 = vmatpush1.msra.mxu1 %v3321_v33  ;;  %10390 = vmatprep.subr.bf16.mxu0 %v11907_v55  ;;  %v13632_v55 = vand.u32 4294901760, %v12168_v53  ;;  %v12220_v33 = vsub.f32 %v141_v56, %v4896_v34  ;;  %v13627_v56 = vand.u32 4294901760, %v12164_v62  ;;  %v12268_v34 = vsub.f32 %v281_v31, %v12232_v16 }
 0x108   :  { %10338 = vmatprep.subr.bf16.mxu1 %v11865_v25  ;;  %3660 = vmatmul.mubr.f32.vlgmr.msra.gmra.mrb[6].mxu1 %v11253_v43  ;;  %v13622_v25 = vand.u32 4294901760, %v12150_v32  ;;  %v12239_v42 = vsub.f32 %v12147_v6, %v13623_v26  ;;  %v4988_v31 = vand.u32 4294901760, %v4987_v49  ;;  %v4442_v26 = vsub.f32 %v12180_v40, %v13625_v20 }
 0x109   :  { %10340 = vmatpush1.bf16.msra.mxu1 %v11883_v57  ;;  %3740 = vmatprep.mubr.f32.mxu1 %v13699_v37  ;;  %v13621_v57 = vand.u32 4294901760, %v12162_v4  ;;  %v13629_v39 = vand.u32 4294901760, %v12220_v33  ;;  %v4435_v49 = vand.u32 4294901760, %v12197_v3  ;;  %v5017_v63 = vsub.f32 %v12222_v14, %v13631_v45 }
 0x10a   :  { %10342 = vmatprep.subr.bf16.mxu1 %v11899_v54  ;;  %10392 = vmatpush1.bf16.msra.mxu0 %v11926_v59  ;;  %v4975_v54 = vsub.f32 %v12154_v30, %v13634_v23  ;;  %v13628_v59 = vand.u32 4294901760, %v12186_v11  ;;  %v4418_v8 = vsub.f32 %v12150_v32, %v13622_v25  ;;  %v4430_v25 = vsub.f32 %v12178_v44, %v13626_v61 }
 0x10b   :  { %4252 = vmatprep.subr.mxu0 %v11948_v22  ;;  %v4981_v22 = vsub.f32 %v12168_v53, %v13632_v55  ;;  %v12312_v20 = vsub.f32 %v12191_v5, %v12214_v13  ;;  %v4443_v15 = vand.u32 4294901760, %v4442_v26  ;;  %v5018_v23 = vand.u32 4294901760, %v5017_v63 }
 0x10c   :  { %v4976_v2 = vand.u32 4294901760, %v4975_v54  ;;  %v4424_v54 = vsub.f32 %v12164_v62, %v13627_v56  ;;  %v4419_v61 = vand.u32 4294901760, %v4418_v8  ;;  %v4431_v55 = vand.u32 4294901760, %v4430_v25 }
 0x10d   :  { %10344 = vmatpush1.bf16.msra.mxu1 %v11911_v0  ;;  %v4412_v0 = vsub.f32 %v12162_v4, %v13621_v57  ;;  %v4982_v57 = vand.u32 4294901760, %v4981_v22  ;;  %v4407_v22 = vand.u32 4294901760, %v12239_v42  ;;  %v4436_v8 = vsub.f32 %v12197_v3, %v4435_v49 }
 0x10e   :  { %3683 = vmatprep.subr.mxu1 %v11999_v36  ;;  %4254 = vmatpush1.msra.mxu0 %v11950_v21  ;;  %v4999_v21 = vsub.f32 %v12186_v11, %v13628_v59  ;;  %v5011_v36 = vsub.f32 %v12188_v29, %v13624_v19  ;;  %v4447_v19 = vand.u32 4294901760, %v12199_v60  ;;  %v4425_v45 = vand.u32 4294901760, %v4424_v54 }
 0x10f   :  { %4311 = vmatmul.mubr.f32.vlgmr.msra.gmra.mrb[6].mxu0 %v11253_v43  ;;  %10442 = vmatprep.subr.bf16.mxu0 %v12152_v9  ;;  %v4413_v28 = vand.u32 4294901760, %v4412_v0  ;;  %v10451_v5 = vpack.c.bf16 %v4994_v1, %v4982_v57  ;;  %v4453_v42 = vand.u32 4294901760, %v12312_v20  ;;  %v5028_v0 = vand.u32 4294901760, %v12268_v34 }
 0x110   :  { %10444 = vmatpush1.bf16.msra.mxu0 %v12166_v35  ;;  %4960 = vmatprep.mubr.f32.mxu0 %v13699_v37  ;;  %v5000_v56 = vand.u32 4294901760, %v4999_v21  ;;  %v5012_v59 = vand.u32 4294901760, %v5011_v36  ;;  %v4448_v21 = vsub.f32 %v12199_v60, %v4447_v19  ;;  %v13730_v57 = vand.u32 4294901760, %v12284_v18 }
 0x111   :  { %3685 = vmatpush1.msra.mxu1 %v11942_v38  ;;  %10446 = vmatprep.subr.bf16.mxu0 %v12184_v46  ;;  %v5005_v38 = vsub.f32 %v12220_v33, %v13629_v39  ;;  %v10449_v39 = vpack.c.bf16 %v4988_v31, %v4976_v2  ;;  %v10401_v2 = vpack.c.bf16 %v4419_v61, %v4407_v22  ;;  %v4437_v1 = vand.u32 4294901760, %v4436_v8 }
 0x112   :  { %3742 = vmatmul.mubr.f32.vlgmr.msra.gmra.mrb[6].mxu1 %v11253_v43  ;;  %10394 = vmatprep.subr.bf16.mxu1 %v12145_v52  ;;  %v10453_v25 = vpack.c.bf16 %v5012_v59, %v5000_v56  ;;  %v5023_v26 = vsub.f32 %v12284_v18, %v13730_v57  ;;  %v10403_v31 = vpack.c.bf16 %v4425_v45, %v4413_v28  ;;  %v4459_v63 = vand.u32 4294901760, %v12256_v41 }
 0x113   :  { %10396 = vmatpush1.bf16.msra.mxu1 %v12160_v48  ;;  %4391 = vmatprep.mubr.f32.mxu1 %v13699_v37  ;;  %v5006_v36 = vand.u32 4294901760, %v5005_v38  ;;  %v10405_v54 = vpack.c.bf16 %v4443_v15, %v4431_v55  ;;  %v4449_v38 = vand.u32 4294901760, %v4448_v21  ;;  %v4454_v56 = vsub.f32 %v12312_v20, %v4453_v42 }
 0x114   :  { %10398 = vmatprep.subr.bf16.mxu1 %v12172_v17  ;;  %10448 = vmatpush1.bf16.msra.mxu0 %v12211_v10  ;;  %v5029_v57 = vsub.f32 %v12268_v34, %v5028_v0  ;;  %v5024_v15 = vand.u32 4294901760, %v5023_v26  ;;  %v10459_v45 = vpack.c.bf16 %v12170_v7, %v12168_v53  ;;  %v10409_v8 = vpack.c.bf16 %v12150_v32, %v12147_v6 }
 0x115   :  { %4903 = vmatprep.subr.mxu0 %v12228_v27  ;;  %v10455_v59 = vpack.c.bf16 %v5018_v23, %v5006_v36  ;;  %v10407_v55 = vpack.c.bf16 %v4449_v38, %v4437_v1  ;;  %v4460_v23 = vsub.f32 %v12256_v41, %v4459_v63  ;;  %v4455_v28 = vand.u32 4294901760, %v4454_v56 }
 0x116   :  { %v5030_v61 = vand.u32 4294901760, %v5029_v57  ;;  %v10411_v21 = vpack.c.bf16 %v12164_v62, %v12162_v4  ;;  %v10413_v36 = vpack.c.bf16 %v12180_v40, %v12178_v44  ;;  %v10415_v26 = vpack.c.bf16 %v12199_v60, %v12197_v3  ;;  %v143_v60 = vld [vmem:[#allocation7 + $0x2b0] sm:$0xff] }
 0x117   :  { %10400 = vmatpush1.bf16.msra.mxu1 %v12195_v24  ;;  %v4461_v22 = vand.u32 4294901760, %v4460_v23  ;;  %v13731_v56 = vand.u32 4294901760, %v12154_v30  ;;  %v13732_v57 = vand.u32 4294901760, %v12158_v51  ;;  %v110_v23 = vld [vmem:[#allocation7 + $0x1a8] sm:$0xff] }
 0x118   :  { %4334 = vmatprep.subr.mxu1 %v12214_v13  ;;  %4905 = vmatpush1.msra.mxu0 %v12232_v16 }
 0x119   :  { %10450 = vmatprep.subr.bf16.mxu0 %v10449_v39  ;;  %4966 = vmatmul.mubr.f32.vlgmr.msra.gmra.mrb[8].mxu0 %v11286_v12  ;;  %v10457_v39 = vpack.c.bf16 %v12158_v51, %v12154_v30  ;;  %v78_v30 = vld [vmem:[#allocation7 + $0xa8] sm:$0xff]  ;;  %v13737_v51 = vand.u32 4294901760, %v12147_v6  ;;  %v13742_v6 = vand.u32 4294901760, %v12180_v40 }
 0x11a   :  { %10452 = vmatpush1.bf16.msra.mxu0 %v10451_v5  ;;  %5086 = vmatprep.mubr.f32.mxu0 %v13699_v37  ;;  %v10461_v5 = vpack.c.bf16 %v12188_v29, %v12186_v11 }
 0x11b   :  { %4336 = vmatpush1.msra.mxu1 %v12230_v47  ;;  %10454 = vmatprep.subr.bf16.mxu0 %v10453_v25  ;;  %v10463_v25 = vpack.c.bf16 %v12222_v14, %v12220_v33 }
 0x11c   :  { %10402 = vmatprep.subr.bf16.mxu1 %v10401_v2  ;;  %4397 = vmatmul.mubr.f32.vlgmr.msra.gmra.mrb[8].mxu1 %v11286_v12 }
 0x11d   :  { %10404 = vmatpush1.bf16.msra.mxu1 %v10403_v31  ;;  %4517 = vmatprep.mubr.f32.mxu1 %v13699_v37 }
 0x11e   :  { %10406 = vmatprep.subr.bf16.mxu1 %v10405_v54  ;;  %10456 = vmatpush1.bf16.msra.mxu0 %v10455_v59 }
 0x11f   :  { %5025 = vmatprep.subr.mxu0 %v5024_v15  ;;  %v10473_v15 = vpack.c.bf16 %v13732_v57, %v13731_v56  ;;  %v111_v56 = vld [vmem:[#allocation7 + $0x1b0] sm:$0xff]  ;;  %v144_v57 = vld [vmem:[#allocation7 + $0x2b8] sm:$0xff] }
 0x120   :  { %v5463_v3 = vand.u32 4294901760, %v144_v57 }
 0x121   :  { %10408 = vmatpush1.bf16.msra.mxu1 %v10407_v55  ;;  %v76_v55 = vld [vmem:[#allocation7 + $0x98] sm:$0xff] }
 0x122   :  { %4456 = vmatprep.subr.mxu1 %v4455_v28  ;;  %5031 = vmatpush1.msra.mxu0 %v5030_v61  ;;  %v13733_v28 = vand.u32 4294901760, %v12168_v53  ;;  %v13734_v61 = vand.u32 4294901760, %v12170_v7  ;;  %v13738_v53 = vand.u32 4294901760, %v12150_v32 }
 0x123   :  { %10458 = vmatprep.subr.bf16.mxu0 %v10457_v39  ;;  %5088 = vmatmul.mubr.f32.vlgmr.msra.gmra.mrb[8].mxu0 %v11253_v43 }
 0x124   :  { %10460 = vmatpush1.bf16.msra.mxu0 %v10459_v45  ;;  %5178 = vmatprep.mubr.f32.mxu0 %v13699_v37  ;;  %v10475_v39 = vpack.c.bf16 %v13734_v61, %v13733_v28  ;;  %v13735_v45 = vand.u32 4294901760, %v12186_v11  ;;  %v10425_v7 = vpack.c.bf16 %v13738_v53, %v13737_v51  ;;  %v13740_v11 = vand.u32 4294901760, %v12164_v62  ;;  %v146_v61 = vld [vmem:[#allocation7 + $0x2c8] sm:$0xff] }
 0x125   :  { %4462 = vmatpush1.msra.mxu1 %v4461_v22  ;;  %10462 = vmatprep.subr.bf16.mxu0 %v10461_v5  ;;  %v13736_v22 = vand.u32 4294901760, %v12188_v29  ;;  %v13745_v53 = vand.u32 4294901760, %v12284_v18 }
 0x126   :  { %10410 = vmatprep.subr.bf16.mxu1 %v10409_v8  ;;  %4519 = vmatmul.mubr.f32.vlgmr.msra.gmra.mrb[8].mxu1 %v11253_v43  ;;  %v112_v8 = vld [vmem:[#allocation7 + $0x1b8] sm:$0xff] }
 0x127   :  { %10412 = vmatpush1.bf16.msra.mxu1 %v10411_v21  ;;  %4609 = vmatprep.mubr.f32.mxu1 %v13699_v37  ;;  %v10477_v5 = vpack.c.bf16 %v13736_v22, %v13735_v45  ;;  %v5455_v21 = vand.u32 4294901760, %v76_v55  ;;  %v6028_v62 = vand.u32 4294901760, %v112_v8  ;;  %v6030_v22 = vand.u32 4294901760, %v111_v56 }
 0x128   :  { %10414 = vmatprep.subr.bf16.mxu1 %v10413_v36  ;;  %10464 = vmatpush1.bf16.msra.mxu0 %v10463_v25  ;;  %v5459_v36 = vand.u32 4294901760, %v110_v23  ;;  %v13739_v25 = vand.u32 4294901760, %v12162_v4  ;;  %v6024_v4 = vand.u32 4294901760, %v78_v30 }
 0x129   :  { %5120 = vmatprep.subr.mxu0 %v12284_v18 }
 0x12a   :  { %v10427_v29 = vpack.c.bf16 %v13740_v11, %v13739_v25  ;;  %v12424_v40 = vpack.c.bf16 %v5459_v36, %v5455_v21  ;;  %v12431_v51 = vpack.c.bf16 %v6028_v62, %v6024_v4  ;;  %v6032_v25 = vand.u32 4294901760, %v146_v61 }
 0x12b   :  { %10416 = vmatpush1.bf16.msra.mxu1 %v10415_v26  ;;  %v75_v26 = vld [vmem:[#allocation7 + $0x90] sm:$0xff] }
 0x12c   :  { %4551 = vmatprep.subr.mxu1 %v12312_v20  ;;  %5123 = vmatpush1.msra.mxu0 %v12268_v34 }
 0x12d   :  { %10466 = vmatprep.subr.bf16.mxu0 %v12152_v9  ;;  %5181 = vmatmul.mubr.f32.vlgmr.msra.gmra.mrb[8].mxu0 %v11264_v50 }
 0x12e   :  { %v898_v2 = vpop.f32.mrb[0].mxu0  ;;  %10468 = vmatpush1.bf16.msra.mxu0 %v12166_v35  ;;  %5261 = vmatprep.mubr.f32.mxu0 %v13699_v37 }
 0x12f   :  { %4554 = vmatpush1.msra.mxu1 %v12256_v41  ;;  %v900_v31 = vpop.f32.mrb[1].mxu0  ;;  %10470 = vmatprep.subr.bf16.mxu0 %v12184_v46 }
 0x130   :  { %10418 = vmatprep.subr.bf16.mxu1 %v12145_v52  ;;  %4612 = vmatmul.mubr.f32.vlgmr.msra.gmra.mrb[8].mxu1 %v11264_v50 }
 0x131   :  { %v630_v54 = vpop.f32.mrb[0].mxu1  ;;  %10420 = vmatpush1.bf16.msra.mxu1 %v12160_v48  ;;  %4692 = vmatprep.mubr.f32.mxu1 %v13699_v37 }
 0x132   :  { %v10873_v1 = vadd.f32 %v898_v2, %v630_v54  ;;  %v632_v38 = vpop.f32.mrb[1].mxu1  ;;  %10422 = vmatprep.subr.bf16.mxu1 %v12172_v17  ;;  %10472 = vmatpush1.bf16.msra.mxu0 %v12211_v10  ;;  %v109_v2 = vld [vmem:[#allocation7 + $0x1a0] sm:$0xff]  ;;  %v13741_v54 = vand.u32 4294901760, %v12178_v44  ;;  %v10431_v44 = vpack.c.bf16 %v4447_v19, %v4435_v49  ;;  %v12429_v49 = vsub.f32 %v110_v23, %v5459_v36 }
 0x133   :  { %v10874_v59 = vadd.f32 %v900_v31, %v632_v38  ;;  %5204 = vmatprep.subr.mxu0 %v12228_v27  ;;  %v77_v31 = vld [vmem:[#allocation7 + $0xa0] sm:$0xff]  ;;  %v13744_v38 = vand.u32 4294901760, %v12222_v14  ;;  %v5457_v14 = vand.u32 4294901760, %v75_v26  ;;  %v5461_v28 = vand.u32 4294901760, %v109_v2 }
 0x134   :  { %10007 = vst [vmem:[#allocation8 + $0x10] sm:$0xff] %v10873_v1  ;;  %v10429_v32 = vpack.c.bf16 %v13742_v6, %v13741_v54  ;;  %v13743_v1 = vand.u32 4294901760, %v12220_v33  ;;  %v12426_v33 = vsub.f32 %v76_v55, %v5455_v21  ;;  %v6026_v45 = vand.u32 4294901760, %v77_v31  ;;  %v177_v19 = vld [vmem:[#allocation7 + $0x3c0] sm:$0xff]  ;;  %v179_v54 = vld [vmem:[#allocation7 + $0x3d0] sm:$0xff] }
 0x135   :  { %10008 = vst [vmem:[#allocation8 + $0x18] sm:$0xff] %v10874_v59  ;;  %10424 = vmatpush1.bf16.msra.mxu1 %v12195_v24  ;;  %v12433_v55 = vsub.f32 %v78_v30, %v6024_v4  ;;  %v12439_v21 = vsub.f32 %v75_v26, %v5457_v14  ;;  %v12441_v6 = vpack.c.bf16 %v5461_v28, %v5457_v14  ;;  %v5465_v23 = vand.u32 4294901760, %v143_v60 }
 0x136   :  { %4635 = vmatprep.subr.mxu1 %v12214_v13  ;;  %5206 = vmatpush1.msra.mxu0 %v12232_v16  ;;  %v10479_v59 = vpack.c.bf16 %v13744_v38, %v13743_v1  ;;  %v5469_v36 = vand.u32 4294901760, %v177_v19  ;;  %v212_v1 = vld [vmem:[#allocation7 + $0x4d8] sm:$0x7]  ;;  %v12445_v30 = vpack.c.bf16 %v6030_v22, %v6026_v45  ;;  %v12447_v18 = vsub.f32 %v77_v31, %v6026_v45  ;;  %v214_v38 = vld [vmem:[#allocation7 + $0x4e8] sm:$0x7] }
 0x137   :  { %10474 = vmatprep.subr.bf16.mxu0 %v10473_v15  ;;  %5265 = vmatmul.mubr.f32.vlgmr.msra.gmra.mrb[8].mxu0 %v11272_v58  ;;  %v178_v15 = vld [vmem:[#allocation7 + $0x3c8] sm:$0xff]  ;;  %v213_v31 = vld [vmem:[#allocation7 + $0x4e0] sm:$0x7]  ;;  %v12465_v14 = vsub.f32 %v146_v61, %v6032_v25  ;;  %v12470_v34 = vsel %vm231_vm0, %v212_v1, 0  ;;  %v13648_v61 = vand.u32 4294901760, %v12433_v55 }
 0x138   :  { %10476 = vmatpush1.bf16.msra.mxu0 %v10475_v39  ;;  %5365 = vmatprep.mubr.f32.mxu0 %v13699_v37  ;;  %v180_v39 = vld [vmem:[#allocation7 + $0x3d8] sm:$0xff]  ;;  %v12493_v45 = vand.u32 4294901760, %v12470_v34 }
 0x139   :  { %4637 = vmatpush1.msra.mxu1 %v12230_v47  ;;  %10478 = vmatprep.subr.bf16.mxu0 %v10477_v5  ;;  %v5467_v5 = vand.u32 4294901760, %v178_v15  ;;  %v6036_v11 = vand.u32 4294901760, %v180_v39 }
 0x13a   :  { %10426 = vmatprep.subr.bf16.mxu1 %v10425_v7  ;;  %4696 = vmatmul.mubr.f32.vlgmr.msra.gmra.mrb[8].mxu1 %v11272_v58  ;;  %v12437_v7 = vsub.f32 %v112_v8, %v6028_v62  ;;  %v12449_v8 = vsub.f32 %v111_v56, %v6030_v22  ;;  %v6038_v62 = vand.u32 4294901760, %v179_v54 }
 0x13b   :  { %10428 = vmatpush1.bf16.msra.mxu1 %v10427_v29  ;;  %4796 = vmatprep.mubr.f32.mxu1 %v13699_v37  ;;  %v145_v29 = vld [vmem:[#allocation7 + $0x2c0] sm:$0xff]  ;;  %v12451_v26 = vpack.c.bf16 %v5467_v5, %v5463_v3  ;;  %v12463_v56 = vpack.c.bf16 %v6036_v11, %v6032_v25  ;;  %v12467_v20 = vsub.f32 %v180_v39, %v6036_v11 }
 0x13c   :  { %10430 = vmatprep.subr.bf16.mxu1 %v10429_v32  ;;  %10480 = vmatpush1.bf16.msra.mxu0 %v10479_v59  ;;  %v12443_v32 = vsub.f32 %v109_v2, %v5461_v28  ;;  %v12457_v2 = vsub.f32 %v144_v57, %v5463_v3  ;;  %v12459_v59 = vsub.f32 %v178_v15, %v5467_v5  ;;  %v6034_v4 = vand.u32 4294901760, %v145_v29 }
 0x13d   :  { %5306 = vmatprep.subr.mxu0 %v13745_v53  ;;  %v296_v57 = vsel %vm231_vm0, %v214_v38, 0  ;;  %v293_v28 = vsel %vm231_vm0, %v213_v31, 0  ;;  %v13647_v41 = vand.u32 4294901760, %v12437_v7  ;;  %v12501_v22 = vsub.f32 %v179_v54, %v6038_v62 }
 0x13e   :  { %v12490_v39 = vpack.c.bf16 %v6038_v62, %v6034_v4  ;;  %v13644_v3 = vand.u32 4294901760, %v12449_v8  ;;  %v12507_v5 = vand.u32 4294901760, %v296_v57  ;;  %v13638_v25 = vand.u32 4294901760, %v12467_v20 }
 0x13f   :  { %10432 = vmatpush1.bf16.msra.mxu1 %v10431_v44  ;;  %v211_v44 = vld [vmem:[#allocation7 + $0x4d0] sm:$0x7]  ;;  %v6125_v11 = vsub.f32 %v12437_v7, %v13647_v41  ;;  %v13640_v54 = vand.u32 4294901760, %v12457_v2  ;;  %v13639_v38 = vand.u32 4294901760, %v12459_v59 }
 0x140   :  { %4737 = vmatprep.subr.mxu1 %v4453_v42  ;;  %5310 = vmatpush1.msra.mxu0 %v5028_v0  ;;  %v12474_v42 = vpack.c.bf16 %v5469_v36, %v5465_v23  ;;  %v12476_v0 = vsub.f32 %v143_v60, %v5465_v23  ;;  %v287_v15 = vsel %vm231_vm0, %v211_v44, 0  ;;  %v6131_v1 = vsub.f32 %v12449_v8, %v13644_v3 }
 0x141   :  { %10482 = vmatprep.subr.bf16.mxu0 %v12152_v9  ;;  %5367 = vmatmul.mubr.f32.vlgmr.msra.gmra.mrb[8].mxu0 %v11253_v43  ;;  %v12478_v9 = vsub.f32 %v177_v19, %v5469_v36  ;;  %v12509_v60 = vand.u32 4294901760, %v287_v15  ;;  %v12511_v19 = vand.u32 4294901760, %v293_v28  ;;  %v13645_v44 = vand.u32 4294901760, %v12501_v22 }
 0x142   :  { %10484 = vmatpush1.bf16.msra.mxu0 %v12166_v35  ;;  %5447 = vmatprep.mubr.f32.mxu0 %v13699_v37  ;;  %v13637_v35 = vand.u32 4294901760, %v12426_v33 }
 0x143   :  { %4741 = vmatpush1.msra.mxu1 %v4459_v63  ;;  %10486 = vmatprep.subr.bf16.mxu0 %v12184_v46  ;;  %v13646_v46 = vand.u32 4294901760, %v12447_v18  ;;  %v12499_v63 = vsub.f32 %v145_v29, %v6034_v4  ;;  %v13641_v29 = vand.u32 4294901760, %v12443_v32  ;;  %v12535_v23 = vsub.f32 %v287_v15, %v12509_v60 }
 0x144   :  { %10434 = vmatprep.subr.bf16.mxu1 %v12145_v52  ;;  %4798 = vmatmul.mubr.f32.vlgmr.msra.gmra.mrb[8].mxu1 %v11253_v43  ;;  %v13636_v52 = vand.u32 4294901760, %v12429_v49  ;;  %v12518_v53 = vsub.f32 %v12426_v33, %v13637_v35  ;;  %v12547_v4 = vsub.f32 %v293_v28, %v12511_v19  ;;  %v12563_v15 = vsub.f32 %v296_v57, %v12507_v5 }
 0x145   :  { %10436 = vmatpush1.bf16.msra.mxu1 %v12160_v48  ;;  %4878 = vmatprep.mubr.f32.mxu1 %v13699_v37  ;;  %v13635_v48 = vand.u32 4294901760, %v12439_v21  ;;  %v13643_v62 = vand.u32 4294901760, %v12499_v63  ;;  %v6126_v28 = vand.u32 4294901760, %v6125_v11  ;;  %v6132_v57 = vand.u32 4294901760, %v6131_v1 }
 0x146   :  { %10438 = vmatprep.subr.bf16.mxu1 %v12172_v17  ;;  %10488 = vmatpush1.bf16.msra.mxu0 %v12211_v10  ;;  %v6113_v17 = vsub.f32 %v12433_v55, %v13648_v61  ;;  %v13642_v10 = vand.u32 4294901760, %v12465_v14  ;;  %v5556_v36 = vsub.f32 %v12429_v49, %v13636_v52  ;;  %v5568_v52 = vsub.f32 %v12457_v2, %v13640_v54 }
 0x147   :  { %5390 = vmatprep.subr.mxu0 %v12228_v27  ;;  %v6119_v27 = vsub.f32 %v12447_v18, %v13646_v46  ;;  %v5580_v35 = vsub.f32 %v12459_v59, %v13639_v38  ;;  %v5573_v11 = vand.u32 4294901760, %v12476_v0  ;;  %v6155_v1 = vsub.f32 %v12501_v22, %v13645_v44 }
 0x148   :  { %v6114_v31 = vand.u32 4294901760, %v6113_v17  ;;  %v5562_v17 = vsub.f32 %v12443_v32, %v13641_v29  ;;  %v12591_v38 = vsub.f32 %v12470_v34, %v12493_v45  ;;  %v5557_v54 = vand.u32 4294901760, %v5556_v36 }
 0x149   :  { %10440 = vmatpush1.bf16.msra.mxu1 %v12195_v24  ;;  %v5550_v24 = vsub.f32 %v12439_v21, %v13635_v48  ;;  %v6120_v48 = vand.u32 4294901760, %v6119_v27  ;;  %v5545_v27 = vand.u32 4294901760, %v12518_v53  ;;  %v5569_v46 = vand.u32 4294901760, %v5568_v52 }
 0x14a   :  { %4821 = vmatprep.subr.mxu1 %v12214_v13  ;;  %5392 = vmatpush1.msra.mxu0 %v12232_v16  ;;  %v6137_v13 = vsub.f32 %v12465_v14, %v13642_v10  ;;  %v6149_v16 = vsub.f32 %v12467_v20, %v13638_v25  ;;  %v5585_v25 = vand.u32 4294901760, %v12478_v9  ;;  %v5563_v44 = vand.u32 4294901760, %v5562_v17 }
 0x14b   :  { %5449 = vmatmul.mubr.f32.vlgmr.msra.gmra.mrb[8].mxu0 %v11253_v43  ;;  %10538 = vmatprep.subr.bf16.mxu0 %v12431_v51  ;;  %v5551_v3 = vand.u32 4294901760, %v5550_v24  ;;  %v10547_v34 = vpack.c.bf16 %v6132_v57, %v6120_v48  ;;  %v5581_v41 = vand.u32 4294901760, %v5580_v35  ;;  %v5574_v36 = vsub.f32 %v12476_v0, %v5573_v11 }
 0x14c   :  { %10540 = vmatpush1.bf16.msra.mxu0 %v12445_v30  ;;  %6098 = vmatprep.mubr.f32.mxu0 %v13699_v37  ;;  %v6138_v29 = vand.u32 4294901760, %v6137_v13  ;;  %v6150_v10 = vand.u32 4294901760, %v6149_v16  ;;  %v5586_v13 = vsub.f32 %v12478_v9, %v5585_v25  ;;  %v6156_v61 = vand.u32 4294901760, %v6155_v1 }
 0x14d   :  { %4823 = vmatpush1.msra.mxu1 %v12230_v47  ;;  %10542 = vmatprep.subr.bf16.mxu0 %v12463_v56  ;;  %v6143_v47 = vsub.f32 %v12499_v63, %v13643_v62  ;;  %v10545_v62 = vpack.c.bf16 %v6126_v28, %v6114_v31  ;;  %v5591_v53 = vand.u32 4294901760, %v12591_v38  ;;  %v6166_v24 = vand.u32 4294901760, %v12547_v4 }
 0x14e   :  { %4880 = vmatmul.mubr.f32.vlgmr.msra.gmra.mrb[8].mxu1 %v11253_v43  ;;  %10490 = vmatprep.subr.bf16.mxu1 %v12424_v40  ;;  %v10549_v52 = vpack.c.bf16 %v6150_v10, %v6138_v29  ;;  %v13746_v48 = vand.u32 4294901760, %v12563_v15  ;;  %v10497_v31 = vpack.c.bf16 %v5557_v54, %v5545_v27  ;;  %v10499_v28 = vpack.c.bf16 %v5563_v44, %v5551_v3 }
 0x14f   :  { %10492 = vmatpush1.bf16.msra.mxu1 %v12441_v6  ;;  %5529 = vmatprep.mubr.f32.mxu1 %v13699_v37  ;;  %v6144_v16 = vand.u32 4294901760, %v6143_v47  ;;  %v10501_v17 = vpack.c.bf16 %v5581_v41, %v5569_v46  ;;  %v5575_v57 = vand.u32 4294901760, %v5574_v36  ;;  %v5587_v47 = vand.u32 4294901760, %v5586_v13 }
 0x150   :  { %10494 = vmatprep.subr.bf16.mxu1 %v12451_v26  ;;  %10544 = vmatpush1.bf16.msra.mxu0 %v12490_v39  ;;  %v6161_v35 = vsub.f32 %v12563_v15, %v13746_v48  ;;  %v5597_v1 = vand.u32 4294901760, %v12535_v23  ;;  %v5592_v29 = vsub.f32 %v12591_v38, %v5591_v53  ;;  %v6167_v48 = vsub.f32 %v12547_v4, %v6166_v24 }
 0x151   :  { %6041 = vmatprep.subr.mxu0 %v12507_v5  ;;  %v10551_v10 = vpack.c.bf16 %v6156_v61, %v6144_v16  ;;  %v10503_v46 = vpack.c.bf16 %v5587_v47, %v5575_v57  ;;  %v10555_v44 = vpack.c.bf16 %v12449_v8, %v12447_v18  ;;  %v10505_v36 = vpack.c.bf16 %v12429_v49, %v12426_v33 }
 0x152   :  { %v6162_v41 = vand.u32 4294901760, %v6161_v35  ;;  %v5598_v61 = vsub.f32 %v12535_v23, %v5597_v1  ;;  %v5593_v3 = vand.u32 4294901760, %v5592_v29  ;;  %v6168_v54 = vand.u32 4294901760, %v6167_v48  ;;  %v80_v48 = vld [vmem:[#allocation7 + $0xb8] sm:$0xff] }
 0x153   :  { %10496 = vmatpush1.bf16.msra.mxu1 %v12474_v42  ;;  %v10507_v13 = vpack.c.bf16 %v12443_v32, %v12439_v21  ;;  %v10509_v16 = vpack.c.bf16 %v12459_v59, %v12457_v2  ;;  %v10511_v35 = vpack.c.bf16 %v12478_v9, %v12476_v0  ;;  %v13747_v47 = vand.u32 4294901760, %v12433_v55  ;;  %v181_v0 = vld [vmem:[#allocation7 + $0x3e0] sm:$0xff] }
 0x154   :  { %5472 = vmatprep.subr.mxu1 %v12493_v45  ;;  %6043 = vmatpush1.msra.mxu0 %v12511_v19  ;;  %v5599_v27 = vand.u32 4294901760, %v5598_v61  ;;  %v13749_v61 = vand.u32 4294901760, %v12447_v18  ;;  %v13754_v18 = vand.u32 4294901760, %v12429_v49  ;;  %v13758_v49 = vand.u32 4294901760, %v12459_v59 }
 0x155   :  { %10546 = vmatprep.subr.bf16.mxu0 %v10545_v62  ;;  %6104 = vmatmul.mubr.f32.vlgmr.msra.gmra.mrb[10].mxu0 %v11286_v12  ;;  %v10553_v62 = vpack.c.bf16 %v12437_v7, %v12433_v55  ;;  %v13752_v55 = vand.u32 4294901760, %v12467_v20 }
 0x156   :  { %10548 = vmatpush1.bf16.msra.mxu0 %v10547_v34  ;;  %6224 = vmatprep.mubr.f32.mxu0 %v13699_v37  ;;  %v10557_v34 = vpack.c.bf16 %v12467_v20, %v12465_v14 }
 0x157   :  { %5474 = vmatpush1.msra.mxu1 %v12509_v60  ;;  %10550 = vmatprep.subr.bf16.mxu0 %v10549_v52  ;;  %v10559_v52 = vpack.c.bf16 %v12501_v22, %v12499_v63 }
 0x158   :  { %10498 = vmatprep.subr.bf16.mxu1 %v10497_v31  ;;  %5535 = vmatmul.mubr.f32.vlgmr.msra.gmra.mrb[10].mxu1 %v11286_v12 }
 0x159   :  { %10500 = vmatpush1.bf16.msra.mxu1 %v10499_v28  ;;  %5655 = vmatprep.mubr.f32.mxu1 %v13699_v37 }
 0x15a   :  { %10502 = vmatprep.subr.bf16.mxu1 %v10501_v17  ;;  %10552 = vmatpush1.bf16.msra.mxu0 %v10551_v10  ;;  %v13748_v10 = vand.u32 4294901760, %v12437_v7  ;;  %v13753_v7 = vand.u32 4294901760, %v12426_v33  ;;  %v13757_v33 = vand.u32 4294901760, %v12457_v2  ;;  %v10527_v2 = vpack.c.bf16 %v5585_v25, %v5573_v11 }
 0x15b   :  { %6163 = vmatprep.subr.mxu0 %v6162_v41  ;;  %v114_v41 = vld [vmem:[#allocation7 + $0x1c8] sm:$0xff] }
 0x15c   :  { %v10569_v29 = vpack.c.bf16 %v13748_v10, %v13747_v47  ;;  %v115_v47 = vld [vmem:[#allocation7 + $0x1d0] sm:$0xff]  ;;  %v13760_v10 = vand.u32 4294901760, %v12501_v22 }
 0x15d   :  { %10504 = vmatpush1.bf16.msra.mxu1 %v10503_v46  ;;  %v82_v46 = vld [vmem:[#allocation7 + $0xc8] sm:$0xff]  ;;  %v7168_v22 = vand.u32 4294901760, %v115_v47 }
 0x15e   :  { %5594 = vmatprep.subr.mxu1 %v5593_v3  ;;  %6169 = vmatpush1.msra.mxu0 %v6168_v54  ;;  %v13750_v3 = vand.u32 4294901760, %v12449_v8  ;;  %v10521_v8 = vpack.c.bf16 %v13754_v18, %v13753_v7  ;;  %v147_v18 = vld [vmem:[#allocation7 + $0x2d0] sm:$0xff] }
 0x15f   :  { %10554 = vmatprep.subr.bf16.mxu0 %v10553_v62  ;;  %6226 = vmatmul.mubr.f32.vlgmr.msra.gmra.mrb[10].mxu0 %v11253_v43  ;;  %v116_v62 = vld [vmem:[#allocation7 + $0x1d8] sm:$0xff] }
 0x160   :  { %10556 = vmatpush1.bf16.msra.mxu0 %v10555_v44  ;;  %6316 = vmatprep.mubr.f32.mxu0 %v13699_v37  ;;  %v10571_v54 = vpack.c.bf16 %v13750_v3, %v13749_v61  ;;  %v79_v44 = vld [vmem:[#allocation7 + $0xb0] sm:$0xff]  ;;  %v7166_v20 = vand.u32 4294901760, %v116_v62  ;;  %v182_v3 = vld [vmem:[#allocation7 + $0x3e8] sm:$0xff] }
 0x161   :  { %5600 = vmatpush1.msra.mxu1 %v5599_v27  ;;  %10558 = vmatprep.subr.bf16.mxu0 %v10557_v34  ;;  %v113_v27 = vld [vmem:[#allocation7 + $0x1c0] sm:$0xff]  ;;  %v13751_v34 = vand.u32 4294901760, %v12465_v14  ;;  %v7162_v14 = vand.u32 4294901760, %v82_v46 }
 0x162   :  { %10506 = vmatprep.subr.bf16.mxu1 %v10505_v36  ;;  %5657 = vmatmul.mubr.f32.vlgmr.msra.gmra.mrb[10].mxu1 %v11253_v43 }
 0x163   :  { %10508 = vmatpush1.bf16.msra.mxu1 %v10507_v13  ;;  %5747 = vmatprep.mubr.f32.mxu1 %v13699_v37  ;;  %v10573_v36 = vpack.c.bf16 %v13752_v55, %v13751_v34  ;;  %v13755_v13 = vand.u32 4294901760, %v12439_v21  ;;  %v10525_v21 = vpack.c.bf16 %v13758_v49, %v13757_v33  ;;  %v184_v34 = vld [vmem:[#allocation7 + $0x3f8] sm:$0xff]  ;;  %v12714_v25 = vsub.f32 %v82_v46, %v7162_v14 }
 0x164   :  { %10510 = vmatprep.subr.bf16.mxu1 %v10509_v16  ;;  %10560 = vmatpush1.bf16.msra.mxu0 %v10559_v52  ;;  %v13756_v16 = vand.u32 4294901760, %v12443_v32  ;;  %v13759_v32 = vand.u32 4294901760, %v12499_v63  ;;  %v7174_v49 = vand.u32 4294901760, %v184_v34  ;;  %v6607_v46 = vand.u32 4294901760, %v181_v0 }
 0x165   :  { %6258 = vmatprep.subr.mxu0 %v12563_v15 }
 0x166   :  { %v10523_v52 = vpack.c.bf16 %v13756_v16, %v13755_v13  ;;  %v10575_v61 = vpack.c.bf16 %v13760_v10, %v13759_v32  ;;  %v149_v13 = vld [vmem:[#allocation7 + $0x2e0] sm:$0xff]  ;;  %v183_v16 = vld [vmem:[#allocation7 + $0x3f0] sm:$0xff]  ;;  %v12728_v10 = vsub.f32 %v115_v47, %v7168_v22 }
 0x167   :  { %10512 = vmatpush1.bf16.msra.mxu1 %v10511_v35  ;;  %v6593_v35 = vand.u32 4294901760, %v80_v48 }
 0x168   :  { %5689 = vmatprep.subr.mxu1 %v12591_v38  ;;  %6261 = vmatpush1.msra.mxu0 %v12547_v4  ;;  %v12746_v38 = vsub.f32 %v184_v34, %v7174_v49 }
 0x169   :  { %10562 = vmatprep.subr.bf16.mxu0 %v12431_v51  ;;  %6319 = vmatmul.mubr.f32.vlgmr.msra.gmra.mrb[10].mxu0 %v11264_v50  ;;  %v12706_v55 = vsub.f32 %v80_v48, %v6593_v35  ;;  %v12718_v48 = vsub.f32 %v116_v62, %v7166_v20  ;;  %v215_v62 = vld [vmem:[#allocation7 + $0x4f0] sm:$0x7] }
 0x16a   :  { %v2036_v31 = vpop.f32.mrb[2].mxu0  ;;  %10564 = vmatpush1.bf16.msra.mxu0 %v12445_v30  ;;  %6399 = vmatprep.mubr.f32.mxu0 %v13699_v37 }
 0x16b   :  { %5692 = vmatpush1.msra.mxu1 %v12535_v23  ;;  %10011 = vst [vmem:[#allocation8 + $0x30] sm:$0xff] %v2036_v31  ;;  %v2038_v28 = vpop.f32.mrb[3].mxu0  ;;  %10566 = vmatprep.subr.bf16.mxu0 %v12463_v56  ;;  %v6597_v31 = vand.u32 4294901760, %v114_v41  ;;  %v13661_v23 = vand.u32 4294901760, %v12718_v48 }
 0x16c   :  { %10514 = vmatprep.subr.bf16.mxu1 %v12424_v40  ;;  %5750 = vmatmul.mubr.f32.vlgmr.msra.gmra.mrb[10].mxu1 %v11264_v50  ;;  %10012 = vst [vmem:[#allocation8 + $0x38] sm:$0xff] %v2038_v28  ;;  %v6595_v28 = vand.u32 4294901760, %v79_v44 }
 0x16d   :  { %v1467_v17 = vpop.f32.mrb[2].mxu1  ;;  %10516 = vmatpush1.bf16.msra.mxu1 %v12441_v6  ;;  %5830 = vmatprep.mubr.f32.mxu1 %v13699_v37  ;;  %v12703_v59 = vpack.c.bf16 %v6597_v31, %v6593_v35  ;;  %v12712_v9 = vsub.f32 %v114_v41, %v6597_v31  ;;  %v6603_v41 = vand.u32 4294901760, %v147_v18  ;;  %v216_v31 = vld [vmem:[#allocation7 + $0x4f8] sm:$0x7] }
 0x16e   :  { %10009 = vst [vmem:[#allocation8 + $0x20] sm:$0xff] %v1467_v17  ;;  %v1469_v57 = vpop.f32.mrb[3].mxu1  ;;  %10518 = vmatprep.subr.bf16.mxu1 %v12451_v26  ;;  %10568 = vmatpush1.bf16.msra.mxu0 %v12490_v39  ;;  %v6599_v17 = vand.u32 4294901760, %v113_v27  ;;  %v12720_v35 = vsub.f32 %v79_v44, %v6595_v28  ;;  %v12749_v4 = vsel %vm231_vm0, %v216_v31, 0 }
 0x16f   :  { %10010 = vst [vmem:[#allocation8 + $0x28] sm:$0xff] %v1469_v57  ;;  %6342 = vmatprep.subr.mxu0 %v12507_v5  ;;  %v81_v57 = vld [vmem:[#allocation7 + $0xc0] sm:$0xff] }
 0x170   :  { %v7164_v63 = vand.u32 4294901760, %v81_v57  ;;  %v12710_v7 = vpack.c.bf16 %v6599_v17, %v6595_v28  ;;  %v12722_v32 = vsub.f32 %v113_v27, %v6599_v17  ;;  %v218_v28 = vld [vmem:[#allocation7 + $0x508] sm:$0x7]  ;;  %v217_v17 = vld [vmem:[#allocation7 + $0x500] sm:$0x7] }
 0x171   :  { %10520 = vmatpush1.bf16.msra.mxu1 %v12474_v42 }
 0x172   :  { %5773 = vmatprep.subr.mxu1 %v12493_v45  ;;  %6344 = vmatpush1.msra.mxu0 %v12511_v19 }
 0x173   :  { %10570 = vmatprep.subr.bf16.mxu0 %v10569_v29  ;;  %6403 = vmatmul.mubr.f32.vlgmr.msra.gmra.mrb[10].mxu0 %v11272_v58  ;;  %v148_v29 = vld [vmem:[#allocation7 + $0x2d8] sm:$0xff] }
 0x174   :  { %10572 = vmatpush1.bf16.msra.mxu0 %v10571_v54  ;;  %6503 = vmatprep.mubr.f32.mxu0 %v13699_v37  ;;  %v150_v54 = vld [vmem:[#allocation7 + $0x2e8] sm:$0xff]  ;;  %v6601_v11 = vand.u32 4294901760, %v148_v29 }
 0x175   :  { %5775 = vmatpush1.msra.mxu1 %v12509_v60  ;;  %10574 = vmatprep.subr.bf16.mxu0 %v10573_v36  ;;  %v12708_v36 = vpack.c.bf16 %v7166_v20, %v7162_v14  ;;  %v7170_v33 = vand.u32 4294901760, %v150_v54  ;;  %v12726_v14 = vsub.f32 %v81_v57, %v7164_v63 }
 0x176   :  { %10522 = vmatprep.subr.bf16.mxu1 %v10521_v8  ;;  %5834 = vmatmul.mubr.f32.vlgmr.msra.gmra.mrb[10].mxu1 %v11272_v58  ;;  %v6605_v8 = vand.u32 4294901760, %v182_v3  ;;  %v12736_v27 = vsub.f32 %v148_v29, %v6601_v11  ;;  %v299_v29 = vsel %vm231_vm0, %v215_v62, 0 }
 0x177   :  { %10524 = vmatpush1.bf16.msra.mxu1 %v10523_v52  ;;  %5934 = vmatprep.mubr.f32.mxu1 %v13699_v37  ;;  %v13761_v52 = vand.u32 4294901760, %v12563_v15  ;;  %v7172_v15 = vand.u32 4294901760, %v149_v13  ;;  %v12742_v57 = vpack.c.bf16 %v7174_v49, %v7170_v33  ;;  %v12744_v47 = vsub.f32 %v150_v54, %v7170_v33 }
 0x178   :  { %10526 = vmatprep.subr.bf16.mxu1 %v10525_v21  ;;  %10576 = vmatpush1.bf16.msra.mxu0 %v10575_v61  ;;  %v12724_v21 = vpack.c.bf16 %v7168_v22, %v7164_v63  ;;  %v7176_v61 = vand.u32 4294901760, %v183_v16  ;;  %v12734_v44 = vpack.c.bf16 %v6605_v8, %v6601_v11  ;;  %v12738_v20 = vsub.f32 %v182_v3, %v6605_v8 }
 0x179   :  { %6444 = vmatprep.subr.mxu0 %v13761_v52  ;;  %v13652_v63 = vand.u32 4294901760, %v12706_v55  ;;  %v12770_v22 = vsub.f32 %v149_v13, %v7172_v15  ;;  %v13662_v54 = vand.u32 4294901760, %v12714_v25  ;;  %v12779_v34 = vand.u32 4294901760, %v299_v29 }
 0x17a   :  { %v12763_v3 = vpack.c.bf16 %v7176_v61, %v7172_v15  ;;  %v13649_v8 = vand.u32 4294901760, %v12722_v32  ;;  %v13656_v49 = vand.u32 4294901760, %v12736_v27  ;;  %v13655_v15 = vand.u32 4294901760, %v12738_v20 }
 0x17b   :  { %10528 = vmatpush1.bf16.msra.mxu1 %v10527_v2  ;;  %v308_v2 = vsel %vm231_vm0, %v218_v28, 0  ;;  %v12793_v13 = vsub.f32 %v299_v29, %v12779_v34  ;;  %v7251_v52 = vsub.f32 %v12714_v25, %v13662_v54  ;;  %v13657_v62 = vand.u32 4294901760, %v12770_v22 }
 0x17c   :  { %5875 = vmatprep.subr.mxu1 %v5591_v53  ;;  %6448 = vmatpush1.msra.mxu0 %v6166_v24  ;;  %v12753_v53 = vpack.c.bf16 %v6607_v46, %v6603_v41  ;;  %v12755_v24 = vsub.f32 %v147_v18, %v6603_v41  ;;  %v13658_v18 = vand.u32 4294901760, %v12728_v10 }
 0x17d   :  { %10578 = vmatprep.subr.bf16.mxu0 %v12431_v51  ;;  %6505 = vmatmul.mubr.f32.vlgmr.msra.gmra.mrb[10].mxu0 %v11253_v43  ;;  %v12757_v51 = vsub.f32 %v181_v0, %v6607_v46  ;;  %v12785_v0 = vand.u32 4294901760, %v308_v2 }
 0x17e   :  { %10580 = vmatpush1.bf16.msra.mxu0 %v12445_v30  ;;  %6585 = vmatprep.mubr.f32.mxu0 %v13699_v37  ;;  %v305_v30 = vsel %vm231_vm0, %v217_v17, 0  ;;  %v7269_v31 = vsub.f32 %v12728_v10, %v13658_v18 }
 0x17f   :  { %5879 = vmatpush1.msra.mxu1 %v5597_v1  ;;  %10582 = vmatprep.subr.bf16.mxu0 %v12463_v56  ;;  %v13660_v56 = vand.u32 4294901760, %v12726_v14  ;;  %v12777_v1 = vsub.f32 %v183_v16, %v7176_v61  ;;  %v12787_v11 = vand.u32 4294901760, %v305_v30  ;;  %v12798_v16 = vsub.f32 %v12706_v55, %v13652_v63 }
 0x180   :  { %10530 = vmatprep.subr.bf16.mxu1 %v12424_v40  ;;  %5936 = vmatmul.mubr.f32.vlgmr.msra.gmra.mrb[10].mxu1 %v11253_v43  ;;  %v13651_v40 = vand.u32 4294901760, %v12712_v9  ;;  %v6700_v61 = vsub.f32 %v12722_v32, %v13649_v8  ;;  %v12845_v29 = vsub.f32 %v308_v2, %v12785_v0  ;;  %v7270_v63 = vand.u32 4294901760, %v7269_v31 }
 0x181   :  { %10532 = vmatpush1.bf16.msra.mxu1 %v12441_v6  ;;  %6016 = vmatprep.mubr.f32.mxu1 %v13699_v37  ;;  %v13650_v6 = vand.u32 4294901760, %v12720_v35  ;;  %v7257_v33 = vsub.f32 %v12726_v14, %v13660_v56  ;;  %v12814_v41 = vsub.f32 %v305_v30, %v12787_v11  ;;  %v13659_v28 = vand.u32 4294901760, %v12777_v1 }
 0x182   :  { %10534 = vmatprep.subr.bf16.mxu1 %v12451_v26  ;;  %10584 = vmatpush1.bf16.msra.mxu0 %v12490_v39  ;;  %v13654_v26 = vand.u32 4294901760, %v12744_v47  ;;  %v13653_v39 = vand.u32 4294901760, %v12746_v38  ;;  %v6694_v46 = vsub.f32 %v12712_v9, %v13651_v40  ;;  %v7252_v30 = vand.u32 4294901760, %v7251_v52 }
 0x183   :  { %6528 = vmatprep.subr.mxu0 %v12507_v5  ;;  %v7263_v5 = vsub.f32 %v12718_v48, %v13661_v23  ;;  %v6706_v40 = vsub.f32 %v12736_v27, %v13656_v49  ;;  %v6718_v2 = vsub.f32 %v12738_v20, %v13655_v15  ;;  %v6683_v52 = vand.u32 4294901760, %v12798_v16 }
 0x184   :  { %v7287_v17 = vsub.f32 %v12746_v38, %v13653_v39  ;;  %v6711_v39 = vand.u32 4294901760, %v12755_v24  ;;  %v6695_v31 = vand.u32 4294901760, %v6694_v46 }
 0x185   :  { %10536 = vmatpush1.bf16.msra.mxu1 %v12474_v42  ;;  %v6688_v42 = vsub.f32 %v12720_v35, %v13650_v6  ;;  %v7264_v8 = vand.u32 4294901760, %v7263_v5  ;;  %v7258_v6 = vand.u32 4294901760, %v7257_v33  ;;  %v7293_v5 = vsub.f32 %v12777_v1, %v13659_v28 }
 0x186   :  { %5959 = vmatprep.subr.mxu1 %v12493_v45  ;;  %6530 = vmatpush1.msra.mxu0 %v12511_v19  ;;  %v12836_v45 = vand.u32 4294901760, %v12749_v4  ;;  %v7275_v19 = vsub.f32 %v12744_v47, %v13654_v26  ;;  %v6723_v26 = vand.u32 4294901760, %v12757_v51  ;;  %v7288_v49 = vand.u32 4294901760, %v7287_v17 }
 0x187   :  { %6587 = vmatmul.mubr.f32.vlgmr.msra.gmra.mrb[10].mxu0 %v11253_v43  ;;  %10634 = vmatprep.subr.bf16.mxu0 %v12708_v36  ;;  %v6689_v18 = vand.u32 4294901760, %v6688_v42  ;;  %v6701_v28 = vand.u32 4294901760, %v6700_v61  ;;  %v6707_v56 = vand.u32 4294901760, %v6706_v40  ;;  %v6719_v23 = vand.u32 4294901760, %v6718_v2 }
 0x188   :  { %10636 = vmatpush1.bf16.msra.mxu0 %v12724_v21  ;;  %7236 = vmatprep.mubr.f32.mxu0 %v13699_v37  ;;  %v12870_v33 = vsub.f32 %v12749_v4, %v12836_v45  ;;  %v7276_v15 = vand.u32 4294901760, %v7275_v19  ;;  %v10643_v4 = vpack.c.bf16 %v7270_v63, %v7258_v6  ;;  %v6712_v46 = vsub.f32 %v12755_v24, %v6711_v39 }
 0x189   :  { %5961 = vmatpush1.msra.mxu1 %v12509_v60  ;;  %10638 = vmatprep.subr.bf16.mxu0 %v12742_v57  ;;  %v7281_v60 = vsub.f32 %v12770_v22, %v13657_v62  ;;  %v10641_v62 = vpack.c.bf16 %v7264_v8, %v7252_v30  ;;  %v6724_v19 = vsub.f32 %v12757_v51, %v6723_v26  ;;  %v7294_v54 = vand.u32 4294901760, %v7293_v5 }
 0x18a   :  { %6018 = vmatmul.mubr.f32.vlgmr.msra.gmra.mrb[10].mxu1 %v11253_v43  ;;  %10586 = vmatprep.subr.bf16.mxu1 %v12703_v59  ;;  %v6729_v16 = vand.u32 4294901760, %v12870_v33  ;;  %v7304_v8 = vand.u32 4294901760, %v12814_v41  ;;  %v10645_v40 = vpack.c.bf16 %v7288_v49, %v7276_v15  ;;  %v13762_v63 = vand.u32 4294901760, %v12845_v29 }
 0x18b   :  { %10588 = vmatpush1.bf16.msra.mxu1 %v12710_v7  ;;  %6667 = vmatprep.mubr.f32.mxu1 %v13699_v37  ;;  %v7282_v17 = vand.u32 4294901760, %v7281_v60  ;;  %v10593_v42 = vpack.c.bf16 %v6695_v31, %v6683_v52  ;;  %v10595_v61 = vpack.c.bf16 %v6701_v28, %v6689_v18  ;;  %v10597_v30 = vpack.c.bf16 %v6719_v23, %v6707_v56 }
 0x18c   :  { %10590 = vmatprep.subr.bf16.mxu1 %v12734_v44  ;;  %10640 = vmatpush1.bf16.msra.mxu0 %v12763_v3  ;;  %v7299_v6 = vsub.f32 %v12845_v29, %v13762_v63  ;;  %v6713_v2 = vand.u32 4294901760, %v6712_v46  ;;  %v6725_v60 = vand.u32 4294901760, %v6724_v19  ;;  %v6735_v5 = vand.u32 4294901760, %v12793_v13 }
 0x18d   :  { %7179 = vmatprep.subr.mxu0 %v12785_v0  ;;  %v10647_v49 = vpack.c.bf16 %v7294_v54, %v7282_v17  ;;  %v6730_v15 = vsub.f32 %v12870_v33, %v6729_v16  ;;  %v7305_v63 = vsub.f32 %v12814_v41, %v7304_v8  ;;  %v10649_v28 = vpack.c.bf16 %v12718_v48, %v12714_v25 }
 0x18e   :  { %v7300_v23 = vand.u32 4294901760, %v7299_v6  ;;  %v10599_v56 = vpack.c.bf16 %v6725_v60, %v6713_v2  ;;  %v6736_v54 = vsub.f32 %v12793_v13, %v6735_v5  ;;  %v10651_v52 = vpack.c.bf16 %v12728_v10, %v12726_v14 }
 0x18f   :  { %10592 = vmatpush1.bf16.msra.mxu1 %v12753_v53  ;;  %v6731_v18 = vand.u32 4294901760, %v6730_v15  ;;  %v10601_v46 = vpack.c.bf16 %v12712_v9, %v12706_v55  ;;  %v10603_v19 = vpack.c.bf16 %v12722_v32, %v12720_v35  ;;  %v10605_v17 = vpack.c.bf16 %v12738_v20, %v12736_v27 }
 0x190   :  { %6610 = vmatprep.subr.mxu1 %v12836_v45  ;;  %7181 = vmatpush1.msra.mxu0 %v12787_v11  ;;  %v6737_v31 = vand.u32 4294901760, %v6736_v54  ;;  %v10607_v6 = vpack.c.bf16 %v12757_v51, %v12755_v24  ;;  %v13763_v60 = vand.u32 4294901760, %v12714_v25  ;;  %v13765_v54 = vand.u32 4294901760, %v12726_v14  ;;  %v185_v24 = vld [vmem:[#allocation7 + $0x400] sm:$0xff] }
 0x191   :  { %10642 = vmatprep.subr.bf16.mxu0 %v10641_v62  ;;  %7242 = vmatmul.mubr.f32.vlgmr.msra.gmra.mrb[12].mxu0 %v11286_v12  ;;  %v7306_v62 = vand.u32 4294901760, %v7305_v63  ;;  %v84_v63 = vld [vmem:[#allocation7 + $0xd8] sm:$0xff]  ;;  %v13768_v25 = vand.u32 4294901760, %v12746_v38  ;;  %v13770_v14 = vand.u32 4294901760, %v12712_v9  ;;  %v13774_v9 = vand.u32 4294901760, %v12738_v20 }
 0x192   :  { %10644 = vmatpush1.bf16.msra.mxu0 %v10643_v4  ;;  %7362 = vmatprep.mubr.f32.mxu0 %v13699_v37  ;;  %v10653_v4 = vpack.c.bf16 %v12746_v38, %v12744_v47 }
 0x193   :  { %6612 = vmatpush1.msra.mxu1 %v12779_v34  ;;  %10646 = vmatprep.subr.bf16.mxu0 %v10645_v40  ;;  %v10655_v40 = vpack.c.bf16 %v12777_v1, %v12770_v22 }
 0x194   :  { %10594 = vmatprep.subr.bf16.mxu1 %v10593_v42  ;;  %6673 = vmatmul.mubr.f32.vlgmr.msra.gmra.mrb[12].mxu1 %v11286_v12 }
 0x195   :  { %10596 = vmatpush1.bf16.msra.mxu1 %v10595_v61  ;;  %6793 = vmatprep.mubr.f32.mxu1 %v13699_v37 }
 0x196   :  { %10598 = vmatprep.subr.bf16.mxu1 %v10597_v30  ;;  %10648 = vmatpush1.bf16.msra.mxu0 %v10647_v49  ;;  %v13764_v49 = vand.u32 4294901760, %v12718_v48  ;;  %v13769_v48 = vand.u32 4294901760, %v12706_v55  ;;  %v13773_v55 = vand.u32 4294901760, %v12736_v27  ;;  %v10623_v27 = vpack.c.bf16 %v6723_v26, %v6711_v39 }
 0x197   :  { %7301 = vmatprep.subr.mxu0 %v7300_v23  ;;  %v118_v23 = vld [vmem:[#allocation7 + $0x1e8] sm:$0xff] }
 0x198   :  { %v10665_v15 = vpack.c.bf16 %v13764_v49, %v13763_v60  ;;  %v119_v60 = vld [vmem:[#allocation7 + $0x1f0] sm:$0xff]  ;;  %v13776_v49 = vand.u32 4294901760, %v12777_v1 }
 0x199   :  { %10600 = vmatpush1.bf16.msra.mxu1 %v10599_v56  ;;  %v86_v56 = vld [vmem:[#allocation7 + $0xe8] sm:$0xff]  ;;  %v8306_v1 = vand.u32 4294901760, %v119_v60 }
 0x19a   :  { %6732 = vmatprep.subr.mxu1 %v6731_v18  ;;  %7307 = vmatpush1.msra.mxu0 %v7306_v62  ;;  %v13766_v18 = vand.u32 4294901760, %v12728_v10  ;;  %v10617_v10 = vpack.c.bf16 %v13770_v14, %v13769_v48  ;;  %v151_v14 = vld [vmem:[#allocation7 + $0x2f0] sm:$0xff] }
 0x19b   :  { %10650 = vmatprep.subr.bf16.mxu0 %v10649_v28  ;;  %7364 = vmatmul.mubr.f32.vlgmr.msra.gmra.mrb[12].mxu0 %v11253_v43  ;;  %v120_v28 = vld [vmem:[#allocation7 + $0x1f8] sm:$0xff] }
 0x19c   :  { %10652 = vmatpush1.bf16.msra.mxu0 %v10651_v52  ;;  %7454 = vmatprep.mubr.f32.mxu0 %v13699_v37  ;;  %v10667_v62 = vpack.c.bf16 %v13766_v18, %v13765_v54  ;;  %v83_v52 = vld [vmem:[#allocation7 + $0xd0] sm:$0xff]  ;;  %v8304_v38 = vand.u32 4294901760, %v120_v28  ;;  %v186_v18 = vld [vmem:[#allocation7 + $0x408] sm:$0xff] }
 0x19d   :  { %6738 = vmatpush1.msra.mxu1 %v6737_v31  ;;  %10654 = vmatprep.subr.bf16.mxu0 %v10653_v4  ;;  %v117_v31 = vld [vmem:[#allocation7 + $0x1e0] sm:$0xff]  ;;  %v13767_v4 = vand.u32 4294901760, %v12744_v47  ;;  %v8300_v47 = vand.u32 4294901760, %v86_v56 }
 0x19e   :  { %10602 = vmatprep.subr.bf16.mxu1 %v10601_v46  ;;  %6795 = vmatmul.mubr.f32.vlgmr.msra.gmra.mrb[12].mxu1 %v11253_v43 }
 0x19f   :  { %10604 = vmatpush1.bf16.msra.mxu1 %v10603_v19  ;;  %6885 = vmatprep.mubr.f32.mxu1 %v13699_v37  ;;  %v10669_v46 = vpack.c.bf16 %v13768_v25, %v13767_v4  ;;  %v13771_v19 = vand.u32 4294901760, %v12720_v35  ;;  %v10621_v35 = vpack.c.bf16 %v13774_v9, %v13773_v55  ;;  %v188_v4 = vld [vmem:[#allocation7 + $0x418] sm:$0xff]  ;;  %v12993_v26 = vsub.f32 %v86_v56, %v8300_v47 }
 0x1a0   :  { %10606 = vmatprep.subr.bf16.mxu1 %v10605_v17  ;;  %10656 = vmatpush1.bf16.msra.mxu0 %v10655_v40  ;;  %v13772_v17 = vand.u32 4294901760, %v12722_v32  ;;  %v13775_v32 = vand.u32 4294901760, %v12770_v22  ;;  %v8312_v9 = vand.u32 4294901760, %v188_v4  ;;  %v7745_v56 = vand.u32 4294901760, %v185_v24 }
 0x1a1   :  { %7396 = vmatprep.subr.mxu0 %v12845_v29 }
 0x1a2   :  { %v10619_v40 = vpack.c.bf16 %v13772_v17, %v13771_v19  ;;  %v10671_v54 = vpack.c.bf16 %v13776_v49, %v13775_v32  ;;  %v153_v19 = vld [vmem:[#allocation7 + $0x300] sm:$0xff]  ;;  %v187_v17 = vld [vmem:[#allocation7 + $0x410] sm:$0xff]  ;;  %v13007_v49 = vsub.f32 %v119_v60, %v8306_v1 }
 0x1a3   :  { %10608 = vmatpush1.bf16.msra.mxu1 %v10607_v6  ;;  %v7731_v6 = vand.u32 4294901760, %v84_v63 }
 0x1a4   :  { %6827 = vmatprep.subr.mxu1 %v12870_v33  ;;  %7399 = vmatpush1.msra.mxu0 %v12814_v41  ;;  %v13025_v33 = vsub.f32 %v188_v4, %v8312_v9 }
 0x1a5   :  { %10658 = vmatprep.subr.bf16.mxu0 %v12708_v36  ;;  %7457 = vmatmul.mubr.f32.vlgmr.msra.gmra.mrb[12].mxu0 %v11264_v50  ;;  %v12985_v25 = vsub.f32 %v84_v63, %v7731_v6  ;;  %v12997_v63 = vsub.f32 %v120_v28, %v8304_v38  ;;  %v219_v28 = vld [vmem:[#allocation7 + $0x510] sm:$0x7] }
 0x1a6   :  { %v3174_v42 = vpop.f32.mrb[4].mxu0  ;;  %10660 = vmatpush1.bf16.msra.mxu0 %v12724_v21  ;;  %7537 = vmatprep.mubr.f32.mxu0 %v13699_v37 }
 0x1a7   :  { %6830 = vmatpush1.msra.mxu1 %v12793_v13  ;;  %10015 = vst [vmem:[#allocation8 + $0x50] sm:$0xff] %v3174_v42  ;;  %v3176_v61 = vpop.f32.mrb[5].mxu0  ;;  %10662 = vmatprep.subr.bf16.mxu0 %v12742_v57  ;;  %v7735_v42 = vand.u32 4294901760, %v118_v23  ;;  %v13675_v13 = vand.u32 4294901760, %v12997_v63 }
 0x1a8   :  { %10610 = vmatprep.subr.bf16.mxu1 %v12703_v59  ;;  %6888 = vmatmul.mubr.f32.vlgmr.msra.gmra.mrb[12].mxu1 %v11264_v50  ;;  %10016 = vst [vmem:[#allocation8 + $0x58] sm:$0xff] %v3176_v61  ;;  %v7733_v61 = vand.u32 4294901760, %v83_v52 }
 0x1a9   :  { %v2605_v30 = vpop.f32.mrb[4].mxu1  ;;  %10612 = vmatpush1.bf16.msra.mxu1 %v12710_v7  ;;  %6968 = vmatprep.mubr.f32.mxu1 %v13699_v37  ;;  %v12982_v20 = vpack.c.bf16 %v7735_v42, %v7731_v6  ;;  %v12991_v51 = vsub.f32 %v118_v23, %v7735_v42  ;;  %v7741_v23 = vand.u32 4294901760, %v151_v14  ;;  %v220_v42 = vld [vmem:[#allocation7 + $0x518] sm:$0x7] }
 0x1aa   :  { %10013 = vst [vmem:[#allocation8 + $0x40] sm:$0xff] %v2605_v30  ;;  %v2607_v2 = vpop.f32.mrb[5].mxu1  ;;  %10614 = vmatprep.subr.bf16.mxu1 %v12734_v44  ;;  %10664 = vmatpush1.bf16.msra.mxu0 %v12763_v3  ;;  %v7737_v30 = vand.u32 4294901760, %v117_v31  ;;  %v12999_v6 = vsub.f32 %v83_v52, %v7733_v61  ;;  %v13028_v41 = vsel %vm231_vm0, %v220_v42, 0 }
 0x1ab   :  { %10014 = vst [vmem:[#allocation8 + $0x48] sm:$0xff] %v2607_v2  ;;  %7480 = vmatprep.subr.mxu0 %v12785_v0  ;;  %v85_v2 = vld [vmem:[#allocation7 + $0xe0] sm:$0xff] }
 0x1ac   :  { %v8302_v22 = vand.u32 4294901760, %v85_v2  ;;  %v12989_v48 = vpack.c.bf16 %v7737_v30, %v7733_v61  ;;  %v13001_v32 = vsub.f32 %v117_v31, %v7737_v30  ;;  %v222_v61 = vld [vmem:[#allocation7 + $0x528] sm:$0x7]  ;;  %v221_v30 = vld [vmem:[#allocation7 + $0x520] sm:$0x7] }
 0x1ad   :  { %10616 = vmatpush1.bf16.msra.mxu1 %v12753_v53 }
 0x1ae   :  { %6911 = vmatprep.subr.mxu1 %v12836_v45  ;;  %7482 = vmatpush1.msra.mxu0 %v12787_v11 }
 0x1af   :  { %10666 = vmatprep.subr.bf16.mxu0 %v10665_v15  ;;  %7541 = vmatmul.mubr.f32.vlgmr.msra.gmra.mrb[12].mxu0 %v11272_v58  ;;  %v152_v15 = vld [vmem:[#allocation7 + $0x2f8] sm:$0xff] }
 0x1b0   :  { %10668 = vmatpush1.bf16.msra.mxu0 %v10667_v62  ;;  %7641 = vmatprep.mubr.f32.mxu0 %v13699_v37  ;;  %v154_v62 = vld [vmem:[#allocation7 + $0x308] sm:$0xff]  ;;  %v7739_v39 = vand.u32 4294901760, %v152_v15 }
 0x1b1   :  { %6913 = vmatpush1.msra.mxu1 %v12779_v34  ;;  %10670 = vmatprep.subr.bf16.mxu0 %v10669_v46  ;;  %v12987_v46 = vpack.c.bf16 %v8304_v38, %v8300_v47  ;;  %v8308_v55 = vand.u32 4294901760, %v154_v62  ;;  %v13005_v47 = vsub.f32 %v85_v2, %v8302_v22 }
 0x1b2   :  { %10618 = vmatprep.subr.bf16.mxu1 %v10617_v10  ;;  %6972 = vmatmul.mubr.f32.vlgmr.msra.gmra.mrb[12].mxu1 %v11272_v58  ;;  %v7743_v10 = vand.u32 4294901760, %v186_v18  ;;  %v13015_v31 = vsub.f32 %v152_v15, %v7739_v39  ;;  %v311_v15 = vsel %vm231_vm0, %v219_v28, 0 }
 0x1b3   :  { %10620 = vmatpush1.bf16.msra.mxu1 %v10619_v40  ;;  %7072 = vmatprep.mubr.f32.mxu1 %v13699_v37  ;;  %v13777_v40 = vand.u32 4294901760, %v12845_v29  ;;  %v8310_v29 = vand.u32 4294901760, %v153_v19  ;;  %v13021_v2 = vpack.c.bf16 %v8312_v9, %v8308_v55  ;;  %v13023_v60 = vsub.f32 %v154_v62, %v8308_v55 }
 0x1b4   :  { %10622 = vmatprep.subr.bf16.mxu1 %v10621_v35  ;;  %10672 = vmatpush1.bf16.msra.mxu0 %v10671_v54  ;;  %v13003_v35 = vpack.c.bf16 %v8306_v1, %v8302_v22  ;;  %v8314_v54 = vand.u32 4294901760, %v187_v17  ;;  %v13013_v52 = vpack.c.bf16 %v7743_v10, %v7739_v39  ;;  %v13017_v38 = vsub.f32 %v186_v18, %v7743_v10 }
 0x1b5   :  { %7582 = vmatprep.subr.mxu0 %v13777_v40  ;;  %v13666_v22 = vand.u32 4294901760, %v12985_v25  ;;  %v13049_v1 = vsub.f32 %v153_v19, %v8310_v29  ;;  %v13676_v62 = vand.u32 4294901760, %v12993_v26  ;;  %v13058_v4 = vand.u32 4294901760, %v311_v15 }
 0x1b6   :  { %v13042_v18 = vpack.c.bf16 %v8314_v54, %v8310_v29  ;;  %v13663_v10 = vand.u32 4294901760, %v13001_v32  ;;  %v13670_v9 = vand.u32 4294901760, %v13015_v31  ;;  %v13669_v29 = vand.u32 4294901760, %v13017_v38 }
 0x1b7   :  { %10624 = vmatpush1.bf16.msra.mxu1 %v10623_v27  ;;  %v320_v27 = vsel %vm231_vm0, %v222_v61, 0  ;;  %v13072_v19 = vsub.f32 %v311_v15, %v13058_v4  ;;  %v8389_v40 = vsub.f32 %v12993_v26, %v13676_v62  ;;  %v13671_v28 = vand.u32 4294901760, %v13049_v1 }
 0x1b8   :  { %7013 = vmatprep.subr.mxu1 %v6729_v16  ;;  %7586 = vmatpush1.msra.mxu0 %v7304_v8  ;;  %v13032_v16 = vpack.c.bf16 %v7745_v56, %v7741_v23  ;;  %v13034_v8 = vsub.f32 %v151_v14, %v7741_v23  ;;  %v13672_v14 = vand.u32 4294901760, %v13007_v49 }
 0x1b9   :  { %10674 = vmatprep.subr.bf16.mxu0 %v12708_v36  ;;  %7643 = vmatmul.mubr.f32.vlgmr.msra.gmra.mrb[12].mxu0 %v11253_v43  ;;  %v13036_v36 = vsub.f32 %v185_v24, %v7745_v56  ;;  %v13064_v24 = vand.u32 4294901760, %v320_v27 }
 0x1ba   :  { %10676 = vmatpush1.bf16.msra.mxu0 %v12724_v21  ;;  %7723 = vmatprep.mubr.f32.mxu0 %v13699_v37  ;;  %v317_v21 = vsel %vm231_vm0, %v221_v30, 0  ;;  %v8407_v42 = vsub.f32 %v13007_v49, %v13672_v14 }
 0x1bb   :  { %7017 = vmatpush1.msra.mxu1 %v6735_v5  ;;  %10678 = vmatprep.subr.bf16.mxu0 %v12742_v57  ;;  %v13674_v57 = vand.u32 4294901760, %v13005_v47  ;;  %v13056_v5 = vsub.f32 %v187_v17, %v8314_v54  ;;  %v13066_v39 = vand.u32 4294901760, %v317_v21  ;;  %v13077_v17 = vsub.f32 %v12985_v25, %v13666_v22 }
 0x1bc   :  { %10626 = vmatprep.subr.bf16.mxu1 %v12703_v59  ;;  %7074 = vmatmul.mubr.f32.vlgmr.msra.gmra.mrb[12].mxu1 %v11253_v43  ;;  %v13665_v59 = vand.u32 4294901760, %v12991_v51  ;;  %v7838_v54 = vsub.f32 %v13001_v32, %v13663_v10  ;;  %v13124_v15 = vsub.f32 %v320_v27, %v13064_v24  ;;  %v8408_v22 = vand.u32 4294901760, %v8407_v42 }
 0x1bd   :  { %10628 = vmatpush1.bf16.msra.mxu1 %v12710_v7  ;;  %7154 = vmatprep.mubr.f32.mxu1 %v13699_v37  ;;  %v13664_v7 = vand.u32 4294901760, %v12999_v6  ;;  %v8395_v55 = vsub.f32 %v13005_v47, %v13674_v57  ;;  %v13093_v23 = vsub.f32 %v317_v21, %v13066_v39  ;;  %v13673_v61 = vand.u32 4294901760, %v13056_v5 }
 0x1be   :  { %10630 = vmatprep.subr.bf16.mxu1 %v12734_v44  ;;  %10680 = vmatpush1.bf16.msra.mxu0 %v12763_v3  ;;  %v13668_v44 = vand.u32 4294901760, %v13023_v60  ;;  %v13667_v3 = vand.u32 4294901760, %v13025_v33  ;;  %v7832_v56 = vsub.f32 %v12991_v51, %v13665_v59  ;;  %v8390_v21 = vand.u32 4294901760, %v8389_v40 }
 0x1bf   :  { %7666 = vmatprep.subr.mxu0 %v12785_v0  ;;  %v8401_v0 = vsub.f32 %v12997_v63, %v13675_v13  ;;  %v7844_v59 = vsub.f32 %v13015_v31, %v13670_v9  ;;  %v7856_v27 = vsub.f32 %v13017_v38, %v13669_v29  ;;  %v7821_v40 = vand.u32 4294901760, %v13077_v17 }
 0x1c0   :  { %v8425_v30 = vsub.f32 %v13025_v33, %v13667_v3  ;;  %v7849_v3 = vand.u32 4294901760, %v13034_v8  ;;  %v7833_v42 = vand.u32 4294901760, %v7832_v56 }
 0x1c1   :  { %10632 = vmatpush1.bf16.msra.mxu1 %v12753_v53  ;;  %v7826_v53 = vsub.f32 %v12999_v6, %v13664_v7  ;;  %v8402_v10 = vand.u32 4294901760, %v8401_v0  ;;  %v8396_v7 = vand.u32 4294901760, %v8395_v55  ;;  %v8431_v0 = vsub.f32 %v13056_v5, %v13673_v61 }
 0x1c2   :  { %7097 = vmatprep.subr.mxu1 %v12836_v45  ;;  %7668 = vmatpush1.msra.mxu0 %v12787_v11  ;;  %v13115_v45 = vand.u32 4294901760, %v13028_v41  ;;  %v8413_v11 = vsub.f32 %v13023_v60, %v13668_v44  ;;  %v7861_v44 = vand.u32 4294901760, %v13036_v36  ;;  %v8426_v9 = vand.u32 4294901760, %v8425_v30 }
 0x1c3   :  { %7725 = vmatmul.mubr.f32.vlgmr.msra.gmra.mrb[12].mxu0 %v11253_v43  ;;  %10730 = vmatprep.subr.bf16.mxu0 %v12987_v46  ;;  %v7827_v14 = vand.u32 4294901760, %v7826_v53  ;;  %v7839_v61 = vand.u32 4294901760, %v7838_v54  ;;  %v7845_v57 = vand.u32 4294901760, %v7844_v59  ;;  %v7857_v13 = vand.u32 4294901760, %v7856_v27 }
 0x1c4   :  { %10732 = vmatpush1.bf16.msra.mxu0 %v13003_v35  ;;  %8374 = vmatprep.mubr.f32.mxu0 %v13699_v37  ;;  %v13149_v55 = vsub.f32 %v13028_v41, %v13115_v45  ;;  %v8414_v29 = vand.u32 4294901760, %v8413_v11  ;;  %v10739_v41 = vpack.c.bf16 %v8408_v22, %v8396_v7  ;;  %v7850_v56 = vsub.f32 %v13034_v8, %v7849_v3 }
 0x1c5   :  { %7099 = vmatpush1.msra.mxu1 %v12779_v34  ;;  %10734 = vmatprep.subr.bf16.mxu0 %v13021_v2  ;;  %v8419_v34 = vsub.f32 %v13049_v1, %v13671_v28  ;;  %v10737_v28 = vpack.c.bf16 %v8402_v10, %v8390_v21  ;;  %v7862_v11 = vsub.f32 %v13036_v36, %v7861_v44  ;;  %v8432_v62 = vand.u32 4294901760, %v8431_v0 }
 0x1c6   :  { %7156 = vmatmul.mubr.f32.vlgmr.msra.gmra.mrb[12].mxu1 %v11253_v43  ;;  %10682 = vmatprep.subr.bf16.mxu1 %v12982_v20  ;;  %v7867_v17 = vand.u32 4294901760, %v13149_v55  ;;  %v8442_v10 = vand.u32 4294901760, %v13093_v23  ;;  %v10741_v59 = vpack.c.bf16 %v8426_v9, %v8414_v29  ;;  %v13778_v22 = vand.u32 4294901760, %v13124_v15 }
 0x1c7   :  { %10684 = vmatpush1.bf16.msra.mxu1 %v12989_v48  ;;  %7805 = vmatprep.mubr.f32.mxu1 %v13699_v37  ;;  %v8420_v30 = vand.u32 4294901760, %v8419_v34  ;;  %v10689_v53 = vpack.c.bf16 %v7833_v42, %v7821_v40  ;;  %v10691_v54 = vpack.c.bf16 %v7839_v61, %v7827_v14  ;;  %v10693_v21 = vpack.c.bf16 %v7857_v13, %v7845_v57 }
 0x1c8   :  { %10686 = vmatprep.subr.bf16.mxu1 %v13013_v52  ;;  %10736 = vmatpush1.bf16.msra.mxu0 %v13042_v18  ;;  %v8437_v7 = vsub.f32 %v13124_v15, %v13778_v22  ;;  %v7851_v27 = vand.u32 4294901760, %v7850_v56  ;;  %v7863_v34 = vand.u32 4294901760, %v7862_v11  ;;  %v7873_v0 = vand.u32 4294901760, %v13072_v19 }
 0x1c9   :  { %8317 = vmatprep.subr.mxu0 %v13064_v24  ;;  %v10743_v9 = vpack.c.bf16 %v8432_v62, %v8420_v30  ;;  %v7868_v29 = vsub.f32 %v13149_v55, %v7867_v17  ;;  %v8443_v22 = vsub.f32 %v13093_v23, %v8442_v10  ;;  %v10745_v61 = vpack.c.bf16 %v12997_v63, %v12993_v26 }
 0x1ca   :  { %v8438_v13 = vand.u32 4294901760, %v8437_v7  ;;  %v10695_v57 = vpack.c.bf16 %v7863_v34, %v7851_v27  ;;  %v7874_v62 = vsub.f32 %v13072_v19, %v7873_v0  ;;  %v10747_v40 = vpack.c.bf16 %v13007_v49, %v13005_v47 }
 0x1cb   :  { %10688 = vmatpush1.bf16.msra.mxu1 %v13032_v16  ;;  %v7869_v14 = vand.u32 4294901760, %v7868_v29  ;;  %v10697_v56 = vpack.c.bf16 %v12991_v51, %v12985_v25  ;;  %v10699_v11 = vpack.c.bf16 %v13001_v32, %v12999_v6  ;;  %v10701_v30 = vpack.c.bf16 %v13017_v38, %v13015_v31 }
 0x1cc   :  { %7748 = vmatprep.subr.mxu1 %v13115_v45  ;;  %8319 = vmatpush1.msra.mxu0 %v13066_v39  ;;  %v7875_v42 = vand.u32 4294901760, %v7874_v62  ;;  %v10703_v7 = vpack.c.bf16 %v13036_v36, %v13034_v8  ;;  %v13779_v34 = vand.u32 4294901760, %v12993_v26  ;;  %v13781_v62 = vand.u32 4294901760, %v13005_v47  ;;  %v189_v8 = vld [vmem:[#allocation7 + $0x420] sm:$0xff] }
 0x1cd   :  { %10738 = vmatprep.subr.bf16.mxu0 %v10737_v28  ;;  %8380 = vmatmul.mubr.f32.vlgmr.msra.gmra.mrb[14].mxu0 %v11286_v12  ;;  %v8444_v28 = vand.u32 4294901760, %v8443_v22  ;;  %v88_v22 = vld [vmem:[#allocation7 + $0xf8] sm:$0xff]  ;;  %v13784_v26 = vand.u32 4294901760, %v13025_v33  ;;  %v13786_v47 = vand.u32 4294901760, %v12991_v51  ;;  %v13790_v51 = vand.u32 4294901760, %v13017_v38 }
 0x1ce   :  { %10740 = vmatpush1.bf16.msra.mxu0 %v10739_v41  ;;  %8500 = vmatprep.mubr.f32.mxu0 %v13699_v37  ;;  %v10749_v41 = vpack.c.bf16 %v13025_v33, %v13023_v60 }
 0x1cf   :  { %7750 = vmatpush1.msra.mxu1 %v13058_v4  ;;  %10742 = vmatprep.subr.bf16.mxu0 %v10741_v59  ;;  %v10751_v59 = vpack.c.bf16 %v13056_v5, %v13049_v1 }
 0x1d0   :  { %10690 = vmatprep.subr.bf16.mxu1 %v10689_v53  ;;  %7811 = vmatmul.mubr.f32.vlgmr.msra.gmra.mrb[14].mxu1 %v11286_v12 }
 0x1d1   :  { %10692 = vmatpush1.bf16.msra.mxu1 %v10691_v54  ;;  %7931 = vmatprep.mubr.f32.mxu1 %v13699_v37 }
 0x1d2   :  { %10694 = vmatprep.subr.bf16.mxu1 %v10693_v21  ;;  %10744 = vmatpush1.bf16.msra.mxu0 %v10743_v9  ;;  %v13780_v9 = vand.u32 4294901760, %v12997_v63  ;;  %v13785_v63 = vand.u32 4294901760, %v12985_v25  ;;  %v13789_v25 = vand.u32 4294901760, %v13015_v31  ;;  %v10719_v31 = vpack.c.bf16 %v7861_v44, %v7849_v3 }
 0x1d3   :  { %8439 = vmatprep.subr.mxu0 %v8438_v13  ;;  %v122_v13 = vld [vmem:[#allocation7 + $0x208] sm:$0xff] }
 0x1d4   :  { %v10761_v29 = vpack.c.bf16 %v13780_v9, %v13779_v34  ;;  %v123_v34 = vld [vmem:[#allocation7 + $0x210] sm:$0xff]  ;;  %v13792_v9 = vand.u32 4294901760, %v13056_v5 }
 0x1d5   :  { %10696 = vmatpush1.bf16.msra.mxu1 %v10695_v57  ;;  %v90_v57 = vld [vmem:[#allocation7 + $0x108] sm:$0xff]  ;;  %v9444_v5 = vand.u32 4294901760, %v123_v34 }
 0x1d6   :  { %7870 = vmatprep.subr.mxu1 %v7869_v14  ;;  %8445 = vmatpush1.msra.mxu0 %v8444_v28  ;;  %v13782_v14 = vand.u32 4294901760, %v13007_v49  ;;  %v10713_v49 = vpack.c.bf16 %v13786_v47, %v13785_v63  ;;  %v155_v47 = vld [vmem:[#allocation7 + $0x310] sm:$0xff] }
 0x1d7   :  { %10746 = vmatprep.subr.bf16.mxu0 %v10745_v61  ;;  %8502 = vmatmul.mubr.f32.vlgmr.msra.gmra.mrb[14].mxu0 %v11253_v43  ;;  %v124_v61 = vld [vmem:[#allocation7 + $0x218] sm:$0xff] }
 0x1d8   :  { %10748 = vmatpush1.bf16.msra.mxu0 %v10747_v40  ;;  %8592 = vmatprep.mubr.f32.mxu0 %v13699_v37  ;;  %v10763_v28 = vpack.c.bf16 %v13782_v14, %v13781_v62  ;;  %v87_v40 = vld [vmem:[#allocation7 + $0xf0] sm:$0xff]  ;;  %v9442_v33 = vand.u32 4294901760, %v124_v61  ;;  %v190_v14 = vld [vmem:[#allocation7 + $0x428] sm:$0xff] }
 0x1d9   :  { %7876 = vmatpush1.msra.mxu1 %v7875_v42  ;;  %10750 = vmatprep.subr.bf16.mxu0 %v10749_v41  ;;  %v121_v42 = vld [vmem:[#allocation7 + $0x200] sm:$0xff]  ;;  %v13783_v41 = vand.u32 4294901760, %v13023_v60  ;;  %v9438_v60 = vand.u32 4294901760, %v90_v57 }
 0x1da   :  { %10698 = vmatprep.subr.bf16.mxu1 %v10697_v56  ;;  %7933 = vmatmul.mubr.f32.vlgmr.msra.gmra.mrb[14].mxu1 %v11253_v43 }
 0x1db   :  { %10700 = vmatpush1.bf16.msra.mxu1 %v10699_v11  ;;  %8023 = vmatprep.mubr.f32.mxu1 %v13699_v37  ;;  %v10765_v56 = vpack.c.bf16 %v13784_v26, %v13783_v41  ;;  %v13787_v11 = vand.u32 4294901760, %v12999_v6  ;;  %v10717_v6 = vpack.c.bf16 %v13790_v51, %v13789_v25  ;;  %v192_v41 = vld [vmem:[#allocation7 + $0x438] sm:$0xff]  ;;  %v13272_v44 = vsub.f32 %v90_v57, %v9438_v60 }
 0x1dc   :  { %10702 = vmatprep.subr.bf16.mxu1 %v10701_v30  ;;  %10752 = vmatpush1.bf16.msra.mxu0 %v10751_v59  ;;  %v13788_v30 = vand.u32 4294901760, %v13001_v32  ;;  %v13791_v32 = vand.u32 4294901760, %v13049_v1  ;;  %v9450_v51 = vand.u32 4294901760, %v192_v41  ;;  %v8883_v57 = vand.u32 4294901760, %v189_v8 }
 0x1dd   :  { %8534 = vmatprep.subr.mxu0 %v13124_v15 }
 0x1de   :  { %v10715_v59 = vpack.c.bf16 %v13788_v30, %v13787_v11  ;;  %v10767_v62 = vpack.c.bf16 %v13792_v9, %v13791_v32  ;;  %v157_v11 = vld [vmem:[#allocation7 + $0x320] sm:$0xff]  ;;  %v191_v30 = vld [vmem:[#allocation7 + $0x430] sm:$0xff]  ;;  %v13286_v9 = vsub.f32 %v123_v34, %v9444_v5 }
 0x1df   :  { %10704 = vmatpush1.bf16.msra.mxu1 %v10703_v7  ;;  %v8869_v7 = vand.u32 4294901760, %v88_v22 }
 0x1e0   :  { %7965 = vmatprep.subr.mxu1 %v13149_v55  ;;  %8537 = vmatpush1.msra.mxu0 %v13093_v23  ;;  %v13304_v55 = vsub.f32 %v192_v41, %v9450_v51 }
 0x1e1   :  { %10754 = vmatprep.subr.bf16.mxu0 %v12987_v46  ;;  %8595 = vmatmul.mubr.f32.vlgmr.msra.gmra.mrb[14].mxu0 %v11264_v50  ;;  %v13264_v26 = vsub.f32 %v88_v22, %v8869_v7  ;;  %v13276_v22 = vsub.f32 %v124_v61, %v9442_v33  ;;  %v223_v61 = vld [vmem:[#allocation7 + $0x530] sm:$0x7] }
 0x1e2   :  { %v4312_v53 = vpop.f32.mrb[6].mxu0  ;;  %10756 = vmatpush1.bf16.msra.mxu0 %v13003_v35  ;;  %8675 = vmatprep.mubr.f32.mxu0 %v13699_v37 }
 0x1e3   :  { %7968 = vmatpush1.msra.mxu1 %v13072_v19  ;;  %10019 = vst [vmem:[#allocation8 + $0x70] sm:$0xff] %v4312_v53  ;;  %v4314_v54 = vpop.f32.mrb[7].mxu0  ;;  %10758 = vmatprep.subr.bf16.mxu0 %v13021_v2  ;;  %v8873_v53 = vand.u32 4294901760, %v122_v13  ;;  %v13689_v19 = vand.u32 4294901760, %v13276_v22 }
 0x1e4   :  { %10706 = vmatprep.subr.bf16.mxu1 %v12982_v20  ;;  %8026 = vmatmul.mubr.f32.vlgmr.msra.gmra.mrb[14].mxu1 %v11264_v50  ;;  %10020 = vst [vmem:[#allocation8 + $0x78] sm:$0xff] %v4314_v54  ;;  %v8871_v54 = vand.u32 4294901760, %v87_v40 }
 0x1e5   :  { %v3743_v21 = vpop.f32.mrb[6].mxu1  ;;  %10708 = vmatpush1.bf16.msra.mxu1 %v12989_v48  ;;  %8106 = vmatprep.mubr.f32.mxu1 %v13699_v37  ;;  %v13261_v38 = vpack.c.bf16 %v8873_v53, %v8869_v7  ;;  %v13270_v36 = vsub.f32 %v122_v13, %v8873_v53  ;;  %v8879_v13 = vand.u32 4294901760, %v155_v47  ;;  %v224_v53 = vld [vmem:[#allocation7 + $0x538] sm:$0x7] }
 0x1e6   :  { %10017 = vst [vmem:[#allocation8 + $0x60] sm:$0xff] %v3743_v21  ;;  %v3745_v27 = vpop.f32.mrb[7].mxu1  ;;  %10710 = vmatprep.subr.bf16.mxu1 %v13013_v52  ;;  %10760 = vmatpush1.bf16.msra.mxu0 %v13042_v18  ;;  %v8875_v21 = vand.u32 4294901760, %v121_v42  ;;  %v13278_v7 = vsub.f32 %v87_v40, %v8871_v54  ;;  %v13307_v23 = vsel %vm231_vm0, %v224_v53, 0 }
 0x1e7   :  { %10018 = vst [vmem:[#allocation8 + $0x68] sm:$0xff] %v3745_v27  ;;  %8618 = vmatprep.subr.mxu0 %v13064_v24  ;;  %v89_v27 = vld [vmem:[#allocation7 + $0x100] sm:$0xff] }
 0x1e8   :  { %v9440_v1 = vand.u32 4294901760, %v89_v27  ;;  %v13268_v63 = vpack.c.bf16 %v8875_v21, %v8871_v54  ;;  %v13280_v32 = vsub.f32 %v121_v42, %v8875_v21  ;;  %v226_v54 = vld [vmem:[#allocation7 + $0x548] sm:$0x7]  ;;  %v225_v21 = vld [vmem:[#allocation7 + $0x540] sm:$0x7] }
 0x1e9   :  { %10712 = vmatpush1.bf16.msra.mxu1 %v13032_v16 }
 0x1ea   :  { %8049 = vmatprep.subr.mxu1 %v13115_v45  ;;  %8620 = vmatpush1.msra.mxu0 %v13066_v39 }
 0x1eb   :  { %10762 = vmatprep.subr.bf16.mxu0 %v10761_v29  ;;  %8679 = vmatmul.mubr.f32.vlgmr.msra.gmra.mrb[14].mxu0 %v11272_v58  ;;  %v156_v29 = vld [vmem:[#allocation7 + $0x318] sm:$0xff] }
 0x1ec   :  { %10764 = vmatpush1.bf16.msra.mxu0 %v10763_v28  ;;  %8779 = vmatprep.mubr.f32.mxu0 %v13699_v37  ;;  %v158_v28 = vld [vmem:[#allocation7 + $0x328] sm:$0xff]  ;;  %v8877_v3 = vand.u32 4294901760, %v156_v29 }
 0x1ed   :  { %8051 = vmatpush1.msra.mxu1 %v13058_v4  ;;  %10766 = vmatprep.subr.bf16.mxu0 %v10765_v56  ;;  %v13266_v56 = vpack.c.bf16 %v9442_v33, %v9438_v60  ;;  %v9446_v25 = vand.u32 4294901760, %v158_v28  ;;  %v13284_v60 = vsub.f32 %v89_v27, %v9440_v1 }
 0x1ee   :  { %10714 = vmatprep.subr.bf16.mxu1 %v10713_v49  ;;  %8110 = vmatmul.mubr.f32.vlgmr.msra.gmra.mrb[14].mxu1 %v11272_v58  ;;  %v8881_v49 = vand.u32 4294901760, %v190_v14  ;;  %v13294_v42 = vsub.f32 %v156_v29, %v8877_v3  ;;  %v323_v29 = vsel %vm231_vm0, %v223_v61, 0 }
 0x1ef   :  { %10716 = vmatpush1.bf16.msra.mxu1 %v10715_v59  ;;  %8210 = vmatprep.mubr.f32.mxu1 %v13699_v37  ;;  %v13793_v59 = vand.u32 4294901760, %v13124_v15  ;;  %v9448_v15 = vand.u32 4294901760, %v157_v11  ;;  %v13300_v27 = vpack.c.bf16 %v9450_v51, %v9446_v25  ;;  %v13302_v34 = vsub.f32 %v158_v28, %v9446_v25 }
 0x1f0   :  { %10718 = vmatprep.subr.bf16.mxu1 %v10717_v6  ;;  %10768 = vmatpush1.bf16.msra.mxu0 %v10767_v62  ;;  %v13282_v6 = vpack.c.bf16 %v9444_v5, %v9440_v1  ;;  %v9452_v62 = vand.u32 4294901760, %v191_v30  ;;  %v13292_v40 = vpack.c.bf16 %v8881_v49, %v8877_v3  ;;  %v13296_v33 = vsub.f32 %v190_v14, %v8881_v49 }
 0x1f1   :  { %8720 = vmatprep.subr.mxu0 %v13793_v59  ;;  %v13680_v1 = vand.u32 4294901760, %v13264_v26  ;;  %v13328_v5 = vsub.f32 %v157_v11, %v9448_v15  ;;  %v13690_v28 = vand.u32 4294901760, %v13272_v44  ;;  %v13337_v41 = vand.u32 4294901760, %v323_v29 }
 0x1f2   :  { %v13321_v14 = vpack.c.bf16 %v9452_v62, %v9448_v15  ;;  %v13677_v49 = vand.u32 4294901760, %v13280_v32  ;;  %v13684_v51 = vand.u32 4294901760, %v13294_v42  ;;  %v13683_v15 = vand.u32 4294901760, %v13296_v33 }
 0x1f3   :  { %10720 = vmatpush1.bf16.msra.mxu1 %v10719_v31  ;;  %v332_v31 = vsel %vm231_vm0, %v226_v54, 0  ;;  %v13351_v11 = vsub.f32 %v323_v29, %v13337_v41  ;;  %v9527_v59 = vsub.f32 %v13272_v44, %v13690_v28  ;;  %v13685_v61 = vand.u32 4294901760, %v13328_v5 }
 0x1f4   :  { %8151 = vmatprep.subr.mxu1 %v7867_v17  ;;  %8724 = vmatpush1.msra.mxu0 %v8442_v10  ;;  %v13311_v17 = vpack.c.bf16 %v8883_v57, %v8879_v13  ;;  %v13313_v10 = vsub.f32 %v155_v47, %v8879_v13  ;;  %v13686_v47 = vand.u32 4294901760, %v13286_v9 }
 0x1f5   :  { %10770 = vmatprep.subr.bf16.mxu0 %v12987_v46  ;;  %8781 = vmatmul.mubr.f32.vlgmr.msra.gmra.mrb[14].mxu0 %v11253_v43  ;;  %v13315_v46 = vsub.f32 %v189_v8, %v8883_v57  ;;  %v13343_v8 = vand.u32 4294901760, %v332_v31 }
 0x1f6   :  { %10772 = vmatpush1.bf16.msra.mxu0 %v13003_v35  ;;  %8861 = vmatprep.mubr.f32.mxu0 %v13699_v37  ;;  %v329_v35 = vsel %vm231_vm0, %v225_v21, 0  ;;  %v9545_v53 = vsub.f32 %v13286_v9, %v13686_v47 }
 0x1f7   :  { %8155 = vmatpush1.msra.mxu1 %v7873_v0  ;;  %10774 = vmatprep.subr.bf16.mxu0 %v13021_v2  ;;  %v13688_v2 = vand.u32 4294901760, %v13284_v60  ;;  %v13335_v0 = vsub.f32 %v191_v30, %v9452_v62  ;;  %v13345_v3 = vand.u32 4294901760, %v329_v35  ;;  %v13356_v30 = vsub.f32 %v13264_v26, %v13680_v1 }
 0x1f8   :  { %10722 = vmatprep.subr.bf16.mxu1 %v12982_v20  ;;  %8212 = vmatmul.mubr.f32.vlgmr.msra.gmra.mrb[14].mxu1 %v11253_v43  ;;  %v13679_v20 = vand.u32 4294901760, %v13270_v36  ;;  %v8976_v62 = vsub.f32 %v13280_v32, %v13677_v49  ;;  %v13403_v29 = vsub.f32 %v332_v31, %v13343_v8  ;;  %v9546_v1 = vand.u32 4294901760, %v9545_v53 }
 0x1f9   :  { %10724 = vmatpush1.bf16.msra.mxu1 %v12989_v48  ;;  %8292 = vmatprep.mubr.f32.mxu1 %v13699_v37  ;;  %v13678_v48 = vand.u32 4294901760, %v13278_v7  ;;  %v9533_v25 = vsub.f32 %v13284_v60, %v13688_v2  ;;  %v13372_v13 = vsub.f32 %v329_v35, %v13345_v3  ;;  %v13687_v54 = vand.u32 4294901760, %v13335_v0 }
 0x1fa   :  { %10726 = vmatprep.subr.bf16.mxu1 %v13013_v52  ;;  %10776 = vmatpush1.bf16.msra.mxu0 %v13042_v18  ;;  %v13682_v52 = vand.u32 4294901760, %v13302_v34  ;;  %v13681_v18 = vand.u32 4294901760, %v13304_v55  ;;  %v8970_v57 = vsub.f32 %v13270_v36, %v13679_v20  ;;  %v9528_v35 = vand.u32 4294901760, %v9527_v59 }
 0x1fb   :  { %8804 = vmatprep.subr.mxu0 %v13064_v24  ;;  %v9539_v24 = vsub.f32 %v13276_v22, %v13689_v19  ;;  %v8982_v20 = vsub.f32 %v13294_v42, %v13684_v51  ;;  %v8994_v31 = vsub.f32 %v13296_v33, %v13683_v15  ;;  %v8959_v59 = vand.u32 4294901760, %v13356_v30 }
 0x1fc   :  { %v9563_v21 = vsub.f32 %v13304_v55, %v13681_v18  ;;  %v8987_v18 = vand.u32 4294901760, %v13313_v10  ;;  %v8971_v53 = vand.u32 4294901760, %v8970_v57 }
 0x1fd   :  { %10728 = vmatpush1.bf16.msra.mxu1 %v13032_v16  ;;  %v8964_v16 = vsub.f32 %v13278_v7, %v13678_v48  ;;  %v9540_v49 = vand.u32 4294901760, %v9539_v24  ;;  %v9534_v48 = vand.u32 4294901760, %v9533_v25  ;;  %v9569_v24 = vsub.f32 %v13335_v0, %v13687_v54 }
 0x1fe   :  { %8235 = vmatprep.subr.mxu1 %v13115_v45  ;;  %8806 = vmatpush1.msra.mxu0 %v13066_v39  ;;  %v13394_v45 = vand.u32 4294901760, %v13307_v23  ;;  %v9551_v39 = vsub.f32 %v13302_v34, %v13682_v52  ;;  %v8999_v52 = vand.u32 4294901760, %v13315_v46  ;;  %v9564_v51 = vand.u32 4294901760, %v9563_v21 }
 0x1ff   :  { %8863 = vmatmul.mubr.f32.vlgmr.msra.gmra.mrb[14].mxu0 %v11253_v43  ;;  %10826 = vmatprep.subr.bf16.mxu0 %v13266_v56  ;;  %v8965_v47 = vand.u32 4294901760, %v8964_v16  ;;  %v8977_v54 = vand.u32 4294901760, %v8976_v62  ;;  %v8983_v2 = vand.u32 4294901760, %v8982_v20  ;;  %v8995_v19 = vand.u32 4294901760, %v8994_v31 }
 0x200   :  { %10828 = vmatpush1.bf16.msra.mxu0 %v13282_v6  ;;  %9512 = vmatprep.mubr.f32.mxu0 %v13699_v37  ;;  %v13428_v25 = vsub.f32 %v13307_v23, %v13394_v45  ;;  %v9552_v15 = vand.u32 4294901760, %v9551_v39  ;;  %v10835_v23 = vpack.c.bf16 %v9546_v1, %v9534_v48  ;;  %v8988_v57 = vsub.f32 %v13313_v10, %v8987_v18 }
 0x201   :  { %8237 = vmatpush1.msra.mxu1 %v13058_v4  ;;  %10830 = vmatprep.subr.bf16.mxu0 %v13300_v27  ;;  %v9557_v4 = vsub.f32 %v13328_v5, %v13685_v61  ;;  %v10833_v61 = vpack.c.bf16 %v9540_v49, %v9528_v35  ;;  %v9000_v39 = vsub.f32 %v13315_v46, %v8999_v52  ;;  %v9570_v28 = vand.u32 4294901760, %v9569_v24 }
 0x202   :  { %8294 = vmatmul.mubr.f32.vlgmr.msra.gmra.mrb[14].mxu1 %v11253_v43  ;;  %10778 = vmatprep.subr.bf16.mxu1 %v13261_v38  ;;  %v9005_v30 = vand.u32 4294901760, %v13428_v25  ;;  %v9580_v49 = vand.u32 4294901760, %v13372_v13  ;;  %v10837_v20 = vpack.c.bf16 %v9564_v51, %v9552_v15  ;;  %v13794_v1 = vand.u32 4294901760, %v13403_v29 }
 0x203   :  { %10780 = vmatpush1.bf16.msra.mxu1 %v13268_v63  ;;  %8943 = vmatprep.mubr.f32.mxu1 %v13699_v37  ;;  %v9558_v21 = vand.u32 4294901760, %v9557_v4  ;;  %v10785_v16 = vpack.c.bf16 %v8971_v53, %v8959_v59  ;;  %v10787_v62 = vpack.c.bf16 %v8977_v54, %v8965_v47  ;;  %v10789_v35 = vpack.c.bf16 %v8995_v19, %v8983_v2 }
 0x204   :  { %10782 = vmatprep.subr.bf16.mxu1 %v13292_v40  ;;  %10832 = vmatpush1.bf16.msra.mxu0 %v13321_v14  ;;  %v9575_v48 = vsub.f32 %v13403_v29, %v13794_v1  ;;  %v8989_v31 = vand.u32 4294901760, %v8988_v57  ;;  %v9001_v4 = vand.u32 4294901760, %v9000_v39  ;;  %v9011_v24 = vand.u32 4294901760, %v13351_v11 }
 0x205   :  { %9455 = vmatprep.subr.mxu0 %v13343_v8  ;;  %v10839_v51 = vpack.c.bf16 %v9570_v28, %v9558_v21  ;;  %v9006_v15 = vsub.f32 %v13428_v25, %v9005_v30  ;;  %v9581_v1 = vsub.f32 %v13372_v13, %v9580_v49  ;;  %v10841_v54 = vpack.c.bf16 %v13276_v22, %v13272_v44 }
 0x206   :  { %v9576_v19 = vand.u32 4294901760, %v9575_v48  ;;  %v10791_v2 = vpack.c.bf16 %v9001_v4, %v8989_v31  ;;  %v9012_v28 = vsub.f32 %v13351_v11, %v9011_v24  ;;  %v10843_v59 = vpack.c.bf16 %v13286_v9, %v13284_v60 }
 0x207   :  { %10784 = vmatpush1.bf16.msra.mxu1 %v13311_v17  ;;  %v9007_v47 = vand.u32 4294901760, %v9006_v15  ;;  %v10845_v53 = vpack.c.bf16 %v13304_v55, %v13302_v34  ;;  %v10795_v57 = vpack.c.bf16 %v13280_v32, %v13278_v7  ;;  %v10797_v39 = vpack.c.bf16 %v13296_v33, %v13294_v42 }
 0x208   :  { %8886 = vmatprep.subr.mxu1 %v13394_v45  ;;  %9457 = vmatpush1.msra.mxu0 %v13345_v3  ;;  %v10847_v21 = vpack.c.bf16 %v13335_v0, %v13328_v5  ;;  %v13795_v31 = vand.u32 4294901760, %v13272_v44  ;;  %v13796_v4 = vand.u32 4294901760, %v13276_v22  ;;  %v13798_v15 = vand.u32 4294901760, %v13286_v9 }
 0x209   :  { %10834 = vmatprep.subr.bf16.mxu0 %v10833_v61  ;;  %9518 = vmatmul.mubr.f32.vlgmr.msra.gmra.mrb[16].mxu0 %v11286_v12  ;;  %v9582_v61 = vand.u32 4294901760, %v9581_v1  ;;  %v13801_v44 = vand.u32 4294901760, %v13264_v26  ;;  %v13802_v22 = vand.u32 4294901760, %v13270_v36  ;;  %v13804_v9 = vand.u32 4294901760, %v13280_v32 }
 0x20a   :  { %10836 = vmatpush1.bf16.msra.mxu0 %v10835_v23  ;;  %9638 = vmatprep.mubr.f32.mxu0 %v13699_v37  ;;  %v10793_v23 = vpack.c.bf16 %v13270_v36, %v13264_v26  ;;  %v13808_v26 = vand.u32 4294901760, %v13335_v0  ;;  %v13809_v32 = vand.u32 4294901760, %v13403_v29 }
 0x20b   :  { %8888 = vmatpush1.msra.mxu1 %v13337_v41  ;;  %10838 = vmatprep.subr.bf16.mxu0 %v10837_v20  ;;  %v10799_v20 = vpack.c.bf16 %v13315_v46, %v13313_v10 }
 0x20c   :  { %10786 = vmatprep.subr.bf16.mxu1 %v10785_v16  ;;  %8949 = vmatmul.mubr.f32.vlgmr.msra.gmra.mrb[16].mxu1 %v11286_v12  ;;  %v9013_v12 = vand.u32 4294901760, %v9012_v28 }
 0x20d   :  { %10788 = vmatpush1.bf16.msra.mxu1 %v10787_v62  ;;  %9069 = vmatprep.mubr.f32.mxu1 %v13699_v37 }
 0x20e   :  { %10790 = vmatprep.subr.bf16.mxu1 %v10789_v35  ;;  %10840 = vmatpush1.bf16.msra.mxu0 %v10839_v51  ;;  %v13797_v51 = vand.u32 4294901760, %v13284_v60  ;;  %v13803_v60 = vand.u32 4294901760, %v13278_v7  ;;  %v10815_v7 = vpack.c.bf16 %v8999_v52, %v8987_v18 }
 0x20f   :  { %9577 = vmatprep.subr.mxu0 %v9576_v19  ;;  %v13799_v19 = vand.u32 4294901760, %v13302_v34  ;;  %v13805_v34 = vand.u32 4294901760, %v13294_v42 }
 0x210   :  { %v10859_v1 = vpack.c.bf16 %v13798_v15, %v13797_v51 }
 0x211   :  { %10792 = vmatpush1.bf16.msra.mxu1 %v10791_v2  ;;  %v13800_v2 = vand.u32 4294901760, %v13304_v55  ;;  %v13806_v55 = vand.u32 4294901760, %v13296_v33 }
 0x212   :  { %9008 = vmatprep.subr.mxu1 %v9007_v47  ;;  %9583 = vmatpush1.msra.mxu0 %v9582_v61  ;;  %v10809_v47 = vpack.c.bf16 %v13802_v22, %v13801_v44  ;;  %v10811_v61 = vpack.c.bf16 %v13804_v9, %v13803_v60 }
 0x213   :  { %10842 = vmatprep.subr.bf16.mxu0 %v10841_v54  ;;  %9640 = vmatmul.mubr.f32.vlgmr.msra.gmra.mrb[16].mxu0 %v11253_v43  ;;  %v10861_v28 = vpack.c.bf16 %v13800_v2, %v13799_v19  ;;  %v10813_v54 = vpack.c.bf16 %v13806_v55, %v13805_v34 }
 0x214   :  { %10844 = vmatpush1.bf16.msra.mxu0 %v10843_v59  ;;  %9730 = vmatprep.mubr.f32.mxu0 %v13699_v37  ;;  %v13807_v59 = vand.u32 4294901760, %v13328_v5 }
 0x215   :  { %9014 = vmatpush1.msra.mxu1 %v9013_v12  ;;  %10846 = vmatprep.subr.bf16.mxu0 %v10845_v53 }
 0x216   :  { %10794 = vmatprep.subr.bf16.mxu1 %v10793_v23  ;;  %9071 = vmatmul.mubr.f32.vlgmr.msra.gmra.mrb[16].mxu1 %v11253_v43  ;;  %v10863_v36 = vpack.c.bf16 %v13808_v26, %v13807_v59 }
 0x217   :  { %10796 = vmatpush1.bf16.msra.mxu1 %v10795_v57  ;;  %9161 = vmatprep.mubr.f32.mxu1 %v13699_v37 }
 0x218   :  { %10798 = vmatprep.subr.bf16.mxu1 %v10797_v39  ;;  %10848 = vmatpush1.bf16.msra.mxu0 %v10847_v21 }
 0x219   :  { %9672 = vmatprep.subr.mxu0 %v13403_v29 }
 0x21b   :  { %10800 = vmatpush1.bf16.msra.mxu1 %v10799_v20 }
 0x21c   :  { %9103 = vmatprep.subr.mxu1 %v13428_v25  ;;  %9675 = vmatpush1.msra.mxu0 %v13372_v13 }
 0x21d   :  { %10850 = vmatprep.subr.bf16.mxu0 %v13266_v56  ;;  %9733 = vmatmul.mubr.f32.vlgmr.msra.gmra.mrb[16].mxu0 %v11264_v50 }
 0x21e   :  { %v5450_v48 = vpop.f32.mrb[8].mxu0  ;;  %10852 = vmatpush1.bf16.msra.mxu0 %v13282_v6  ;;  %9813 = vmatprep.mubr.f32.mxu0 %v13699_v37 }
 0x21f   :  { %9106 = vmatpush1.msra.mxu1 %v13351_v11  ;;  %10023 = vst [vmem:[#allocation8 + $0x90] sm:$0xff] %v5450_v48  ;;  %v5452_v16 = vpop.f32.mrb[9].mxu0  ;;  %10854 = vmatprep.subr.bf16.mxu0 %v13300_v27 }
 0x220   :  { %10802 = vmatprep.subr.bf16.mxu1 %v13261_v38  ;;  %9164 = vmatmul.mubr.f32.vlgmr.msra.gmra.mrb[16].mxu1 %v11264_v50  ;;  %10024 = vst [vmem:[#allocation8 + $0x98] sm:$0xff] %v5452_v16  ;;  %v10857_v50 = vpack.c.bf16 %v13796_v4, %v13795_v31 }
 0x221   :  { %v4881_v62 = vpop.f32.mrb[8].mxu1  ;;  %10804 = vmatpush1.bf16.msra.mxu1 %v13268_v63  ;;  %9244 = vmatprep.mubr.f32.mxu1 %v13699_v37 }
 0x222   :  { %10021 = vst [vmem:[#allocation8 + $0x80] sm:$0xff] %v4881_v62  ;;  %v4883_v35 = vpop.f32.mrb[9].mxu1  ;;  %10806 = vmatprep.subr.bf16.mxu1 %v13292_v40  ;;  %10856 = vmatpush1.bf16.msra.mxu0 %v13321_v14 }
 0x223   :  { %10022 = vst [vmem:[#allocation8 + $0x88] sm:$0xff] %v4883_v35  ;;  %9756 = vmatprep.subr.mxu0 %v13343_v8 }
 0x225   :  { %10808 = vmatpush1.bf16.msra.mxu1 %v13311_v17 }
 0x226   :  { %9187 = vmatprep.subr.mxu1 %v13394_v45  ;;  %9758 = vmatpush1.msra.mxu0 %v13345_v3 }
 0x227   :  { %10858 = vmatprep.subr.bf16.mxu0 %v10857_v50  ;;  %9817 = vmatmul.mubr.f32.vlgmr.msra.gmra.mrb[16].mxu0 %v11272_v58 }
 0x228   :  { %10860 = vmatpush1.bf16.msra.mxu0 %v10859_v1  ;;  %9917 = vmatprep.mubr.f32.mxu0 %v13699_v37 }
 0x229   :  { %9189 = vmatpush1.msra.mxu1 %v13337_v41  ;;  %10862 = vmatprep.subr.bf16.mxu0 %v10861_v28 }
 0x22a   :  { %10810 = vmatprep.subr.bf16.mxu1 %v10809_v47  ;;  %9248 = vmatmul.mubr.f32.vlgmr.msra.gmra.mrb[16].mxu1 %v11272_v58 }
 0x22b   :  { %10812 = vmatpush1.bf16.msra.mxu1 %v10811_v61  ;;  %9348 = vmatprep.mubr.f32.mxu1 %v13699_v37 }
 0x22c   :  { %10814 = vmatprep.subr.bf16.mxu1 %v10813_v54  ;;  %10864 = vmatpush1.bf16.msra.mxu0 %v10863_v36 }
 0x22d   :  { %9858 = vmatprep.subr.mxu0 %v13809_v32 }
 0x22f   :  { %10816 = vmatpush1.bf16.msra.mxu1 %v10815_v7 }
 0x230   :  { %9289 = vmatprep.subr.mxu1 %v9005_v30  ;;  %9862 = vmatpush1.msra.mxu0 %v9580_v49 }
 0x231   :  { %10866 = vmatprep.subr.bf16.mxu0 %v13266_v56  ;;  %9919 = vmatmul.mubr.f32.vlgmr.msra.gmra.mrb[16].mxu0 %v11253_v43 }
 0x232   :  { %10868 = vmatpush1.bf16.msra.mxu0 %v13282_v6  ;;  %9999 = vmatprep.mubr.f32.mxu0 %v13699_v37  ;;  %v53_v6 = vld [vmem:[#allocation2 + $0x8] sm:$0xff] }
 0x233   :  { %9293 = vmatpush1.msra.mxu1 %v9011_v24  ;;  %10870 = vmatprep.subr.bf16.mxu0 %v13300_v27  ;;  %55 = vst [vmem:[#allocation8 + $0x8] sm:$0xff] %v53_v6 }
 0x234   :  { %10818 = vmatprep.subr.bf16.mxu1 %v13261_v38  ;;  %9350 = vmatmul.mubr.f32.vlgmr.msra.gmra.mrb[16].mxu1 %v11253_v43 }
 0x235   :  { %10820 = vmatpush1.bf16.msra.mxu1 %v13268_v63  ;;  %9430 = vmatprep.mubr.f32.mxu1 %v13699_v37  ;;  %v52_v63 = vld [vmem:[#allocation2] sm:$0xff] }
 0x236   :  { %10822 = vmatprep.subr.bf16.mxu1 %v13292_v40  ;;  %10872 = vmatpush1.bf16.msra.mxu0 %v13321_v14  ;;  %54 = vst [vmem:[#allocation8] sm:$0xff] %v52_v63 }
 0x237   :  { %9942 = vmatprep.subr.mxu0 %v13343_v8 }
 0x239   :  { %10824 = vmatpush1.bf16.msra.mxu1 %v13311_v17 }
 0x23a   :  { %9373 = vmatprep.subr.mxu1 %v13394_v45  ;;  %9944 = vmatpush1.msra.mxu0 %v13345_v3 }
 0x23b   :  { %10001 = vmatmul.mubr.f32.vlgmr.msra.gmra.mrb[16].mxu0 %v11253_v43 }
 0x23d   :  { %9375 = vmatpush1.msra.mxu1 %v13337_v41 }
 0x23e   :  { %9432 = vmatmul.mubr.f32.vlgmr.msra.gmra.mrb[16].mxu1 %v11253_v43 }
 0x25a   :  { %v6588_v58 = vpop.f32.mrb[10].mxu0 }
 0x25b   :  { %10027 = vst [vmem:[#allocation8 + $0xb0] sm:$0xff] %v6588_v58  ;;  %v6590_v37 = vpop.f32.mrb[11].mxu0 }
 0x25c   :  { %10028 = vst [vmem:[#allocation8 + $0xb8] sm:$0xff] %v6590_v37 }
 0x25d   :  { %v6019_v38 = vpop.f32.mrb[10].mxu1 }
 0x25e   :  { %10025 = vst [vmem:[#allocation8 + $0xa0] sm:$0xff] %v6019_v38  ;;  %v6021_v56 = vpop.f32.mrb[11].mxu1 }
 0x25f   :  { %10026 = vst [vmem:[#allocation8 + $0xa8] sm:$0xff] %v6021_v56 }
 0x296   :  { %v7726_v40 = vpop.f32.mrb[12].mxu0 }
 0x297   :  { %10031 = vst [vmem:[#allocation8 + $0xd0] sm:$0xff] %v7726_v40  ;;  %v7728_v42 = vpop.f32.mrb[13].mxu0 }
 0x298   :  { %10032 = vst [vmem:[#allocation8 + $0xd8] sm:$0xff] %v7728_v42 }
 0x299   :  { %v7157_v33 = vpop.f32.mrb[12].mxu1 }
 0x29a   :  { %10029 = vst [vmem:[#allocation8 + $0xc0] sm:$0xff] %v7157_v33  ;;  %v7159_v27 = vpop.f32.mrb[13].mxu1 }
 0x29b   :  { %10030 = vst [vmem:[#allocation8 + $0xc8] sm:$0xff] %v7159_v27 }
 0x2d2   :  { %v8864_v43 = vpop.f32.mrb[14].mxu0 }
 0x2d3   :  { %10035 = vst [vmem:[#allocation8 + $0xf0] sm:$0xff] %v8864_v43  ;;  %v8866_v17 = vpop.f32.mrb[15].mxu0 }
 0x2d4   :  { %10036 = vst [vmem:[#allocation8 + $0xf8] sm:$0xff] %v8866_v17 }
 0x2d5   :  { %v8295_v10 = vpop.f32.mrb[14].mxu1 }
 0x2d6   :  { %10033 = vst [vmem:[#allocation8 + $0xe0] sm:$0xff] %v8295_v10  ;;  %v8297_v46 = vpop.f32.mrb[15].mxu1 }
 0x2d7   :  { %10034 = vst [vmem:[#allocation8 + $0xe8] sm:$0xff] %v8297_v46 }
 0x30e   :  { %v10002_v14 = vpop.f32.mrb[16].mxu0 }
 0x30f   :  { %10039 = vst [vmem:[#allocation8 + $0x110] sm:$0xff] %v10002_v14  ;;  %v10004_v5 = vpop.f32.mrb[17].mxu0 }
 0x310   :  { %10040 = vst [vmem:[#allocation8 + $0x118] sm:$0xff] %v10004_v5 }
 0x311   :  { %v9433_v0 = vpop.f32.mrb[16].mxu1 }
 0x312   :  { %10037 = vst [vmem:[#allocation8 + $0x100] sm:$0xff] %v9433_v0  ;;  %v9435_v41 = vpop.f32.mrb[17].mxu1 }
 0x313   :  { %10038 = vst [vmem:[#allocation8 + $0x108] sm:$0xff] %v9435_v41 }
 0x314   :  { %11127 = shalt.err (!%p11124_p0)
}
 0x315   :  { %s11128_s25 = scalar_lea.hbm %s13582_s3, 4608 }
 0x316   :  { %p11129_p1 = scmp.ne.s32.totalorder %s13582_s3, %s11128_s25  ;;  %p11132_p2 = scmp.lt.u32.totalorder %s11128_s25, %s13582_s3 }
 0x318   :  { %p11134_p3 = pnand %p11132_p2, %p11129_p1 }
 0x31a   :  { %11137 = shalt.err (!%p11134_p3)
}
 0x31b   :  { %10050 = dma.vmem_to_hbm [thread:$0]  %s10048_s21, 4608, %s13582_s3, [#allocation4]  }
 0x31c   :  { %11142 = dma.done.wait [#allocation4], 4608  }
 0x31d   :  { %11143 = vsyncadd [#allocation4], 4294962688 }
 0x31e   :  { %10054 = vsyncpa [#allocation3], 1 }
 0x31f   :  { %10055 = vsyncpa [#allocation6], 1 }
 0x320   :  { %10056 = vsyncpa [#allocation4], 1 }

</bundles_post_ra>
